<compile_context>
chip_gen: v5e
topology: v5e:2x2
jax: 0.10.0
libtpu: 0.0.40
codegen_flags: <defaults>
</compile_context>

<pallas_src>
import functools

import jax
import jax.numpy as jnp
from jax.experimental import pallas as pl
from jax.experimental.pallas import tpu as pltpu


# ---------------------------------------------------------------------------
# Pallas kernels
# ---------------------------------------------------------------------------

def _linear_kernel(x_ref, w_ref, b_ref, o_ref):
    """out = x @ W + b  (one row-tile per grid step; W, b VMEM-resident)."""
    o_ref[...] = (
        jnp.dot(x_ref[...], w_ref[...], preferred_element_type=jnp.float32)
        + b_ref[...]
    )


def _head_kernel(x_ref, w1_ref, b1_ref, w2_ref, b2_ref, w3_ref, b3_ref, o_ref):
    """Fused FC head: relu(fc1) -> relu(fc1_5) -> relu(fc2) -> softmax(dim=1)."""
    h = jnp.dot(x_ref[...], w1_ref[...], preferred_element_type=jnp.float32) + b1_ref[...]
    h = jnp.maximum(h, 0.0)
    h = jnp.dot(h, w2_ref[...], preferred_element_type=jnp.float32) + b2_ref[...]
    h = jnp.maximum(h, 0.0)
    h = jnp.dot(h, w3_ref[...], preferred_element_type=jnp.float32) + b3_ref[...]
    h = jnp.maximum(h, 0.0)
    # softmax over the class (lane) axis
    m = jnp.max(h, axis=-1, keepdims=True)
    e = jnp.exp(h - m)
    o_ref[...] = e / jnp.sum(e, axis=-1, keepdims=True)


# ---------------------------------------------------------------------------
# Pallas wrappers
# ---------------------------------------------------------------------------

def _linear_pallas(x, w, b, row_tile=256):
    """(R, K) @ (K, N) + (1, N) with a row grid; weights stay VMEM-resident."""
    R, K = x.shape
    N = w.shape[1]
    tr = R if R <= row_tile else row_tile          # full-dim or 8-aligned tile
    grid = (pl.cdiv(R, tr),)
    return pl.pallas_call(
        _linear_kernel,
        out_shape=jax.ShapeDtypeStruct((R, N), jnp.float32),
        grid=grid,
        in_specs=[
            pl.BlockSpec((tr, K), lambda i: (i, 0)),
            pl.BlockSpec((K, N), lambda i: (0, 0)),   # resident across steps
            pl.BlockSpec((1, N), lambda i: (0, 0)),   # resident across steps
        ],
        out_specs=pl.BlockSpec((tr, N), lambda i: (i, 0)),
        compiler_params=pltpu.CompilerParams(dimension_semantics=("parallel",)),
    )(x, w, b)


def _head_pallas(x, w1, b1, w2, b2, w3, b3, row_tile=128):
    """Fused FC head, gridded over batch tiles with resident weights."""
    B, D = x.shape
    N = w3.shape[1]
    tb = B if B <= row_tile else row_tile
    grid = (pl.cdiv(B, tb),)
    return pl.pallas_call(
        _head_kernel,
        out_shape=jax.ShapeDtypeStruct((B, N), jnp.float32),
        grid=grid,
        in_specs=[
            pl.BlockSpec((tb, D), lambda i: (i, 0)),
            pl.BlockSpec(w1.shape, lambda i: (0, 0)),
            pl.BlockSpec(b1.shape, lambda i: (0, 0)),
            pl.BlockSpec(w2.shape, lambda i: (0, 0)),
            pl.BlockSpec(b2.shape, lambda i: (0, 0)),
            pl.BlockSpec(w3.shape, lambda i: (0, 0)),
            pl.BlockSpec(b3.shape, lambda i: (0, 0)),
        ],
        out_specs=pl.BlockSpec((tb, N), lambda i: (i, 0)),
        compiler_params=pltpu.CompilerParams(dimension_semantics=("parallel",)),
    )(x, w1, b1, w2, b2, w3, b3)


# ---------------------------------------------------------------------------
# im2col layout plumbing (zero FLOPs, runs as jnp in the jitted wrapper)
# ---------------------------------------------------------------------------

def _im2col(x_nhwc, kh, kw):
    """(B,H,W,C) -> patches (B*Ho*Wo, kh*kw*C); feature order = (dy, dx, c)."""
    B, H, W, C = x_nhwc.shape
    ho, wo = H - kh + 1, W - kw + 1
    cols = [x_nhwc[:, dy:dy + ho, dx:dx + wo, :]
            for dy in range(kh) for dx in range(kw)]
    p = jnp.concatenate(cols, axis=-1)              # (B, Ho, Wo, kh*kw*C)
    return p.reshape(B * ho * wo, kh * kw * C), ho, wo


def _conv_w_to_col(w):
    """PyTorch (Cout, Cin, KH, KW) -> (KH*KW*Cin, Cout), matching _im2col order."""
    cout, cin, kh, kw = w.shape
    return jnp.transpose(w, (2, 3, 1, 0)).reshape(kh * kw * cin, cout)


# ---------------------------------------------------------------------------
# Full forward pass
# ---------------------------------------------------------------------------

@jax.jit
def model_forward(x, params):
    """x: (B, 1, 28, 28) float32 NCHW -> softmax probabilities (B, 10)."""
    B = x.shape[0]
    a = jnp.transpose(x, (0, 2, 3, 1))              # NCHW -> NHWC

    # conv1 (1 -> 10, k=7): im2col + Pallas matmul
    p, ho, wo = _im2col(a, 7, 7)                    # (B*22*22, 49)
    o = _linear_pallas(p, _conv_w_to_col(params["conv1_w"]),
                       params["conv1_b"].reshape(1, -1))
    a = o.reshape(B, ho, wo, 10)

    # conv2 (10 -> 20, k=7)
    p, ho, wo = _im2col(a, 7, 7)                    # (B*16*16, 490)
    o = _linear_pallas(p, _conv_w_to_col(params["conv2_w"]),
                       params["conv2_b"].reshape(1, -1))
    a = o.reshape(B, ho, wo, 20)

    # conv3 (20 -> 30, k=3)
    p, ho, wo = _im2col(a, 3, 3)                    # (B*14*14, 180)
    o = _linear_pallas(p, _conv_w_to_col(params["conv3_w"]),
                       params["conv3_b"].reshape(1, -1))
    a = o.reshape(B, ho, wo, 30)

    # nn.Flatten(): PyTorch flattens NCHW, i.e. (c, h, w) order
    flat = jnp.transpose(a, (0, 3, 1, 2)).reshape(B, 30 * ho * wo)   # (B, 5880)

    # fused FC head in one Pallas kernel
    out = _head_pallas(
        flat,
        params["fc1_w"].T,  params["fc1_b"].reshape(1, -1),
        params["fc15_w"].T, params["fc15_b"].reshape(1, -1),
        params["fc2_w"].T,  params["fc2_b"].reshape(1, -1),
    )
    return out


# ---------------------------------------------------------------------------
# Parameters (PyTorch layouts, PyTorch-style uniform init) and reference
# ---------------------------------------------------------------------------

def _uniform(key, shape, bound):
    return jax.random.uniform(key, shape, jnp.float32, -bound, bound)


def init_params(key):
    ks = jax.random.split(key, 12)

    def conv(kw, kb, cout, cin, k):
        bound = (cin * k * k) ** -0.5
        return _uniform(kw, (cout, cin, k, k), bound), _uniform(kb, (cout,), bound)

    def linear(kw, kb, fout, fin):
        bound = fin ** -0.5
        return _uniform(kw, (fout, fin), bound), _uniform(kb, (fout,), bound)

    c1w, c1b = conv(ks[0], ks[1], 10, 1, 7)
    c2w, c2b = conv(ks[2], ks[3], 20, 10, 7)
    c3w, c3b = conv(ks[4], ks[5], 30, 20, 3)
    f1w, f1b = linear(ks[6], ks[7], 75, 30 * 14 * 14)
    f15w, f15b = linear(ks[8], ks[9], 10, 75)
    f2w, f2b = linear(ks[10], ks[11], 10, 10)
    return dict(conv1_w=c1w, conv1_b=c1b, conv2_w=c2w, conv2_b=c2b,
                conv3_w=c3w, conv3_b=c3b, fc1_w=f1w, fc1_b=f1b,
                fc15_w=f15w, fc15_b=f15b, fc2_w=f2w, fc2_b=f2b)


def _reference(x, p):
    """Plain-JAX reference of the PyTorch forward (uses real XLA convolutions)."""
    dn = ("NCHW", "OIHW", "NCHW")
    a = jax.lax.conv_general_dilated(x, p["conv1_w"], (1, 1), "VALID",
                                     dimension_numbers=dn) + p["conv1_b"].reshape(1, -1, 1, 1)
    a = jax.lax.conv_general_dilated(a, p["conv2_w"], (1, 1), "VALID",
                                     dimension_numbers=dn) + p["conv2_b"].reshape(1, -1, 1, 1)
    a = jax.lax.conv_general_dilated(a, p["conv3_w"], (1, 1), "VALID",
                                     dimension_numbers=dn) + p["conv3_b"].reshape(1, -1, 1, 1)
    h = a.reshape(a.shape[0], -1)
    h = jax.nn.relu(h @ p["fc1_w"].T + p["fc1_b"])
    h = jax.nn.relu(h @ p["fc15_w"].T + p["fc15_b"])
    h = jax.nn.relu(h @ p["fc2_w"].T + p["fc2_b"])
    return jax.nn.softmax(h, axis=1)


# ---------------------------------------------------------------------------
# Main
# ---------------------------------------------------------------------------

if __name__ == "__main__":
    key = jax.random.PRNGKey(0)
    k_param, k_x = jax.random.split(key)

    B = 2
    x = jax.random.normal(k_x, (B, 1, 28, 28), jnp.float32)   # 28x28 forced by fc1
    params = init_params(k_param)

    out = model_forward(x, params)
    out = jax.block_until_ready(out)

    ref = _reference(x, params)
    assert out.shape == (B, 10)
    assert jnp.allclose(jnp.sum(out, axis=1), 1.0, atol=1e-4)
    assert jnp.allclose(out, ref, atol=1e-4, rtol=1e-4)

    print("KERNEL_OK")
</pallas_src>

<mosaic_0001>
module attributes {stable_mosaic.version = 11 : i64} {
  func.func @_linear_kernel(%arg0: i32, %arg1: memref<256x49xf32, #tpu.memory_space<vmem>>, %arg2: memref<49x10xf32, #tpu.memory_space<vmem>>, %arg3: memref<1x10xf32, #tpu.memory_space<vmem>>, %arg4: memref<256x10xf32, #tpu.memory_space<vmem>>) attributes {dimension_semantics = [#tpu.dimension_semantics<parallel>], iteration_bounds = array<i64: 4>, scalar_prefetch = 0 : i64, scratch_operands = 0 : i64, tpu.core_type = #tpu.core_type<tc>, window_params = [{transform_indices = @transform_0, window_bounds = array<i64: 256, 49>}, {pipeline_mode = #tpu.pipeline_mode<synchronous>, transform_indices = @transform_1, window_bounds = array<i64: 49, 10>}, {pipeline_mode = #tpu.pipeline_mode<synchronous>, transform_indices = @transform_2, window_bounds = array<i64: 1, 10>}, {transform_indices = @transform_3, window_bounds = array<i64: 256, 10>}]} {
    %c0 = arith.constant 0 : index
    %c0_0 = arith.constant 0 : index
    %0 = vector.load %arg1[%c0, %c0_0] : memref<256x49xf32, #tpu.memory_space<vmem>>, vector<256x49xf32>
    %c0_1 = arith.constant 0 : index
    %c0_2 = arith.constant 0 : index
    %1 = vector.load %arg2[%c0_1, %c0_2] : memref<49x10xf32, #tpu.memory_space<vmem>>, vector<49x10xf32>
    %cst = arith.constant dense<0.000000e+00> : vector<256x10xf32>
    %2 = tpu.matmul %0, %1, %cst {dimension_numbers = #tpu.dot_dimension_numbers<[1], [0], [0], [1], [0, 0, 1, 1], [], []>} : vector<256x49xf32>, vector<49x10xf32>, vector<256x10xf32> -> vector<256x10xf32>
    %c0_3 = arith.constant 0 : index
    %c0_4 = arith.constant 0 : index
    %3 = vector.load %arg3[%c0_3, %c0_4] : memref<1x10xf32, #tpu.memory_space<vmem>>, vector<1x10xf32>
    %4 = vector.broadcast %3 : vector<1x10xf32> to vector<256x10xf32>
    %5 = arith.addf %2, %4 : vector<256x10xf32>
    %c0_5 = arith.constant 0 : index
    %c0_6 = arith.constant 0 : index
    %6 = vector.load %arg4[%c0_5, %c0_6] : memref<256x10xf32, #tpu.memory_space<vmem>>, vector<256x10xf32>
    tpu.vector_store %arg4[%c0_5, %c0_6], %5 {strides = array<i32>} : memref<256x10xf32, #tpu.memory_space<vmem>>, vector<256x10xf32>,
    return
  }
  func.func @transform_0(%arg0: i32) -> (i32, i32) {
    %c0_i32 = arith.constant 0 : i32
    %c0_i32_0 = arith.constant 0 : i32
    return %arg0, %c0_i32 : i32, i32
  }
  func.func @transform_1(%arg0: i32) -> (i32, i32) {
    %c0_i32 = arith.constant 0 : i32
    %c0_i32_0 = arith.constant 0 : i32
    %c0_i32_1 = arith.constant 0 : i32
    return %c0_i32, %c0_i32_0 : i32, i32
  }
  func.func @transform_2(%arg0: i32) -> (i32, i32) {
    %c0_i32 = arith.constant 0 : i32
    %c0_i32_0 = arith.constant 0 : i32
    %c0_i32_1 = arith.constant 0 : i32
    return %c0_i32, %c0_i32_0 : i32, i32
  }
  func.func @transform_3(%arg0: i32) -> (i32, i32) {
    %c0_i32 = arith.constant 0 : i32
    %c0_i32_0 = arith.constant 0 : i32
    return %arg0, %c0_i32 : i32, i32
  }
}

module attributes {stable_mosaic.version = 11 : i64} {
  func.func @_linear_kernel(%arg0: i32, %arg1: memref<256x490xf32, #tpu.memory_space<vmem>>, %arg2: memref<490x20xf32, #tpu.memory_space<vmem>>, %arg3: memref<1x20xf32, #tpu.memory_space<vmem>>, %arg4: memref<256x20xf32, #tpu.memory_space<vmem>>) attributes {dimension_semantics = [#tpu.dimension_semantics<parallel>], iteration_bounds = array<i64: 2>, scalar_prefetch = 0 : i64, scratch_operands = 0 : i64, tpu.core_type = #tpu.core_type<tc>, window_params = [{transform_indices = @transform_0, window_bounds = array<i64: 256, 490>}, {pipeline_mode = #tpu.pipeline_mode<synchronous>, transform_indices = @transform_1, window_bounds = array<i64: 490, 20>}, {pipeline_mode = #tpu.pipeline_mode<synchronous>, transform_indices = @transform_2, window_bounds = array<i64: 1, 20>}, {transform_indices = @transform_3, window_bounds = array<i64: 256, 20>}]} {
    %c0 = arith.constant 0 : index
    %c0_0 = arith.constant 0 : index
    %0 = vector.load %arg1[%c0, %c0_0] : memref<256x490xf32, #tpu.memory_space<vmem>>, vector<256x490xf32>
    %c0_1 = arith.constant 0 : index
    %c0_2 = arith.constant 0 : index
    %1 = vector.load %arg2[%c0_1, %c0_2] : memref<490x20xf32, #tpu.memory_space<vmem>>, vector<490x20xf32>
    %cst = arith.constant dense<0.000000e+00> : vector<256x20xf32>
    %2 = tpu.matmul %0, %1, %cst {dimension_numbers = #tpu.dot_dimension_numbers<[1], [0], [0], [1], [0, 0, 1, 1], [], []>} : vector<256x490xf32>, vector<490x20xf32>, vector<256x20xf32> -> vector<256x20xf32>
    %c0_3 = arith.constant 0 : index
    %c0_4 = arith.constant 0 : index
    %3 = vector.load %arg3[%c0_3, %c0_4] : memref<1x20xf32, #tpu.memory_space<vmem>>, vector<1x20xf32>
    %4 = vector.broadcast %3 : vector<1x20xf32> to vector<256x20xf32>
    %5 = arith.addf %2, %4 : vector<256x20xf32>
    %c0_5 = arith.constant 0 : index
    %c0_6 = arith.constant 0 : index
    %6 = vector.load %arg4[%c0_5, %c0_6] : memref<256x20xf32, #tpu.memory_space<vmem>>, vector<256x20xf32>
    tpu.vector_store %arg4[%c0_5, %c0_6], %5 {strides = array<i32>} : memref<256x20xf32, #tpu.memory_space<vmem>>, vector<256x20xf32>,
    return
  }
  func.func @transform_0(%arg0: i32) -> (i32, i32) {
    %c0_i32 = arith.constant 0 : i32
    %c0_i32_0 = arith.constant 0 : i32
    return %arg0, %c0_i32 : i32, i32
  }
  func.func @transform_1(%arg0: i32) -> (i32, i32) {
    %c0_i32 = arith.constant 0 : i32
    %c0_i32_0 = arith.constant 0 : i32
    %c0_i32_1 = arith.constant 0 : i32
    return %c0_i32, %c0_i32_0 : i32, i32
  }
  func.func @transform_2(%arg0: i32) -> (i32, i32) {
    %c0_i32 = arith.constant 0 : i32
    %c0_i32_0 = arith.constant 0 : i32
    %c0_i32_1 = arith.constant 0 : i32
    return %c0_i32, %c0_i32_0 : i32, i32
  }
  func.func @transform_3(%arg0: i32) -> (i32, i32) {
    %c0_i32 = arith.constant 0 : i32
    %c0_i32_0 = arith.constant 0 : i32
    return %arg0, %c0_i32 : i32, i32
  }
}

module attributes {stable_mosaic.version = 11 : i64} {
  func.func @_linear_kernel(%arg0: i32, %arg1: memref<256x180xf32, #tpu.memory_space<vmem>>, %arg2: memref<180x30xf32, #tpu.memory_space<vmem>>, %arg3: memref<1x30xf32, #tpu.memory_space<vmem>>, %arg4: memref<256x30xf32, #tpu.memory_space<vmem>>) attributes {dimension_semantics = [#tpu.dimension_semantics<parallel>], iteration_bounds = array<i64: 2>, scalar_prefetch = 0 : i64, scratch_operands = 0 : i64, tpu.core_type = #tpu.core_type<tc>, window_params = [{transform_indices = @transform_0, window_bounds = array<i64: 256, 180>}, {pipeline_mode = #tpu.pipeline_mode<synchronous>, transform_indices = @transform_1, window_bounds = array<i64: 180, 30>}, {pipeline_mode = #tpu.pipeline_mode<synchronous>, transform_indices = @transform_2, window_bounds = array<i64: 1, 30>}, {transform_indices = @transform_3, window_bounds = array<i64: 256, 30>}]} {
    %c0 = arith.constant 0 : index
    %c0_0 = arith.constant 0 : index
    %0 = vector.load %arg1[%c0, %c0_0] : memref<256x180xf32, #tpu.memory_space<vmem>>, vector<256x180xf32>
    %c0_1 = arith.constant 0 : index
    %c0_2 = arith.constant 0 : index
    %1 = vector.load %arg2[%c0_1, %c0_2] : memref<180x30xf32, #tpu.memory_space<vmem>>, vector<180x30xf32>
    %cst = arith.constant dense<0.000000e+00> : vector<256x30xf32>
    %2 = tpu.matmul %0, %1, %cst {dimension_numbers = #tpu.dot_dimension_numbers<[1], [0], [0], [1], [0, 0, 1, 1], [], []>} : vector<256x180xf32>, vector<180x30xf32>, vector<256x30xf32> -> vector<256x30xf32>
    %c0_3 = arith.constant 0 : index
    %c0_4 = arith.constant 0 : index
    %3 = vector.load %arg3[%c0_3, %c0_4] : memref<1x30xf32, #tpu.memory_space<vmem>>, vector<1x30xf32>
    %4 = vector.broadcast %3 : vector<1x30xf32> to vector<256x30xf32>
    %5 = arith.addf %2, %4 : vector<256x30xf32>
    %c0_5 = arith.constant 0 : index
    %c0_6 = arith.constant 0 : index
    %6 = vector.load %arg4[%c0_5, %c0_6] : memref<256x30xf32, #tpu.memory_space<vmem>>, vector<256x30xf32>
    tpu.vector_store %arg4[%c0_5, %c0_6], %5 {strides = array<i32>} : memref<256x30xf32, #tpu.memory_space<vmem>>, vector<256x30xf32>,
    return
  }
  func.func @transform_0(%arg0: i32) -> (i32, i32) {
    %c0_i32 = arith.constant 0 : i32
    %c0_i32_0 = arith.constant 0 : i32
    return %arg0, %c0_i32 : i32, i32
  }
  func.func @transform_1(%arg0: i32) -> (i32, i32) {
    %c0_i32 = arith.constant 0 : i32
    %c0_i32_0 = arith.constant 0 : i32
    %c0_i32_1 = arith.constant 0 : i32
    return %c0_i32, %c0_i32_0 : i32, i32
  }
  func.func @transform_2(%arg0: i32) -> (i32, i32) {
    %c0_i32 = arith.constant 0 : i32
    %c0_i32_0 = arith.constant 0 : i32
    %c0_i32_1 = arith.constant 0 : i32
    return %c0_i32, %c0_i32_0 : i32, i32
  }
  func.func @transform_3(%arg0: i32) -> (i32, i32) {
    %c0_i32 = arith.constant 0 : i32
    %c0_i32_0 = arith.constant 0 : i32
    return %arg0, %c0_i32 : i32, i32
  }
}

module attributes {stable_mosaic.version = 11 : i64} {
  func.func @_head_kernel(%arg0: i32, %arg1: memref<2x5880xf32, #tpu.memory_space<vmem>>, %arg2: memref<5880x75xf32, #tpu.memory_space<vmem>>, %arg3: memref<1x75xf32, #tpu.memory_space<vmem>>, %arg4: memref<75x10xf32, #tpu.memory_space<vmem>>, %arg5: memref<1x10xf32, #tpu.memory_space<vmem>>, %arg6: memref<10x10xf32, #tpu.memory_space<vmem>>, %arg7: memref<1x10xf32, #tpu.memory_space<vmem>>, %arg8: memref<2x10xf32, #tpu.memory_space<vmem>>) attributes {dimension_semantics = [#tpu.dimension_semantics<parallel>], iteration_bounds = array<i64: 1>, scalar_prefetch = 0 : i64, scratch_operands = 0 : i64, tpu.core_type = #tpu.core_type<tc>, window_params = [{transform_indices = @transform_0, window_bounds = array<i64: 2, 5880>}, {pipeline_mode = #tpu.pipeline_mode<synchronous>, transform_indices = @transform_1, window_bounds = array<i64: 5880, 75>}, {pipeline_mode = #tpu.pipeline_mode<synchronous>, transform_indices = @transform_2, window_bounds = array<i64: 1, 75>}, {pipeline_mode = #tpu.pipeline_mode<synchronous>, transform_indices = @transform_3, window_bounds = array<i64: 75, 10>}, {pipeline_mode = #tpu.pipeline_mode<synchronous>, transform_indices = @transform_4, window_bounds = array<i64: 1, 10>}, {pipeline_mode = #tpu.pipeline_mode<synchronous>, transform_indices = @transform_5, window_bounds = array<i64: 10, 10>}, {pipeline_mode = #tpu.pipeline_mode<synchronous>, transform_indices = @transform_6, window_bounds = array<i64: 1, 10>}, {transform_indices = @transform_7, window_bounds = array<i64: 2, 10>}]} {
    %c0 = arith.constant 0 : index
    %c0_0 = arith.constant 0 : index
    %0 = vector.load %arg1[%c0, %c0_0] : memref<2x5880xf32, #tpu.memory_space<vmem>>, vector<2x5880xf32>
    %c0_1 = arith.constant 0 : index
    %c0_2 = arith.constant 0 : index
    %1 = vector.load %arg2[%c0_1, %c0_2] : memref<5880x75xf32, #tpu.memory_space<vmem>>, vector<5880x75xf32>
    %cst = arith.constant dense<0.000000e+00> : vector<2x75xf32>
    %2 = tpu.matmul %0, %1, %cst {dimension_numbers = #tpu.dot_dimension_numbers<[1], [0], [0], [1], [0, 0, 1, 1], [], []>} : vector<2x5880xf32>, vector<5880x75xf32>, vector<2x75xf32> -> vector<2x75xf32>
    %c0_3 = arith.constant 0 : index
    %c0_4 = arith.constant 0 : index
    %3 = vector.load %arg3[%c0_3, %c0_4] : memref<1x75xf32, #tpu.memory_space<vmem>>, vector<1x75xf32>
    %4 = vector.broadcast %3 : vector<1x75xf32> to vector<2x75xf32>
    %5 = arith.addf %2, %4 : vector<2x75xf32>
    %cst_5 = arith.constant 0.000000e+00 : f32
    %6 = vector.broadcast %cst_5 : f32 to vector<2x75xf32>
    %7 = arith.maximumf %5, %6 : vector<2x75xf32>
    %c0_6 = arith.constant 0 : index
    %c0_7 = arith.constant 0 : index
    %8 = vector.load %arg4[%c0_6, %c0_7] : memref<75x10xf32, #tpu.memory_space<vmem>>, vector<75x10xf32>
    %cst_8 = arith.constant dense<0.000000e+00> : vector<2x10xf32>
    %9 = tpu.matmul %7, %8, %cst_8 {dimension_numbers = #tpu.dot_dimension_numbers<[1], [0], [0], [1], [0, 0, 1, 1], [], []>} : vector<2x75xf32>, vector<75x10xf32>, vector<2x10xf32> -> vector<2x10xf32>
    %c0_9 = arith.constant 0 : index
    %c0_10 = arith.constant 0 : index
    %10 = vector.load %arg5[%c0_9, %c0_10] : memref<1x10xf32, #tpu.memory_space<vmem>>, vector<1x10xf32>
    %11 = vector.broadcast %10 : vector<1x10xf32> to vector<2x10xf32>
    %12 = arith.addf %9, %11 : vector<2x10xf32>
    %cst_11 = arith.constant 0.000000e+00 : f32
    %13 = vector.broadcast %cst_11 : f32 to vector<2x10xf32>
    %14 = arith.maximumf %12, %13 : vector<2x10xf32>
    %c0_12 = arith.constant 0 : index
    %c0_13 = arith.constant 0 : index
    %15 = vector.load %arg6[%c0_12, %c0_13] : memref<10x10xf32, #tpu.memory_space<vmem>>, vector<10x10xf32>
    %cst_14 = arith.constant dense<0.000000e+00> : vector<2x10xf32>
    %16 = tpu.matmul %14, %15, %cst_14 {dimension_numbers = #tpu.dot_dimension_numbers<[1], [0], [0], [1], [0, 0, 1, 1], [], []>} : vector<2x10xf32>, vector<10x10xf32>, vector<2x10xf32> -> vector<2x10xf32>
    %c0_15 = arith.constant 0 : index
    %c0_16 = arith.constant 0 : index
    %17 = vector.load %arg7[%c0_15, %c0_16] : memref<1x10xf32, #tpu.memory_space<vmem>>, vector<1x10xf32>
    %18 = vector.broadcast %17 : vector<1x10xf32> to vector<2x10xf32>
    %19 = arith.addf %16, %18 : vector<2x10xf32>
    %cst_17 = arith.constant 0.000000e+00 : f32
    %20 = vector.broadcast %cst_17 : f32 to vector<2x10xf32>
    %21 = arith.maximumf %19, %20 : vector<2x10xf32>
    %cst_18 = arith.constant dense<0xFF800000> : vector<2xf32>
    %22 = vector.multi_reduction <maximumf>, %21, %cst_18 [1] : vector<2x10xf32> to vector<2xf32>
    %23 = vector.shape_cast %22 : vector<2xf32> to vector<2x1xf32>
    %24 = vector.broadcast %23 : vector<2x1xf32> to vector<2x10xf32>
    %25 = arith.subf %21, %24 : vector<2x10xf32>
    %26 = math.exp %25 : vector<2x10xf32>
    %cst_19 = arith.constant dense<0.000000e+00> : vector<2xf32>
    %27 = vector.multi_reduction <add>, %26, %cst_19 [1] : vector<2x10xf32> to vector<2xf32>
    %28 = vector.shape_cast %27 : vector<2xf32> to vector<2x1xf32>
    %29 = vector.broadcast %28 : vector<2x1xf32> to vector<2x10xf32>
    %30 = arith.divf %26, %29 : vector<2x10xf32>
    %c0_20 = arith.constant 0 : index
    %c0_21 = arith.constant 0 : index
    %31 = vector.load %arg8[%c0_20, %c0_21] : memref<2x10xf32, #tpu.memory_space<vmem>>, vector<2x10xf32>
    tpu.vector_store %arg8[%c0_20, %c0_21], %30 {strides = array<i32>} : memref<2x10xf32, #tpu.memory_space<vmem>>, vector<2x10xf32>,
    return
  }
  func.func @transform_0(%arg0: i32) -> (i32, i32) {
    %c0_i32 = arith.constant 0 : i32
    %c0_i32_0 = arith.constant 0 : i32
    return %arg0, %c0_i32 : i32, i32
  }
  func.func @transform_1(%arg0: i32) -> (i32, i32) {
    %c0_i32 = arith.constant 0 : i32
    %c0_i32_0 = arith.constant 0 : i32
    %c0_i32_1 = arith.constant 0 : i32
    return %c0_i32, %c0_i32_0 : i32, i32
  }
  func.func @transform_2(%arg0: i32) -> (i32, i32) {
    %c0_i32 = arith.constant 0 : i32
    %c0_i32_0 = arith.constant 0 : i32
    %c0_i32_1 = arith.constant 0 : i32
    return %c0_i32, %c0_i32_0 : i32, i32
  }
  func.func @transform_3(%arg0: i32) -> (i32, i32) {
    %c0_i32 = arith.constant 0 : i32
    %c0_i32_0 = arith.constant 0 : i32
    %c0_i32_1 = arith.constant 0 : i32
    return %c0_i32, %c0_i32_0 : i32, i32
  }
  func.func @transform_4(%arg0: i32) -> (i32, i32) {
    %c0_i32 = arith.constant 0 : i32
    %c0_i32_0 = arith.constant 0 : i32
    %c0_i32_1 = arith.constant 0 : i32
    return %c0_i32, %c0_i32_0 : i32, i32
  }
  func.func @transform_5(%arg0: i32) -> (i32, i32) {
    %c0_i32 = arith.constant 0 : i32
    %c0_i32_0 = arith.constant 0 : i32
    %c0_i32_1 = arith.constant 0 : i32
    return %c0_i32, %c0_i32_0 : i32, i32
  }
  func.func @transform_6(%arg0: i32) -> (i32, i32) {
    %c0_i32 = arith.constant 0 : i32
    %c0_i32_0 = arith.constant 0 : i32
    %c0_i32_1 = arith.constant 0 : i32
    return %c0_i32, %c0_i32_0 : i32, i32
  }
  func.func @transform_7(%arg0: i32) -> (i32, i32) {
    %c0_i32 = arith.constant 0 : i32
    %c0_i32_0 = arith.constant 0 : i32
    return %arg0, %c0_i32 : i32, i32
  }
}

</mosaic_0001>

<bundles_post_ra>
// kernel: model_forward.4
= control target key start
LH: loop header
LB: loop body
LE: loop exit
PB: predicated region body
PF: predicated region fallthrough
CT: control target
= control target key end

     0   :  { %s1100_s12 = smov 0   ;;  %s1102_s13 = smov 0   ;;  %s1470_s0 = inlined_call_operand.vmem [shape: f32[968,49], index: 0, kind: input, shape index: {}]   ;;  %s1471_s1 = inlined_call_operand.vmem [shape: f32[49,10], index: 1, kind: input, shape index: {}]   ;;  %s1472_s2 = inlined_call_operand.vmem [shape: f32[1,10], index: 2, kind: input, shape index: {}]   ;;  %s1473_s3 = inlined_call_operand.vmem [shape: f32[968,10], index: 3, kind: output, shape index: {}]  }
   0x1   :  { %s1104_s14 = smov 0  }
   0x2 LB: > { %s1113_s15 = sadd.s32 4294967295, %s1046_s14   ;;  %s1115_s16 = sadd.s32 1, %s1046_s14   ;;  %s1046_s14 = sphi %s1104_s14, %s1482_s14   ;;  %s1042_s13 = sphi %s1102_s13, %s1481_s13   ;;  %s1038_s12 = sphi %s1100_s12, %s1480_s12  }
   0x3   : > { %s85_s17 = ssub.s32 %s1046_s14, %s1115_s16  ;;  %s88_s18 = sadd.s32 1, %s1042_s13 }
   0x4   : > { %p86_p0 = scmp.eq.s32.totalorder %s85_s17, 0  ;;  %p98_p1 = scmp.ne.s32.totalorder %s1042_s13, %s1038_s12 }
   0x5   : > { %p99_p2 = scmp.eq.s32.totalorder %s1113_s15, 3  ;;  %p825_p3 = scmp.ge.s32.totalorder %s1046_s14, 1 }
   0x6   : > { %s1123_s19 = scalar_select %p86_p0, %s1042_s13, %s88_s18  }
   0x7   : > { %p1125_p4 = por %p99_p2, %p98_p1  ;;  %p146_p5 = scmp.lt.s32.totalorder %s1046_s14, 5 }
   0x9   : > { %p147_p6 = pnand %p825_p3, %p146_p5 }
   0xa   : > { %s1136_s25 = sshll.u32 (!%p147_p6), %s1113_s15, 5  ;;  %s170_s18 = sand.u32 (!%p147_p6), 1, %s1038_s12  }
   0xb   : > { %150 = sbr.rel (%p147_p6) target bundleno = 286 (0x11e), region = 32  ;;  %p178_p7 = scmp.lt.s32.totalorder (!%p147_p6), %s1136_s25, 120 }
   0xc   : > { %s826_s21 = sshll.u32 (!%p147_p6), %s170_s18, 8 }
   0xd   : > { %s1232_s24 = scalar_lea.vmem (!%p147_p6), [#allocation2], %s826_s21  }
  0x10   : > { %v230_v0 = vld [vmem:[%s1471_s1 + $0x30] sm:$0x1]  ;;  %vm332_vm0 = vcmask 1040384   ;;  %v229_v1 = vld [vmem:[%s1471_s1 + $0x28] sm:$0xff]  ;;  %v228_v2 = vld [vmem:[%s1471_s1 + $0x20] sm:$0xff]  ;;  %s179_s28 = scalar_select %p178_p7, %s1136_s25, 120 }
  0x11   : > { %883 = vmatpush.msk.msra.mxu2 %vm332_vm0, %v230_v0  ;;  %884 = vmatpush.msk.msra.mxu3 %vm332_vm0, %v230_v0  ;;  %v227_v3 = vld [vmem:[%s1471_s1 + $0x18] sm:$0xff]  ;;  %v226_v4 = vld [vmem:[%s1471_s1 + $0x10] sm:$0xff]  ;;  %v225_v5 = vld [vmem:[%s1471_s1 + $0x8] sm:$0xff]  ;;  %vm235_vm1 = vcmask 400384   ;;  %vm449_vm2 = vcmask 80896   ;;  %s490_s12 = ssub.s32 (%p1125_p4), 121, %s1136_s25 }
  0x12   : > { %829 = vmatpush.msk.msra.mxu0 %vm332_vm0, %v230_v0  ;;  %882 = vmatpush.msk.msra.mxu1 %vm332_vm0, %v230_v0  ;;  %s828_s4 = sshll.u32 %s179_s28, 3  ;;  %v224_v6 = vld [vmem:[%s1471_s1] sm:$0xff]  ;;  %s879_s26 = sshll.u32 (%p1125_p4), %s1113_s15, 8 }
  0x13   : > { %886 = vmatpush.msra.mxu2 %v229_v1  ;;  %887 = vmatpush.msra.mxu3 %v229_v1  ;;  %s1155_s11 = scalar_lea.vmem %s1470_s0, %s828_s4  ;;  %v1228_v39 = vld [vmem:[%s1472_s2] ss:$0 sm:$0xff]  ;;  %p491_p8 = scmp.lt.s32.totalorder (%p1125_p4), %s490_s12, 32 }
  0x14   : > { %346 = vmatpush.msra.mxu0 %v229_v1  ;;  %885 = vmatpush.msra.mxu1 %v229_v1  ;;  %v208_v7 = vld [vmem:[%s1155_s11 + $0x80] sm:$0xff]  ;;  %v209_v11 = vld [vmem:[%s1155_s11 + $0x88] sm:$0xff]  ;;  %v210_v15 = vld [vmem:[%s1155_s11 + $0x90] sm:$0xff]  ;;  %s1335_s29 = scalar_lea.vmem (%p1125_p4), %s1473_s3, %s879_s26  }
  0x15   : > { %889 = vmatpush.msra.mxu2 %v228_v2  ;;  %890 = vmatpush.msra.mxu3 %v228_v2  ;;  %v216_v8 = vld [vmem:[%s1155_s11 + $0xc0] sm:$0xff]  ;;  %v217_v12 = vld [vmem:[%s1155_s11 + $0xc8] sm:$0xff]  ;;  %v218_v16 = vld [vmem:[%s1155_s11 + $0xd0] sm:$0xff] }
  0x16   : > { %347 = vmatpush.msra.mxu0 %v228_v2  ;;  %888 = vmatpush.msra.mxu1 %v228_v2  ;;  %v192_v9 = vld [vmem:[%s1155_s11] sm:$0xff]  ;;  %v193_v13 = vld [vmem:[%s1155_s11 + $0x8] sm:$0xff]  ;;  %v194_v17 = vld [vmem:[%s1155_s11 + $0x10] sm:$0xff] }
  0x17   : > { %892 = vmatpush.msra.mxu2 %v227_v3  ;;  %893 = vmatpush.msra.mxu3 %v227_v3  ;;  %v200_v10 = vld [vmem:[%s1155_s11 + $0x40] sm:$0xff]  ;;  %v201_v14 = vld [vmem:[%s1155_s11 + $0x48] sm:$0xff]  ;;  %v202_v18 = vld [vmem:[%s1155_s11 + $0x50] sm:$0xff] }
  0x18   : > { %348 = vmatpush.msra.mxu0 %v227_v3  ;;  %891 = vmatpush.msra.mxu1 %v227_v3  ;;  %v211_v19 = vld [vmem:[%s1155_s11 + $0x98] sm:$0xff]  ;;  %v212_v23 = vld [vmem:[%s1155_s11 + $0xa0] sm:$0xff]  ;;  %v213_v27 = vld [vmem:[%s1155_s11 + $0xa8] sm:$0xff] }
  0x19   : > { %895 = vmatpush.msra.mxu2 %v226_v4  ;;  %896 = vmatpush.msra.mxu3 %v226_v4  ;;  %v219_v20 = vld [vmem:[%s1155_s11 + $0xd8] sm:$0xff]  ;;  %v220_v24 = vld [vmem:[%s1155_s11 + $0xe0] sm:$0xff]  ;;  %v221_v28 = vld [vmem:[%s1155_s11 + $0xe8] sm:$0xff] }
  0x1a   : > { %349 = vmatpush.msra.mxu0 %v226_v4  ;;  %894 = vmatpush.msra.mxu1 %v226_v4  ;;  %v195_v21 = vld [vmem:[%s1155_s11 + $0x18] sm:$0xff]  ;;  %v196_v25 = vld [vmem:[%s1155_s11 + $0x20] sm:$0xff]  ;;  %v197_v29 = vld [vmem:[%s1155_s11 + $0x28] sm:$0xff] }
  0x1b   : > { %898 = vmatpush.msra.mxu2 %v225_v5  ;;  %899 = vmatpush.msra.mxu3 %v225_v5  ;;  %v203_v22 = vld [vmem:[%s1155_s11 + $0x58] sm:$0xff]  ;;  %v204_v26 = vld [vmem:[%s1155_s11 + $0x60] sm:$0xff]  ;;  %v205_v30 = vld [vmem:[%s1155_s11 + $0x68] sm:$0xff] }
  0x1c   : > { %350 = vmatpush.msra.mxu0 %v225_v5  ;;  %897 = vmatpush.msra.mxu1 %v225_v5  ;;  %v214_v31 = vld [vmem:[%s1155_s11 + $0xb0] sm:$0xff]  ;;  %v215_v35 = vld [vmem:[%s1155_s11 + $0xb8] sm:$0xff] }
  0x1d   : > { %901 = vmatpush.msra.mxu2 %v224_v6  ;;  %902 = vmatpush.msra.mxu3 %v224_v6  ;;  %v222_v32 = vld [vmem:[%s1155_s11 + $0xf0] sm:$0xff]  ;;  %v223_v36 = vld [vmem:[%s1155_s11 + $0xf8] sm:$0xff] }
  0x1e   : > { %846 = vmatmul.msk.f32.vlgmr.msra.gmra.mxu2 %vm235_vm1, %v208_v7  ;;  %854 = vmatmul.msk.f32.vlgmr.msra.gmra.mxu3 %vm235_vm1, %v216_v8  ;;  %v198_v33 = vld [vmem:[%s1155_s11 + $0x30] sm:$0xff]  ;;  %v199_v37 = vld [vmem:[%s1155_s11 + $0x38] sm:$0xff] }
  0x1f   : > { %351 = vmatpush.msra.mxu0 %v224_v6  ;;  %900 = vmatpush.msra.mxu1 %v224_v6  ;;  %v206_v34 = vld [vmem:[%s1155_s11 + $0x70] sm:$0xff]  ;;  %v207_v38 = vld [vmem:[%s1155_s11 + $0x78] sm:$0xff] }
  0x20   : > { %830 = vmatmul.msk.f32.vlgmr.msra.gmra.mxu0 %vm235_vm1, %v192_v9  ;;  %838 = vmatmul.msk.f32.vlgmr.msra.gmra.mxu1 %vm235_vm1, %v200_v10 }
  0x26   : > { %847 = vmatmul.msk.f32.gmra.mxu2 %vm235_vm1, %v209_v11  ;;  %855 = vmatmul.msk.f32.gmra.mxu3 %vm235_vm1, %v217_v12 }
  0x28   : > { %831 = vmatmul.msk.f32.gmra.mxu0 %vm235_vm1, %v193_v13  ;;  %839 = vmatmul.msk.f32.gmra.mxu1 %vm235_vm1, %v201_v14 }
  0x2e   : > { %848 = vmatmul.msk.f32.gmra.mxu2 %vm235_vm1, %v210_v15  ;;  %856 = vmatmul.msk.f32.gmra.mxu3 %vm235_vm1, %v218_v16 }
  0x30   : > { %832 = vmatmul.msk.f32.gmra.mxu0 %vm235_vm1, %v194_v17  ;;  %840 = vmatmul.msk.f32.gmra.mxu1 %vm235_vm1, %v202_v18 }
  0x36   : > { %849 = vmatmul.msk.f32.gmra.mxu2 %vm235_vm1, %v211_v19  ;;  %857 = vmatmul.msk.f32.gmra.mxu3 %vm235_vm1, %v219_v20 }
  0x38   : > { %833 = vmatmul.msk.f32.gmra.mxu0 %vm235_vm1, %v195_v21  ;;  %841 = vmatmul.msk.f32.gmra.mxu1 %vm235_vm1, %v203_v22 }
  0x3e   : > { %850 = vmatmul.msk.f32.gmra.mxu2 %vm235_vm1, %v212_v23  ;;  %858 = vmatmul.msk.f32.gmra.mxu3 %vm235_vm1, %v220_v24 }
  0x40   : > { %834 = vmatmul.msk.f32.gmra.mxu0 %vm235_vm1, %v196_v25  ;;  %842 = vmatmul.msk.f32.gmra.mxu1 %vm235_vm1, %v204_v26 }
  0x46   : > { %851 = vmatmul.msk.f32.gmra.mxu2 %vm235_vm1, %v213_v27  ;;  %859 = vmatmul.msk.f32.gmra.mxu3 %vm235_vm1, %v221_v28 }
  0x48   : > { %835 = vmatmul.msk.f32.gmra.mxu0 %vm235_vm1, %v197_v29  ;;  %843 = vmatmul.msk.f32.gmra.mxu1 %vm235_vm1, %v205_v30 }
  0x4e   : > { %852 = vmatmul.msk.f32.gmra.mxu2 %vm235_vm1, %v214_v31  ;;  %860 = vmatmul.msk.f32.gmra.mxu3 %vm235_vm1, %v222_v32 }
  0x50   : > { %836 = vmatmul.msk.f32.gmra.mxu0 %vm235_vm1, %v198_v33  ;;  %844 = vmatmul.msk.f32.gmra.mxu1 %vm235_vm1, %v206_v34 }
  0x56   : > { %853 = vmatmul.msk.f32.gmra.mxu2 %vm235_vm1, %v215_v35  ;;  %861 = vmatmul.msk.f32.gmra.mxu3 %vm235_vm1, %v223_v36 }
  0x58   : > { %837 = vmatmul.msk.f32.gmra.mxu0 %vm235_vm1, %v199_v37  ;;  %845 = vmatmul.msk.f32.gmra.mxu1 %vm235_vm1, %v207_v38 }
  0x9d   : > { %v353_v40 = vpop.f32.mrf.mxu0  ;;  %v377_v41 = vpop.f32.mrf.mxu1 }
  0x9e   : > { %v354_v42 = vadd.f32 %v1228_v39, %v353_v40  ;;  %v378_v43 = vadd.f32 %v1228_v39, %v377_v41 }
  0xa0   : > { %450 = vst.msk [vmem:[%s1232_s24] sm:$0xff] %vm449_vm2, %v354_v42 }
  0xa1   : > { %458 = vst.msk [vmem:[%s1232_s24 + $0x40] sm:$0xff] %vm449_vm2, %v378_v43  ;;  %v401_v44 = vpop.f32.mrf.mxu2  ;;  %v425_v45 = vpop.f32.mrf.mxu3 }
  0xa2   : > { %v402_v46 = vadd.f32 %v1228_v39, %v401_v44  ;;  %v426_v47 = vadd.f32 %v1228_v39, %v425_v45 }
  0xa4   : > { %466 = vst.msk [vmem:[%s1232_s24 + $0x80] sm:$0xff] %vm449_vm2, %v402_v46 }
  0xa5   : > { %474 = vst.msk [vmem:[%s1232_s24 + $0xc0] sm:$0xff] %vm449_vm2, %v426_v47  ;;  %v356_v48 = vpop.f32.mrf.mxu0  ;;  %v380_v49 = vpop.f32.mrf.mxu1 }
  0xa6   : > { %v357_v50 = vadd.f32 %v1228_v39, %v356_v48  ;;  %v381_v51 = vadd.f32 %v1228_v39, %v380_v49 }
  0xa8   : > { %451 = vst.msk [vmem:[%s1232_s24 + $0x8] sm:$0xff] %vm449_vm2, %v357_v50 }
  0xa9   : > { %459 = vst.msk [vmem:[%s1232_s24 + $0x48] sm:$0xff] %vm449_vm2, %v381_v51  ;;  %v404_v52 = vpop.f32.mrf.mxu2  ;;  %v428_v53 = vpop.f32.mrf.mxu3 }
  0xaa   : > { %v405_v54 = vadd.f32 %v1228_v39, %v404_v52  ;;  %v429_v55 = vadd.f32 %v1228_v39, %v428_v53 }
  0xac   : > { %467 = vst.msk [vmem:[%s1232_s24 + $0x88] sm:$0xff] %vm449_vm2, %v405_v54 }
  0xad   : > { %475 = vst.msk [vmem:[%s1232_s24 + $0xc8] sm:$0xff] %vm449_vm2, %v429_v55  ;;  %v359_v56 = vpop.f32.mrf.mxu0  ;;  %v383_v57 = vpop.f32.mrf.mxu1 }
  0xae   : > { %v360_v58 = vadd.f32 %v1228_v39, %v359_v56  ;;  %v384_v59 = vadd.f32 %v1228_v39, %v383_v57 }
  0xb0   : > { %452 = vst.msk [vmem:[%s1232_s24 + $0x10] sm:$0xff] %vm449_vm2, %v360_v58 }
  0xb1   : > { %460 = vst.msk [vmem:[%s1232_s24 + $0x50] sm:$0xff] %vm449_vm2, %v384_v59  ;;  %v407_v60 = vpop.f32.mrf.mxu2  ;;  %v431_v61 = vpop.f32.mrf.mxu3 }
  0xb2   : > { %v408_v62 = vadd.f32 %v1228_v39, %v407_v60  ;;  %v432_v63 = vadd.f32 %v1228_v39, %v431_v61 }
  0xb4   : > { %468 = vst.msk [vmem:[%s1232_s24 + $0x90] sm:$0xff] %vm449_vm2, %v408_v62 }
  0xb5   : > { %476 = vst.msk [vmem:[%s1232_s24 + $0xd0] sm:$0xff] %vm449_vm2, %v432_v63  ;;  %v362_v0 = vpop.f32.mrf.mxu0  ;;  %v386_v1 = vpop.f32.mrf.mxu1 }
  0xb6   : > { %v363_v2 = vadd.f32 %v1228_v39, %v362_v0  ;;  %v387_v3 = vadd.f32 %v1228_v39, %v386_v1 }
  0xb8   : > { %453 = vst.msk [vmem:[%s1232_s24 + $0x18] sm:$0xff] %vm449_vm2, %v363_v2 }
  0xb9   : > { %461 = vst.msk [vmem:[%s1232_s24 + $0x58] sm:$0xff] %vm449_vm2, %v387_v3  ;;  %v410_v4 = vpop.f32.mrf.mxu2  ;;  %v434_v5 = vpop.f32.mrf.mxu3 }
  0xba   : > { %v411_v6 = vadd.f32 %v1228_v39, %v410_v4  ;;  %v435_v7 = vadd.f32 %v1228_v39, %v434_v5 }
  0xbc   : > { %469 = vst.msk [vmem:[%s1232_s24 + $0x98] sm:$0xff] %vm449_vm2, %v411_v6 }
  0xbd   : > { %477 = vst.msk [vmem:[%s1232_s24 + $0xd8] sm:$0xff] %vm449_vm2, %v435_v7  ;;  %v365_v8 = vpop.f32.mrf.mxu0  ;;  %v389_v9 = vpop.f32.mrf.mxu1 }
  0xbe   : > { %v366_v10 = vadd.f32 %v1228_v39, %v365_v8  ;;  %v390_v11 = vadd.f32 %v1228_v39, %v389_v9 }
  0xc0   : > { %454 = vst.msk [vmem:[%s1232_s24 + $0x20] sm:$0xff] %vm449_vm2, %v366_v10 }
  0xc1   : > { %462 = vst.msk [vmem:[%s1232_s24 + $0x60] sm:$0xff] %vm449_vm2, %v390_v11  ;;  %v413_v12 = vpop.f32.mrf.mxu2  ;;  %v437_v13 = vpop.f32.mrf.mxu3 }
  0xc2   : > { %v414_v14 = vadd.f32 %v1228_v39, %v413_v12  ;;  %v438_v15 = vadd.f32 %v1228_v39, %v437_v13 }
  0xc4   : > { %470 = vst.msk [vmem:[%s1232_s24 + $0xa0] sm:$0xff] %vm449_vm2, %v414_v14 }
  0xc5   : > { %478 = vst.msk [vmem:[%s1232_s24 + $0xe0] sm:$0xff] %vm449_vm2, %v438_v15  ;;  %v368_v16 = vpop.f32.mrf.mxu0  ;;  %v392_v17 = vpop.f32.mrf.mxu1 }
  0xc6   : > { %v369_v18 = vadd.f32 %v1228_v39, %v368_v16  ;;  %v393_v19 = vadd.f32 %v1228_v39, %v392_v17 }
  0xc8   : > { %455 = vst.msk [vmem:[%s1232_s24 + $0x28] sm:$0xff] %vm449_vm2, %v369_v18 }
  0xc9   : > { %463 = vst.msk [vmem:[%s1232_s24 + $0x68] sm:$0xff] %vm449_vm2, %v393_v19  ;;  %v416_v20 = vpop.f32.mrf.mxu2  ;;  %v440_v21 = vpop.f32.mrf.mxu3 }
  0xca   : > { %v417_v22 = vadd.f32 %v1228_v39, %v416_v20  ;;  %v441_v23 = vadd.f32 %v1228_v39, %v440_v21 }
  0xcc   : > { %471 = vst.msk [vmem:[%s1232_s24 + $0xa8] sm:$0xff] %vm449_vm2, %v417_v22 }
  0xcd   : > { %479 = vst.msk [vmem:[%s1232_s24 + $0xe8] sm:$0xff] %vm449_vm2, %v441_v23  ;;  %v371_v24 = vpop.f32.mrf.mxu0  ;;  %v395_v25 = vpop.f32.mrf.mxu1 }
  0xce   : > { %v372_v26 = vadd.f32 %v1228_v39, %v371_v24  ;;  %v396_v27 = vadd.f32 %v1228_v39, %v395_v25 }
  0xd0   : > { %456 = vst.msk [vmem:[%s1232_s24 + $0x30] sm:$0xff] %vm449_vm2, %v372_v26 }
  0xd1   : > { %464 = vst.msk [vmem:[%s1232_s24 + $0x70] sm:$0xff] %vm449_vm2, %v396_v27  ;;  %v419_v28 = vpop.f32.mrf.mxu2  ;;  %v443_v29 = vpop.f32.mrf.mxu3 }
  0xd2   : > { %v420_v30 = vadd.f32 %v1228_v39, %v419_v28  ;;  %v444_v31 = vadd.f32 %v1228_v39, %v443_v29 }
  0xd4   : > { %472 = vst.msk [vmem:[%s1232_s24 + $0xb0] sm:$0xff] %vm449_vm2, %v420_v30 }
  0xd5   : > { %480 = vst.msk [vmem:[%s1232_s24 + $0xf0] sm:$0xff] %vm449_vm2, %v444_v31  ;;  %v374_v32 = vpop.f32.mrf.mxu0  ;;  %v398_v33 = vpop.f32.mrf.mxu1 }
  0xd6   : > { %v375_v34 = vadd.f32 %v1228_v39, %v374_v32  ;;  %v399_v35 = vadd.f32 %v1228_v39, %v398_v33 }
  0xd8   : > { %457 = vst.msk [vmem:[%s1232_s24 + $0x38] sm:$0xff] %vm449_vm2, %v375_v34 }
  0xd9   : > { %465 = vst.msk [vmem:[%s1232_s24 + $0x78] sm:$0xff] %vm449_vm2, %v399_v35  ;;  %v422_v36 = vpop.f32.mrf.mxu2  ;;  %v446_v37 = vpop.f32.mrf.mxu3  ;;  %488 = sbr.rel (!%p1125_p4) target bundleno = 286 (0x11e), region = 36 }
  0xda   : > { %v423_v38 = vadd.f32 %v1228_v39, %v422_v36  ;;  %v447_v40 = vadd.f32 %v1228_v39, %v446_v37 }
  0xdc   : > { %473 = vst.msk [vmem:[%s1232_s24 + $0xb8] sm:$0xff] %vm449_vm2, %v423_v38 }
  0xdd   : > { %481 = vst.msk [vmem:[%s1232_s24 + $0xf8] sm:$0xff] %vm449_vm2, %v447_v40 }
  0xde   : > { %s1484_s12 = smov (!%p491_p8, %s490_s12), 32 }
  0xdf   : > { %s864_s30 = sshll.u32 %s1484_s12, 3 }
  0xe0   : > { %p867_p9 = scmp.eq.s32.totalorder %s864_s30, 0 }
  0xe1   : > { %s1341_s4 = sshrl.u32 (!%p867_p9), %s1484_s12, 5 }
  0xe2   : > { %499 = sbr.rel (%p867_p9) target bundleno = 286 (0x11e), region = 40  ;;  %p868_p10 = scmp.le.s32.totalorder (!%p867_p9), %s1341_s4, 0 }
  0xe7   : > { %778 = sbr.rel (%p868_p10) target bundleno = 269 (0x10d), region = 116  ;;  %s1475_s15 = smov (!%p868_p10), %s1335_s29 }
  0xe8   : > { %s1476_s20 = smov (!%p868_p10), %s1232_s24  ;;  %s1350_s25 = smov (!%p868_p10), 0  }
  0xe9   : > { %s1352_s5 = smov (!%p868_p10), 0  }
  0xec LB: >> { %v624_v39 = vld [vmem:[%s1054_s20] sm:$0xff]  ;;  %v626_v41 = vld [vmem:[%s1054_s20 + $0x8] sm:$0xff]  ;;  %v628_v42 = vld [vmem:[%s1054_s20 + $0x10] sm:$0xff]  ;;  %s688_s6 = sadd.s32 1, %s1058_s25  ;;  %s618_s5 = sadd.s32 1, %s1062_s5   ;;  %s1062_s5 = sphi %s1352_s5, %s618_s5   ;;  %s1058_s25 = sphi %s1350_s25, %s1479_s25   ;;  %s1054_s20 = sphi %s1476_s20, %s1478_s20   ;;  %s1050_s15 = sphi %s1475_s15, %s1477_s15  }
  0xed   : >> { %625 = vst [vmem:[%s1050_s15] sm:$0xff] %v624_v39  ;;  %v630_v43 = vld [vmem:[%s1054_s20 + $0x18] sm:$0xff]  ;;  %p689_p11 = scmp.ge.s32.totalorder %s688_s6, %s1341_s4  ;;  %v632_v44 = vld [vmem:[%s1054_s20 + $0x20] sm:$0xff]  ;;  %v634_v45 = vld [vmem:[%s1054_s20 + $0x28] sm:$0xff]  ;;  %p617_p12 = scmp.ge.s32.totalorder %s618_s5, %s1341_s4 }
  0xee   : >> { %627 = vst [vmem:[%s1050_s15 + $0x8] sm:$0xff] %v626_v41  ;;  %v636_v46 = vld [vmem:[%s1054_s20 + $0x30] sm:$0xff]  ;;  %v638_v47 = vld [vmem:[%s1054_s20 + $0x38] sm:$0xff]  ;;  %v640_v48 = vld [vmem:[%s1054_s20 + $0x40] sm:$0xff] }
  0xef   : >> { %629 = vst [vmem:[%s1050_s15 + $0x10] sm:$0xff] %v628_v42  ;;  %s1486_s6 = smov (%p689_p11, %s688_s6), 0  ;;  %v642_v49 = vld [vmem:[%s1054_s20 + $0x48] sm:$0xff]  ;;  %v644_v50 = vld [vmem:[%s1054_s20 + $0x50] sm:$0xff]  ;;  %v646_v51 = vld [vmem:[%s1054_s20 + $0x58] sm:$0xff] }
  0xf0   : >> { %631 = vst [vmem:[%s1050_s15 + $0x18] sm:$0xff] %v630_v43  ;;  %s869_s7 = sshll.u32 %s1486_s6, 8  ;;  %v648_v52 = vld [vmem:[%s1054_s20 + $0x60] sm:$0xff]  ;;  %v650_v53 = vld [vmem:[%s1054_s20 + $0x68] sm:$0xff]  ;;  %v652_v54 = vld [vmem:[%s1054_s20 + $0x70] sm:$0xff]  ;;  %s1479_s25 = smov %s1486_s6 }
  0xf1   : >> { %633 = vst [vmem:[%s1050_s15 + $0x20] sm:$0xff] %v632_v44  ;;  %s1384_s8 = scalar_lea.vmem %s1232_s24, %s869_s7 [#allocation2]   ;;  %s1387_s9 = scalar_lea.vmem %s1335_s29, %s869_s7   ;;  %v654_v55 = vld [vmem:[%s1054_s20 + $0x78] sm:$0xff]  ;;  %v656_v56 = vld [vmem:[%s1054_s20 + $0x80] sm:$0xff]  ;;  %v658_v57 = vld [vmem:[%s1054_s20 + $0x88] sm:$0xff] }
  0xf2   : >> { %635 = vst [vmem:[%s1050_s15 + $0x28] sm:$0xff] %v634_v45  ;;  %v660_v58 = vld [vmem:[%s1054_s20 + $0x90] sm:$0xff]  ;;  %v662_v59 = vld [vmem:[%s1054_s20 + $0x98] sm:$0xff]  ;;  %v664_v60 = vld [vmem:[%s1054_s20 + $0xa0] sm:$0xff] }
  0xf3   : >> { %637 = vst [vmem:[%s1050_s15 + $0x30] sm:$0xff] %v636_v46  ;;  %v666_v61 = vld [vmem:[%s1054_s20 + $0xa8] sm:$0xff]  ;;  %v668_v62 = vld [vmem:[%s1054_s20 + $0xb0] sm:$0xff]  ;;  %v670_v63 = vld [vmem:[%s1054_s20 + $0xb8] sm:$0xff] }
  0xf4   : >> { %639 = vst [vmem:[%s1050_s15 + $0x38] sm:$0xff] %v638_v47  ;;  %v672_v0 = vld [vmem:[%s1054_s20 + $0xc0] sm:$0xff]  ;;  %v674_v1 = vld [vmem:[%s1054_s20 + $0xc8] sm:$0xff]  ;;  %v676_v2 = vld [vmem:[%s1054_s20 + $0xd0] sm:$0xff] }
  0xf5   : >> { %641 = vst [vmem:[%s1050_s15 + $0x40] sm:$0xff] %v640_v48  ;;  %v678_v3 = vld [vmem:[%s1054_s20 + $0xd8] sm:$0xff]  ;;  %v680_v4 = vld [vmem:[%s1054_s20 + $0xe0] sm:$0xff]  ;;  %v682_v5 = vld [vmem:[%s1054_s20 + $0xe8] sm:$0xff] }
  0xf6   : >> { %643 = vst [vmem:[%s1050_s15 + $0x48] sm:$0xff] %v642_v49  ;;  %v684_v6 = vld [vmem:[%s1054_s20 + $0xf0] sm:$0xff]  ;;  %v686_v7 = vld [vmem:[%s1054_s20 + $0xf8] sm:$0xff]  ;;  %s1478_s20 = smov %s1384_s8 }
  0xf7   : >> { %645 = vst [vmem:[%s1050_s15 + $0x50] sm:$0xff] %v644_v50 }
  0xf8   : >> { %647 = vst [vmem:[%s1050_s15 + $0x58] sm:$0xff] %v646_v51 }
  0xf9   : >> { %649 = vst [vmem:[%s1050_s15 + $0x60] sm:$0xff] %v648_v52 }
  0xfa   : >> { %651 = vst [vmem:[%s1050_s15 + $0x68] sm:$0xff] %v650_v53 }
  0xfb   : >> { %653 = vst [vmem:[%s1050_s15 + $0x70] sm:$0xff] %v652_v54 }
  0xfc   : >> { %655 = vst [vmem:[%s1050_s15 + $0x78] sm:$0xff] %v654_v55 }
  0xfd   : >> { %657 = vst [vmem:[%s1050_s15 + $0x80] sm:$0xff] %v656_v56 }
  0xfe   : >> { %659 = vst [vmem:[%s1050_s15 + $0x88] sm:$0xff] %v658_v57 }
  0xff   : >> { %661 = vst [vmem:[%s1050_s15 + $0x90] sm:$0xff] %v660_v58 }
 0x100   : >> { %663 = vst [vmem:[%s1050_s15 + $0x98] sm:$0xff] %v662_v59 }
 0x101   : >> { %665 = vst [vmem:[%s1050_s15 + $0xa0] sm:$0xff] %v664_v60 }
 0x102   : >> { %667 = vst [vmem:[%s1050_s15 + $0xa8] sm:$0xff] %v666_v61 }
 0x103   : >> { %669 = vst [vmem:[%s1050_s15 + $0xb0] sm:$0xff] %v668_v62 }
 0x104   : >> { %671 = vst [vmem:[%s1050_s15 + $0xb8] sm:$0xff] %v670_v63 }
 0x105   : >> { %673 = vst [vmem:[%s1050_s15 + $0xc0] sm:$0xff] %v672_v0 }
 0x106   : >> { %675 = vst [vmem:[%s1050_s15 + $0xc8] sm:$0xff] %v674_v1 }
 0x107   : >> { %677 = vst [vmem:[%s1050_s15 + $0xd0] sm:$0xff] %v676_v2 }
 0x108   : >> { %679 = vst [vmem:[%s1050_s15 + $0xd8] sm:$0xff] %v678_v3  ;;  %620 = sbr.rel (!%p617_p12) target bundleno = 236 (0xec), region = 122 }
 0x109   : >> { %681 = vst [vmem:[%s1050_s15 + $0xe0] sm:$0xff] %v680_v4 }
 0x10a   : >> { %683 = vst [vmem:[%s1050_s15 + $0xe8] sm:$0xff] %v682_v5 }
 0x10b   : >> { %685 = vst [vmem:[%s1050_s15 + $0xf0] sm:$0xff] %v684_v6 }
 0x10c   : >> { %687 = vst [vmem:[%s1050_s15 + $0xf8] sm:$0xff] %v686_v7  ;;  %s1477_s15 = smov %s1387_s9 }
 0x10d PF: > { %s1452_s10 = sand.u32 31, %s1484_s12   ;;  %s880_s11 = sshll.u32 %s1341_s4, 8 }
 0x10e   : > { %s699_s14 = scalar_lea.vmem %s1232_s24, %s880_s11 [#allocation2]   ;;  %s701_s17 = scalar_lea.vmem %s1335_s29, %s880_s11  }
 0x10f   : > { %p874_p13 = scmp.le.s32.totalorder %s1452_s10, 0 }
 0x110   : > { %s1064_s18 = smov (!%p874_p13), %s701_s17   ;;  %s1068_s21 = smov (!%p874_p13), %s699_s14  }
 0x111   : > { %792 = sbr.rel (%p874_p13) target bundleno = 286 (0x11e), region = 127  ;;  %s1072_s22 = smov (!%p874_p13), 0  }
 0x112   : > { %s1076_s23 = smov (!%p874_p13), 0  }
 0x116 LB: >> { %v711_v8 = vld [vmem:[%s1070_s21] sm:$0xff]  ;;  %s713_s12 = sadd.s32 1, %s1074_s22  ;;  %s705_s23 = sadd.s32 1, %s1078_s23   ;;  %s1078_s23 = sphi %s1076_s23, %s705_s23   ;;  %s1074_s22 = sphi %s1072_s22, %s1073_s22   ;;  %s1070_s21 = sphi %s1068_s21, %s718_s21   ;;  %s1066_s18 = sphi %s1064_s18, %s719_s18  }
 0x117   : >> { %712 = vst [vmem:[%s1066_s18] sm:$0xff] %v711_v8  ;;  %p714_p0 = scmp.ge.s32.totalorder %s713_s12, %s1452_s10  ;;  %p704_p1 = scmp.ge.s32.totalorder %s705_s23, %s1452_s10 }
 0x119   : >> { %s1488_s12 = smov (%p714_p0, %s713_s12), 0  ;;  %707 = sbr.rel (!%p704_p1) target bundleno = 278 (0x116), region = 133 }
 0x11a   : >> { %s875_s24 = sshll.u32 %s1488_s12, 3  ;;  %s1073_s22 = smov %s1488_s12  }
 0x11b   : >> { %s718_s21 = scalar_lea.vmem %s699_s14, %s875_s24 [#allocation2]   ;;  %s719_s18 = scalar_lea.vmem %s701_s17, %s875_s24  }
 0x11e PF: > { %p10_p2 = scmp.ge.s32.totalorder %s1115_s16, 6   ;;  %s1480_s12 = smov %s1042_s13 }
 0x11f   : > { %s1481_s13 = smov %s1123_s19  ;;  %s1482_s14 = smov %s1115_s16 }
 0x120   :  { %12 = sbr.rel (!%p10_p2) target bundleno = 2 (0x2), region = 144 }

// kernel: model_forward.5
= control target key start
LH: loop header
LB: loop body
LE: loop exit
PB: predicated region body
PF: predicated region fallthrough
CT: control target
= control target key end

     0   :  { %s1096_s12 = smov 0   ;;  %s1576_s0 = inlined_call_operand.vmem [shape: f32[512,490], index: 0, kind: input, shape index: {}]   ;;  %s1577_s1 = inlined_call_operand.vmem [shape: f32[490,20], index: 1, kind: input, shape index: {}]   ;;  %s1578_s2 = inlined_call_operand.vmem [shape: f32[1,20], index: 2, kind: input, shape index: {}]   ;;  %s1579_s3 = inlined_call_operand.vmem [shape: f32[512,20], index: 3, kind: output, shape index: {}]  }
   0x1 LB: > { %s1013_s13 = sadd.s32 4294967295, %s1074_s12   ;;  %p1017_p0 = scmp.ge.s32.totalorder %s1074_s12, 1  ;;  %s1074_s12 = sphi %s1096_s12, %s13_s12  }
   0x2   : > { %p139_p1 = scmp.lt.s32.totalorder %s1074_s12, 3 }
   0x4   : > { %p140_p2 = pnand %p1017_p0, %p139_p1 }
   0x5   : > { %s1193_s22 = sshll.u32 (!%p140_p2), %s1013_s13, 5 }
   0x6   : > { %143 = sbr.rel (%p140_p2) target bundleno = 428 (0x1ac), region = 32  ;;  %p165_p3 = scmp.lt.s32.totalorder (!%p140_p2), %s1193_s22, 63 }
   0xb   : > { %v352_v0 = vld [vmem:[%s1577_s1 + $0x178] sm:$0xff]  ;;  %v351_v2 = vld [vmem:[%s1577_s1 + $0x170] sm:$0xff]  ;;  %vm468_vm0 = vcmask 1041408   ;;  %v350_v5 = vld [vmem:[%s1577_s1 + $0x168] sm:$0xff]  ;;  %s1581_s22 = smov (!%p165_p3, %s1193_s22), 63  ;;  %vm371_vm1 = vcmask 867328  }
   0xc   : > { %v320_v1 = vld [vmem:[%s1577_s1 + $0x78] sm:$0xff]  ;;  %698 = vmatpush.msra.mxu2 %v352_v0  ;;  %v319_v3 = vld [vmem:[%s1577_s1 + $0x70] sm:$0xff]  ;;  %v318_v6 = vld [vmem:[%s1577_s1 + $0x68] sm:$0xff]  ;;  %s1058_s16 = sshll.u32 %s1581_s22, 5  ;;  %s1022_s19 = sshll.u32 %s1581_s22, 3  ;;  %vm924_vm2 = vcmask 162816  }
   0xd   : > { %472 = vmatpush.msra.mxu0 %v320_v1  ;;  %v336_v4 = vld [vmem:[%s1577_s1 + $0xf8] sm:$0xff]  ;;  %v335_v7 = vld [vmem:[%s1577_s1 + $0xf0] sm:$0xff]  ;;  %v366_v8 = vld [vmem:[%s1577_s1 + $0x1e8] sm:$0x3]  ;;  %s1289_s4 = scalar_lea.vmem %s1576_s0, %s1058_s16  ;;  %s1401_s23 = scalar_lea.vmem %s1579_s3, %s1022_s19 }
   0xe   : > { %585 = vmatpush.msra.mxu1 %v336_v4  ;;  %699 = vmatpush.msra.mxu2 %v351_v2  ;;  %v334_v9 = vld [vmem:[%s1577_s1 + $0xe8] sm:$0xff]  ;;  %v349_v10 = vld [vmem:[%s1577_s1 + $0x160] sm:$0xff]  ;;  %v364_v14 = vld [vmem:[%s1577_s1 + $0x1d8] sm:$0xff] }
   0xf   : > { %473 = vmatpush.msra.mxu0 %v319_v3  ;;  %1023 = vmatpush.msk.msra.mxu3 %vm468_vm0, %v366_v8  ;;  %v317_v11 = vld [vmem:[%s1577_s1 + $0x60] sm:$0xff]  ;;  %v348_v15 = vld [vmem:[%s1577_s1 + $0x158] sm:$0xff]  ;;  %v363_v18 = vld [vmem:[%s1577_s1 + $0x1d0] sm:$0xff] }
  0x10   : > { %586 = vmatpush.msra.mxu1 %v335_v7  ;;  %v365_v12 = vld [vmem:[%s1577_s1 + $0x1e0] sm:$0xff]  ;;  %700 = vmatpush.msra.mxu2 %v350_v5  ;;  %v316_v16 = vld [vmem:[%s1577_s1 + $0x58] sm:$0xff]  ;;  %v347_v19 = vld [vmem:[%s1577_s1 + $0x150] sm:$0xff] }
  0x11   : > { %474 = vmatpush.msra.mxu0 %v318_v6  ;;  %v333_v13 = vld [vmem:[%s1577_s1 + $0xe0] sm:$0xff]  ;;  %814 = vmatpush.msra.mxu3 %v365_v12  ;;  %v332_v17 = vld [vmem:[%s1577_s1 + $0xd8] sm:$0xff]  ;;  %v315_v20 = vld [vmem:[%s1577_s1 + $0x50] sm:$0xff] }
  0x12   : > { %587 = vmatpush.msra.mxu1 %v334_v9  ;;  %701 = vmatpush.msra.mxu2 %v349_v10  ;;  %v331_v21 = vld [vmem:[%s1577_s1 + $0xd0] sm:$0xff]  ;;  %v362_v22 = vld [vmem:[%s1577_s1 + $0x1c8] sm:$0xff]  ;;  %v361_v26 = vld [vmem:[%s1577_s1 + $0x1c0] sm:$0xff] }
  0x13   : > { %475 = vmatpush.msra.mxu0 %v317_v11  ;;  %815 = vmatpush.msra.mxu3 %v364_v14  ;;  %v346_v23 = vld [vmem:[%s1577_s1 + $0x148] sm:$0xff]  ;;  %v345_v27 = vld [vmem:[%s1577_s1 + $0x140] sm:$0xff]  ;;  %v360_v30 = vld [vmem:[%s1577_s1 + $0x1b8] sm:$0xff] }
  0x14   : > { %588 = vmatpush.msra.mxu1 %v333_v13  ;;  %702 = vmatpush.msra.mxu2 %v348_v15  ;;  %v314_v24 = vld [vmem:[%s1577_s1 + $0x48] sm:$0xff]  ;;  %v313_v28 = vld [vmem:[%s1577_s1 + $0x40] sm:$0xff]  ;;  %v344_v31 = vld [vmem:[%s1577_s1 + $0x138] sm:$0xff] }
  0x15   : > { %476 = vmatpush.msra.mxu0 %v316_v16  ;;  %816 = vmatpush.msra.mxu3 %v363_v18  ;;  %v330_v25 = vld [vmem:[%s1577_s1 + $0xc8] sm:$0xff]  ;;  %v329_v29 = vld [vmem:[%s1577_s1 + $0xc0] sm:$0xff]  ;;  %v312_v32 = vld [vmem:[%s1577_s1 + $0x38] sm:$0xff] }
  0x16   : > { %589 = vmatpush.msra.mxu1 %v332_v17  ;;  %703 = vmatpush.msra.mxu2 %v347_v19  ;;  %v328_v33 = vld [vmem:[%s1577_s1 + $0xb8] sm:$0xff]  ;;  %v359_v34 = vld [vmem:[%s1577_s1 + $0x1b0] sm:$0xff]  ;;  %v358_v38 = vld [vmem:[%s1577_s1 + $0x1a8] sm:$0xff] }
  0x17   : > { %477 = vmatpush.msra.mxu0 %v315_v20  ;;  %817 = vmatpush.msra.mxu3 %v362_v22  ;;  %v343_v35 = vld [vmem:[%s1577_s1 + $0x130] sm:$0xff]  ;;  %v342_v39 = vld [vmem:[%s1577_s1 + $0x128] sm:$0xff]  ;;  %v357_v42 = vld [vmem:[%s1577_s1 + $0x1a0] sm:$0xff] }
  0x18   : > { %590 = vmatpush.msra.mxu1 %v331_v21  ;;  %704 = vmatpush.msra.mxu2 %v346_v23  ;;  %v311_v36 = vld [vmem:[%s1577_s1 + $0x30] sm:$0xff]  ;;  %v310_v40 = vld [vmem:[%s1577_s1 + $0x28] sm:$0xff]  ;;  %v341_v43 = vld [vmem:[%s1577_s1 + $0x120] sm:$0xff] }
  0x19   : > { %478 = vmatpush.msra.mxu0 %v314_v24  ;;  %818 = vmatpush.msra.mxu3 %v361_v26  ;;  %v327_v37 = vld [vmem:[%s1577_s1 + $0xb0] sm:$0xff]  ;;  %v326_v41 = vld [vmem:[%s1577_s1 + $0xa8] sm:$0xff]  ;;  %v309_v44 = vld [vmem:[%s1577_s1 + $0x20] sm:$0xff] }
  0x1a   : > { %591 = vmatpush.msra.mxu1 %v330_v25  ;;  %705 = vmatpush.msra.mxu2 %v345_v27  ;;  %v325_v45 = vld [vmem:[%s1577_s1 + $0xa0] sm:$0xff]  ;;  %v356_v46 = vld [vmem:[%s1577_s1 + $0x198] sm:$0xff]  ;;  %v355_v50 = vld [vmem:[%s1577_s1 + $0x190] sm:$0xff] }
  0x1b   : > { %479 = vmatpush.msra.mxu0 %v313_v28  ;;  %819 = vmatpush.msra.mxu3 %v360_v30  ;;  %v340_v47 = vld [vmem:[%s1577_s1 + $0x118] sm:$0xff]  ;;  %v339_v51 = vld [vmem:[%s1577_s1 + $0x110] sm:$0xff]  ;;  %v354_v54 = vld [vmem:[%s1577_s1 + $0x188] sm:$0xff] }
  0x1c   : > { %592 = vmatpush.msra.mxu1 %v329_v29  ;;  %706 = vmatpush.msra.mxu2 %v344_v31  ;;  %v308_v48 = vld [vmem:[%s1577_s1 + $0x18] sm:$0xff]  ;;  %v307_v52 = vld [vmem:[%s1577_s1 + $0x10] sm:$0xff]  ;;  %v338_v55 = vld [vmem:[%s1577_s1 + $0x108] sm:$0xff] }
  0x1d   : > { %480 = vmatpush.msra.mxu0 %v312_v32  ;;  %820 = vmatpush.msra.mxu3 %v359_v34  ;;  %v324_v49 = vld [vmem:[%s1577_s1 + $0x98] sm:$0xff]  ;;  %v323_v53 = vld [vmem:[%s1577_s1 + $0x90] sm:$0xff]  ;;  %v306_v56 = vld [vmem:[%s1577_s1 + $0x8] sm:$0xff] }
  0x1e   : > { %593 = vmatpush.msra.mxu1 %v328_v33  ;;  %707 = vmatpush.msra.mxu2 %v343_v35  ;;  %v322_v57 = vld [vmem:[%s1577_s1 + $0x88] sm:$0xff]  ;;  %v353_v58 = vld [vmem:[%s1577_s1 + $0x180] sm:$0xff]  ;;  %v179_v61 = vld [vmem:[%s1289_s4 + $0x10] sm:$0xff] }
  0x1f   : > { %481 = vmatpush.msra.mxu0 %v311_v36  ;;  %821 = vmatpush.msra.mxu3 %v358_v38  ;;  %v337_v59 = vld [vmem:[%s1577_s1 + $0x100] sm:$0xff]  ;;  %v180_v63 = vld [vmem:[%s1289_s4 + $0x18] sm:$0xff]  ;;  %v178_v1 = vld [vmem:[%s1289_s4 + $0x8] sm:$0xff] }
  0x20   : > { %594 = vmatpush.msra.mxu1 %v327_v37  ;;  %708 = vmatpush.msra.mxu2 %v342_v39  ;;  %v305_v60 = vld [vmem:[%s1577_s1] sm:$0xff]  ;;  %v183_v2 = vld [vmem:[%s1289_s4 + $0x30] sm:$0xff]  ;;  %v184_v4 = vld [vmem:[%s1289_s4 + $0x38] sm:$0xff] }
  0x21   : > { %482 = vmatpush.msra.mxu0 %v310_v40  ;;  %822 = vmatpush.msra.mxu3 %v357_v42  ;;  %v177_v62 = vld [vmem:[%s1289_s4] sm:$0xff]  ;;  %v182_v5 = vld [vmem:[%s1289_s4 + $0x28] sm:$0xff]  ;;  %v187_v6 = vld [vmem:[%s1289_s4 + $0x50] sm:$0xff] }
  0x22   : > { %595 = vmatpush.msra.mxu1 %v326_v41  ;;  %709 = vmatpush.msra.mxu2 %v341_v43  ;;  %v321_v0 = vld [vmem:[%s1577_s1 + $0x80] sm:$0xff]  ;;  %v188_v8 = vld [vmem:[%s1289_s4 + $0x58] sm:$0xff]  ;;  %v186_v9 = vld [vmem:[%s1289_s4 + $0x48] sm:$0xff] }
  0x23   : > { %483 = vmatpush.msra.mxu0 %v309_v44  ;;  %823 = vmatpush.msra.mxu3 %v356_v46  ;;  %v181_v3 = vld [vmem:[%s1289_s4 + $0x20] sm:$0xff]  ;;  %v191_v10 = vld [vmem:[%s1289_s4 + $0x70] sm:$0xff]  ;;  %v192_v12 = vld [vmem:[%s1289_s4 + $0x78] sm:$0xff] }
  0x24   : > { %596 = vmatpush.msra.mxu1 %v325_v45  ;;  %710 = vmatpush.msra.mxu2 %v340_v47  ;;  %v185_v7 = vld [vmem:[%s1289_s4 + $0x40] sm:$0xff]  ;;  %v190_v13 = vld [vmem:[%s1289_s4 + $0x68] sm:$0xff]  ;;  %v195_v14 = vld [vmem:[%s1289_s4 + $0x90] sm:$0xff] }
  0x25   : > { %484 = vmatpush.msra.mxu0 %v308_v48  ;;  %824 = vmatpush.msra.mxu3 %v355_v50  ;;  %v189_v11 = vld [vmem:[%s1289_s4 + $0x60] sm:$0xff]  ;;  %v196_v16 = vld [vmem:[%s1289_s4 + $0x98] sm:$0xff]  ;;  %v194_v17 = vld [vmem:[%s1289_s4 + $0x88] sm:$0xff] }
  0x26   : > { %597 = vmatpush.msra.mxu1 %v324_v49  ;;  %711 = vmatpush.msra.mxu2 %v339_v51  ;;  %v193_v15 = vld [vmem:[%s1289_s4 + $0x80] sm:$0xff]  ;;  %v199_v18 = vld [vmem:[%s1289_s4 + $0xb0] sm:$0xff]  ;;  %v200_v20 = vld [vmem:[%s1289_s4 + $0xb8] sm:$0xff] }
  0x27   : > { %485 = vmatpush.msra.mxu0 %v307_v52  ;;  %825 = vmatpush.msra.mxu3 %v354_v54  ;;  %v197_v19 = vld [vmem:[%s1289_s4 + $0xa0] sm:$0xff]  ;;  %v198_v21 = vld [vmem:[%s1289_s4 + $0xa8] sm:$0xff]  ;;  %v203_v22 = vld [vmem:[%s1289_s4 + $0xd0] sm:$0xff] }
  0x28   : > { %598 = vmatpush.msra.mxu1 %v323_v53  ;;  %712 = vmatpush.msra.mxu2 %v338_v55  ;;  %v201_v23 = vld [vmem:[%s1289_s4 + $0xc0] sm:$0xff]  ;;  %v204_v24 = vld [vmem:[%s1289_s4 + $0xd8] sm:$0xff]  ;;  %v202_v25 = vld [vmem:[%s1289_s4 + $0xc8] sm:$0xff] }
  0x29   : > { %486 = vmatpush.msra.mxu0 %v306_v56  ;;  %826 = vmatpush.msra.mxu3 %v353_v58  ;;  %v207_v26 = vld [vmem:[%s1289_s4 + $0xf0] sm:$0xff]  ;;  %v205_v27 = vld [vmem:[%s1289_s4 + $0xe0] sm:$0xff]  ;;  %v208_v28 = vld [vmem:[%s1289_s4 + $0xf8] sm:$0xff] }
  0x2a   : > { %599 = vmatpush.msra.mxu1 %v322_v57  ;;  %713 = vmatpush.msra.mxu2 %v337_v59  ;;  %v206_v29 = vld [vmem:[%s1289_s4 + $0xe8] sm:$0xff]  ;;  %v211_v30 = vld [vmem:[%s1289_s4 + $0x110] sm:$0xff]  ;;  %v209_v31 = vld [vmem:[%s1289_s4 + $0x100] sm:$0xff] }
  0x2b   : > { %487 = vmatpush.msra.mxu0 %v305_v60  ;;  %714 = vmatmul.f32.vlgmr.msra.gmra.mxu2 %v179_v61  ;;  %v212_v32 = vld [vmem:[%s1289_s4 + $0x118] sm:$0xff]  ;;  %v210_v33 = vld [vmem:[%s1289_s4 + $0x108] sm:$0xff]  ;;  %v215_v34 = vld [vmem:[%s1289_s4 + $0x130] sm:$0xff] }
  0x2c   : > { %488 = vmatmul.f32.vlgmr.msra.gmra.mxu0 %v177_v62  ;;  %1024 = vmatmul.msk.f32.vlgmr.msra.gmra.mxu3 %vm371_vm1, %v180_v63  ;;  %v213_v35 = vld [vmem:[%s1289_s4 + $0x120] sm:$0xff]  ;;  %v216_v36 = vld [vmem:[%s1289_s4 + $0x138] sm:$0xff]  ;;  %v214_v37 = vld [vmem:[%s1289_s4 + $0x128] sm:$0xff] }
  0x2d   : > { %600 = vmatpush.msra.mxu1 %v321_v0  ;;  %v219_v38 = vld [vmem:[%s1289_s4 + $0x150] sm:$0xff]  ;;  %v217_v39 = vld [vmem:[%s1289_s4 + $0x140] sm:$0xff]  ;;  %v220_v40 = vld [vmem:[%s1289_s4 + $0x158] sm:$0xff] }
  0x2e   : > { %601 = vmatmul.f32.vlgmr.msra.gmra.mxu1 %v178_v1  ;;  %v218_v41 = vld [vmem:[%s1289_s4 + $0x148] sm:$0xff]  ;;  %v223_v42 = vld [vmem:[%s1289_s4 + $0x170] sm:$0xff]  ;;  %v221_v43 = vld [vmem:[%s1289_s4 + $0x160] sm:$0xff] }
  0x2f   : > { %v224_v44 = vld [vmem:[%s1289_s4 + $0x178] sm:$0xff]  ;;  %v222_v45 = vld [vmem:[%s1289_s4 + $0x168] sm:$0xff]  ;;  %v227_v46 = vld [vmem:[%s1289_s4 + $0x190] sm:$0xff] }
  0x30   : > { %v225_v47 = vld [vmem:[%s1289_s4 + $0x180] sm:$0xff]  ;;  %v228_v48 = vld [vmem:[%s1289_s4 + $0x198] sm:$0xff]  ;;  %v226_v49 = vld [vmem:[%s1289_s4 + $0x188] sm:$0xff] }
  0x31   : > { %v231_v50 = vld [vmem:[%s1289_s4 + $0x1b0] sm:$0xff]  ;;  %v229_v51 = vld [vmem:[%s1289_s4 + $0x1a0] sm:$0xff]  ;;  %v232_v52 = vld [vmem:[%s1289_s4 + $0x1b8] sm:$0xff] }
  0x32   : > { %v230_v53 = vld [vmem:[%s1289_s4 + $0x1a8] sm:$0xff]  ;;  %v235_v54 = vld [vmem:[%s1289_s4 + $0x1d0] sm:$0xff]  ;;  %v233_v55 = vld [vmem:[%s1289_s4 + $0x1c0] sm:$0xff] }
  0x33   : > { %717 = vmatmul.f32.gmra.mxu2 %v183_v2  ;;  %v236_v56 = vld [vmem:[%s1289_s4 + $0x1d8] sm:$0xff]  ;;  %v234_v57 = vld [vmem:[%s1289_s4 + $0x1c8] sm:$0xff]  ;;  %v239_v58 = vld [vmem:[%s1289_s4 + $0x1f0] sm:$0xff] }
  0x34   : > { %491 = vmatmul.f32.gmra.mxu0 %v181_v3  ;;  %1025 = vmatmul.msk.f32.gmra.mxu3 %vm371_vm1, %v184_v4  ;;  %v237_v59 = vld [vmem:[%s1289_s4 + $0x1e0] sm:$0xff]  ;;  %v240_v60 = vld [vmem:[%s1289_s4 + $0x1f8] sm:$0xff]  ;;  %v238_v61 = vld [vmem:[%s1289_s4 + $0x1e8] sm:$0xff] }
  0x35   : > { %v1389_v62 = vld [vmem:[%s1578_s2] ss:$0 sm:$0xff]  ;;  %v243_v0 = vld [vmem:[%s1289_s4 + $0x210] sm:$0xff]  ;;  %v244_v3 = vld [vmem:[%s1289_s4 + $0x218] sm:$0xff] }
  0x36   : > { %604 = vmatmul.f32.gmra.mxu1 %v182_v5  ;;  %v241_v1 = vld [vmem:[%s1289_s4 + $0x200] sm:$0xff]  ;;  %v242_v5 = vld [vmem:[%s1289_s4 + $0x208] sm:$0xff] }
  0x3b   : > { %720 = vmatmul.f32.gmra.mxu2 %v187_v6 }
  0x3c   : > { %494 = vmatmul.f32.gmra.mxu0 %v185_v7  ;;  %1026 = vmatmul.msk.f32.gmra.mxu3 %vm371_vm1, %v188_v8 }
  0x3e   : > { %607 = vmatmul.f32.gmra.mxu1 %v186_v9 }
  0x43   : > { %723 = vmatmul.f32.gmra.mxu2 %v191_v10 }
  0x44   : > { %497 = vmatmul.f32.gmra.mxu0 %v189_v11  ;;  %1027 = vmatmul.msk.f32.gmra.mxu3 %vm371_vm1, %v192_v12  ;;  %v247_v11 = vld [vmem:[%s1289_s4 + $0x230] sm:$0xff]  ;;  %v245_v12 = vld [vmem:[%s1289_s4 + $0x220] sm:$0xff] }
  0x46   : > { %610 = vmatmul.f32.gmra.mxu1 %v190_v13 }
  0x4b   : > { %726 = vmatmul.f32.gmra.mxu2 %v195_v14 }
  0x4c   : > { %500 = vmatmul.f32.gmra.mxu0 %v193_v15  ;;  %1028 = vmatmul.msk.f32.gmra.mxu3 %vm371_vm1, %v196_v16  ;;  %v248_v15 = vld [vmem:[%s1289_s4 + $0x238] sm:$0xff] }
  0x4e   : > { %613 = vmatmul.f32.gmra.mxu1 %v194_v17  ;;  %v246_v17 = vld [vmem:[%s1289_s4 + $0x228] sm:$0xff] }
  0x53   : > { %729 = vmatmul.f32.gmra.mxu2 %v199_v18 }
  0x54   : > { %503 = vmatmul.f32.gmra.mxu0 %v197_v19  ;;  %1029 = vmatmul.msk.f32.gmra.mxu3 %vm371_vm1, %v200_v20 }
  0x56   : > { %616 = vmatmul.f32.gmra.mxu1 %v198_v21 }
  0x5b   : > { %732 = vmatmul.f32.gmra.mxu2 %v203_v22 }
  0x5c   : > { %506 = vmatmul.f32.gmra.mxu0 %v201_v23  ;;  %1030 = vmatmul.msk.f32.gmra.mxu3 %vm371_vm1, %v204_v24  ;;  %v251_v23 = vld [vmem:[%s1289_s4 + $0x250] sm:$0xff]  ;;  %v249_v24 = vld [vmem:[%s1289_s4 + $0x240] sm:$0xff] }
  0x5e   : > { %619 = vmatmul.f32.gmra.mxu1 %v202_v25 }
  0x63   : > { %735 = vmatmul.f32.gmra.mxu2 %v207_v26 }
  0x64   : > { %509 = vmatmul.f32.gmra.mxu0 %v205_v27  ;;  %1031 = vmatmul.msk.f32.gmra.mxu3 %vm371_vm1, %v208_v28  ;;  %v252_v27 = vld [vmem:[%s1289_s4 + $0x258] sm:$0xff] }
  0x66   : > { %622 = vmatmul.f32.gmra.mxu1 %v206_v29  ;;  %v250_v29 = vld [vmem:[%s1289_s4 + $0x248] sm:$0xff] }
  0x6b   : > { %738 = vmatmul.f32.gmra.mxu2 %v211_v30 }
  0x6c   : > { %512 = vmatmul.f32.gmra.mxu0 %v209_v31  ;;  %1032 = vmatmul.msk.f32.gmra.mxu3 %vm371_vm1, %v212_v32 }
  0x6e   : > { %625 = vmatmul.f32.gmra.mxu1 %v210_v33 }
  0x73   : > { %741 = vmatmul.f32.gmra.mxu2 %v215_v34 }
  0x74   : > { %515 = vmatmul.f32.gmra.mxu0 %v213_v35  ;;  %1033 = vmatmul.msk.f32.gmra.mxu3 %vm371_vm1, %v216_v36  ;;  %v255_v35 = vld [vmem:[%s1289_s4 + $0x270] sm:$0xff]  ;;  %v253_v36 = vld [vmem:[%s1289_s4 + $0x260] sm:$0xff] }
  0x76   : > { %628 = vmatmul.f32.gmra.mxu1 %v214_v37 }
  0x7b   : > { %744 = vmatmul.f32.gmra.mxu2 %v219_v38 }
  0x7c   : > { %518 = vmatmul.f32.gmra.mxu0 %v217_v39  ;;  %1034 = vmatmul.msk.f32.gmra.mxu3 %vm371_vm1, %v220_v40  ;;  %v256_v39 = vld [vmem:[%s1289_s4 + $0x278] sm:$0xff] }
  0x7e   : > { %631 = vmatmul.f32.gmra.mxu1 %v218_v41  ;;  %v254_v41 = vld [vmem:[%s1289_s4 + $0x268] sm:$0xff] }
  0x83   : > { %747 = vmatmul.f32.gmra.mxu2 %v223_v42 }
  0x84   : > { %521 = vmatmul.f32.gmra.mxu0 %v221_v43  ;;  %1035 = vmatmul.msk.f32.gmra.mxu3 %vm371_vm1, %v224_v44 }
  0x86   : > { %634 = vmatmul.f32.gmra.mxu1 %v222_v45 }
  0x8b   : > { %750 = vmatmul.f32.gmra.mxu2 %v227_v46 }
  0x8c   : > { %524 = vmatmul.f32.gmra.mxu0 %v225_v47  ;;  %1036 = vmatmul.msk.f32.gmra.mxu3 %vm371_vm1, %v228_v48  ;;  %v259_v47 = vld [vmem:[%s1289_s4 + $0x290] sm:$0xff]  ;;  %v257_v48 = vld [vmem:[%s1289_s4 + $0x280] sm:$0xff] }
  0x8e   : > { %637 = vmatmul.f32.gmra.mxu1 %v226_v49 }
  0x93   : > { %753 = vmatmul.f32.gmra.mxu2 %v231_v50 }
  0x94   : > { %527 = vmatmul.f32.gmra.mxu0 %v229_v51  ;;  %1037 = vmatmul.msk.f32.gmra.mxu3 %vm371_vm1, %v232_v52  ;;  %v260_v51 = vld [vmem:[%s1289_s4 + $0x298] sm:$0xff] }
  0x96   : > { %640 = vmatmul.f32.gmra.mxu1 %v230_v53  ;;  %v258_v53 = vld [vmem:[%s1289_s4 + $0x288] sm:$0xff] }
  0x9b   : > { %756 = vmatmul.f32.gmra.mxu2 %v235_v54 }
  0x9c   : > { %530 = vmatmul.f32.gmra.mxu0 %v233_v55  ;;  %1038 = vmatmul.msk.f32.gmra.mxu3 %vm371_vm1, %v236_v56 }
  0x9e   : > { %643 = vmatmul.f32.gmra.mxu1 %v234_v57 }
  0xa3   : > { %759 = vmatmul.f32.gmra.mxu2 %v239_v58 }
  0xa4   : > { %533 = vmatmul.f32.gmra.mxu0 %v237_v59  ;;  %1039 = vmatmul.msk.f32.gmra.mxu3 %vm371_vm1, %v240_v60  ;;  %v263_v59 = vld [vmem:[%s1289_s4 + $0x2b0] sm:$0xff]  ;;  %v261_v60 = vld [vmem:[%s1289_s4 + $0x2a0] sm:$0xff] }
  0xa6   : > { %646 = vmatmul.f32.gmra.mxu1 %v238_v61 }
  0xa9   : > { %v489_v63 = vpop.f32.mrf.mxu0 }
  0xaa   : > { %v490_v2 = vadd.f32 %v1389_v62, %v489_v63 }
  0xab   : > { %v602_v4 = vpop.f32.mrf.mxu1  ;;  %762 = vmatmul.f32.gmra.mxu2 %v243_v0  ;;  %v264_v0 = vld [vmem:[%s1289_s4 + $0x2b8] sm:$0xff] }
  0xac   : > { %v603_v6 = vadd.f32 %v602_v4, %v490_v2  ;;  %536 = vmatmul.f32.gmra.mxu0 %v241_v1  ;;  %1040 = vmatmul.msk.f32.gmra.mxu3 %vm371_vm1, %v244_v3  ;;  %v262_v2 = vld [vmem:[%s1289_s4 + $0x2a8] sm:$0xff] }
  0xae   : > { %649 = vmatmul.f32.gmra.mxu1 %v242_v5  ;;  %v715_v7 = vpop.f32.mrf.mxu2 }
  0xaf   : > { %v716_v8 = vadd.f32 %v715_v7, %v603_v6  ;;  %v828_v9 = vpop.f32.mrf.mxu3 }
  0xb1   : > { %v492_v10 = vpop.f32.mrf.mxu0  ;;  %v829_v13 = vadd.f32 %v828_v9, %v716_v8  ;;  %v267_v8 = vld [vmem:[%s1289_s4 + $0x2d0] sm:$0xff]  ;;  %v265_v9 = vld [vmem:[%s1289_s4 + $0x2c0] sm:$0xff] }
  0xb2   : > { %v493_v14 = vadd.f32 %v1389_v62, %v492_v10 }
  0xb3   : > { %v605_v16 = vpop.f32.mrf.mxu1  ;;  %925 = vst.msk [vmem:[%s1401_s23] sm:$0xff] %vm924_vm2, %v829_v13  ;;  %765 = vmatmul.f32.gmra.mxu2 %v247_v11 }
  0xb4   : > { %v606_v18 = vadd.f32 %v605_v16, %v493_v14  ;;  %539 = vmatmul.f32.gmra.mxu0 %v245_v12  ;;  %1041 = vmatmul.msk.f32.gmra.mxu3 %vm371_vm1, %v248_v15  ;;  %v268_v12 = vld [vmem:[%s1289_s4 + $0x2d8] sm:$0xff]  ;;  %v266_v14 = vld [vmem:[%s1289_s4 + $0x2c8] sm:$0xff] }
  0xb6   : > { %652 = vmatmul.f32.gmra.mxu1 %v246_v17  ;;  %v718_v19 = vpop.f32.mrf.mxu2 }
  0xb7   : > { %v719_v20 = vadd.f32 %v718_v19, %v606_v18  ;;  %v831_v21 = vpop.f32.mrf.mxu3 }
  0xb9   : > { %v495_v22 = vpop.f32.mrf.mxu0  ;;  %v832_v25 = vadd.f32 %v831_v21, %v719_v20  ;;  %v271_v20 = vld [vmem:[%s1289_s4 + $0x2f0] sm:$0xff]  ;;  %v269_v21 = vld [vmem:[%s1289_s4 + $0x2e0] sm:$0xff] }
  0xba   : > { %v496_v26 = vadd.f32 %v1389_v62, %v495_v22 }
  0xbb   : > { %v608_v28 = vpop.f32.mrf.mxu1  ;;  %926 = vst.msk [vmem:[%s1401_s23 + $0x8] sm:$0xff] %vm924_vm2, %v832_v25  ;;  %768 = vmatmul.f32.gmra.mxu2 %v251_v23 }
  0xbc   : > { %v609_v30 = vadd.f32 %v608_v28, %v496_v26  ;;  %542 = vmatmul.f32.gmra.mxu0 %v249_v24  ;;  %1042 = vmatmul.msk.f32.gmra.mxu3 %vm371_vm1, %v252_v27  ;;  %v272_v24 = vld [vmem:[%s1289_s4 + $0x2f8] sm:$0xff]  ;;  %v270_v26 = vld [vmem:[%s1289_s4 + $0x2e8] sm:$0xff] }
  0xbe   : > { %655 = vmatmul.f32.gmra.mxu1 %v250_v29  ;;  %v721_v31 = vpop.f32.mrf.mxu2 }
  0xbf   : > { %v722_v32 = vadd.f32 %v721_v31, %v609_v30  ;;  %v834_v33 = vpop.f32.mrf.mxu3 }
  0xc1   : > { %v498_v34 = vpop.f32.mrf.mxu0  ;;  %v835_v37 = vadd.f32 %v834_v33, %v722_v32  ;;  %v275_v32 = vld [vmem:[%s1289_s4 + $0x310] sm:$0xff]  ;;  %v273_v33 = vld [vmem:[%s1289_s4 + $0x300] sm:$0xff] }
  0xc2   : > { %v499_v38 = vadd.f32 %v1389_v62, %v498_v34 }
  0xc3   : > { %v611_v40 = vpop.f32.mrf.mxu1  ;;  %927 = vst.msk [vmem:[%s1401_s23 + $0x10] sm:$0xff] %vm924_vm2, %v835_v37  ;;  %771 = vmatmul.f32.gmra.mxu2 %v255_v35 }
  0xc4   : > { %v612_v42 = vadd.f32 %v611_v40, %v499_v38  ;;  %545 = vmatmul.f32.gmra.mxu0 %v253_v36  ;;  %1043 = vmatmul.msk.f32.gmra.mxu3 %vm371_vm1, %v256_v39  ;;  %v276_v36 = vld [vmem:[%s1289_s4 + $0x318] sm:$0xff]  ;;  %v274_v38 = vld [vmem:[%s1289_s4 + $0x308] sm:$0xff] }
  0xc6   : > { %658 = vmatmul.f32.gmra.mxu1 %v254_v41  ;;  %v724_v43 = vpop.f32.mrf.mxu2 }
  0xc7   : > { %v725_v44 = vadd.f32 %v724_v43, %v612_v42  ;;  %v837_v45 = vpop.f32.mrf.mxu3 }
  0xc9   : > { %v501_v46 = vpop.f32.mrf.mxu0  ;;  %v838_v49 = vadd.f32 %v837_v45, %v725_v44  ;;  %v279_v44 = vld [vmem:[%s1289_s4 + $0x330] sm:$0xff]  ;;  %v277_v45 = vld [vmem:[%s1289_s4 + $0x320] sm:$0xff] }
  0xca   : > { %v502_v50 = vadd.f32 %v1389_v62, %v501_v46 }
  0xcb   : > { %v614_v52 = vpop.f32.mrf.mxu1  ;;  %928 = vst.msk [vmem:[%s1401_s23 + $0x18] sm:$0xff] %vm924_vm2, %v838_v49  ;;  %774 = vmatmul.f32.gmra.mxu2 %v259_v47 }
  0xcc   : > { %v615_v54 = vadd.f32 %v614_v52, %v502_v50  ;;  %548 = vmatmul.f32.gmra.mxu0 %v257_v48  ;;  %1044 = vmatmul.msk.f32.gmra.mxu3 %vm371_vm1, %v260_v51  ;;  %v280_v48 = vld [vmem:[%s1289_s4 + $0x338] sm:$0xff]  ;;  %v278_v50 = vld [vmem:[%s1289_s4 + $0x328] sm:$0xff] }
  0xce   : > { %661 = vmatmul.f32.gmra.mxu1 %v258_v53  ;;  %v727_v55 = vpop.f32.mrf.mxu2 }
  0xcf   : > { %v728_v56 = vadd.f32 %v727_v55, %v615_v54  ;;  %v840_v57 = vpop.f32.mrf.mxu3 }
  0xd1   : > { %v504_v58 = vpop.f32.mrf.mxu0  ;;  %v841_v61 = vadd.f32 %v840_v57, %v728_v56  ;;  %v283_v56 = vld [vmem:[%s1289_s4 + $0x350] sm:$0xff]  ;;  %v281_v57 = vld [vmem:[%s1289_s4 + $0x340] sm:$0xff] }
  0xd2   : > { %v505_v63 = vadd.f32 %v1389_v62, %v504_v58 }
  0xd3   : > { %v617_v1 = vpop.f32.mrf.mxu1  ;;  %929 = vst.msk [vmem:[%s1401_s23 + $0x20] sm:$0xff] %vm924_vm2, %v841_v61  ;;  %777 = vmatmul.f32.gmra.mxu2 %v263_v59 }
  0xd4   : > { %v618_v3 = vadd.f32 %v617_v1, %v505_v63  ;;  %551 = vmatmul.f32.gmra.mxu0 %v261_v60  ;;  %1045 = vmatmul.msk.f32.gmra.mxu3 %vm371_vm1, %v264_v0  ;;  %v284_v60 = vld [vmem:[%s1289_s4 + $0x358] sm:$0xff]  ;;  %v282_v63 = vld [vmem:[%s1289_s4 + $0x348] sm:$0xff] }
  0xd6   : > { %664 = vmatmul.f32.gmra.mxu1 %v262_v2  ;;  %v730_v4 = vpop.f32.mrf.mxu2 }
  0xd7   : > { %v731_v5 = vadd.f32 %v730_v4, %v618_v3  ;;  %v843_v6 = vpop.f32.mrf.mxu3 }
  0xd9   : > { %v507_v7 = vpop.f32.mrf.mxu0  ;;  %v844_v10 = vadd.f32 %v843_v6, %v731_v5  ;;  %v287_v5 = vld [vmem:[%s1289_s4 + $0x370] sm:$0xff]  ;;  %v285_v6 = vld [vmem:[%s1289_s4 + $0x360] sm:$0xff] }
  0xda   : > { %v508_v11 = vadd.f32 %v1389_v62, %v507_v7 }
  0xdb   : > { %v620_v13 = vpop.f32.mrf.mxu1  ;;  %930 = vst.msk [vmem:[%s1401_s23 + $0x28] sm:$0xff] %vm924_vm2, %v844_v10  ;;  %780 = vmatmul.f32.gmra.mxu2 %v267_v8 }
  0xdc   : > { %v621_v15 = vadd.f32 %v620_v13, %v508_v11  ;;  %554 = vmatmul.f32.gmra.mxu0 %v265_v9  ;;  %1046 = vmatmul.msk.f32.gmra.mxu3 %vm371_vm1, %v268_v12  ;;  %v288_v9 = vld [vmem:[%s1289_s4 + $0x378] sm:$0xff]  ;;  %v286_v11 = vld [vmem:[%s1289_s4 + $0x368] sm:$0xff] }
  0xde   : > { %667 = vmatmul.f32.gmra.mxu1 %v266_v14  ;;  %v733_v16 = vpop.f32.mrf.mxu2 }
  0xdf   : > { %v734_v17 = vadd.f32 %v733_v16, %v621_v15  ;;  %v846_v18 = vpop.f32.mrf.mxu3 }
  0xe1   : > { %v510_v19 = vpop.f32.mrf.mxu0  ;;  %v847_v22 = vadd.f32 %v846_v18, %v734_v17  ;;  %v291_v17 = vld [vmem:[%s1289_s4 + $0x390] sm:$0xff]  ;;  %v289_v18 = vld [vmem:[%s1289_s4 + $0x380] sm:$0xff] }
  0xe2   : > { %v511_v23 = vadd.f32 %v1389_v62, %v510_v19 }
  0xe3   : > { %v623_v25 = vpop.f32.mrf.mxu1  ;;  %931 = vst.msk [vmem:[%s1401_s23 + $0x30] sm:$0xff] %vm924_vm2, %v847_v22  ;;  %783 = vmatmul.f32.gmra.mxu2 %v271_v20 }
  0xe4   : > { %v624_v27 = vadd.f32 %v623_v25, %v511_v23  ;;  %557 = vmatmul.f32.gmra.mxu0 %v269_v21  ;;  %1047 = vmatmul.msk.f32.gmra.mxu3 %vm371_vm1, %v272_v24  ;;  %v292_v21 = vld [vmem:[%s1289_s4 + $0x398] sm:$0xff]  ;;  %v290_v23 = vld [vmem:[%s1289_s4 + $0x388] sm:$0xff] }
  0xe6   : > { %670 = vmatmul.f32.gmra.mxu1 %v270_v26  ;;  %v736_v28 = vpop.f32.mrf.mxu2 }
  0xe7   : > { %v737_v29 = vadd.f32 %v736_v28, %v624_v27  ;;  %v849_v30 = vpop.f32.mrf.mxu3 }
  0xe9   : > { %v513_v31 = vpop.f32.mrf.mxu0  ;;  %v850_v34 = vadd.f32 %v849_v30, %v737_v29  ;;  %v295_v29 = vld [vmem:[%s1289_s4 + $0x3b0] sm:$0xff]  ;;  %v293_v30 = vld [vmem:[%s1289_s4 + $0x3a0] sm:$0xff] }
  0xea   : > { %v514_v35 = vadd.f32 %v1389_v62, %v513_v31 }
  0xeb   : > { %v626_v37 = vpop.f32.mrf.mxu1  ;;  %932 = vst.msk [vmem:[%s1401_s23 + $0x38] sm:$0xff] %vm924_vm2, %v850_v34  ;;  %786 = vmatmul.f32.gmra.mxu2 %v275_v32 }
  0xec   : > { %v627_v39 = vadd.f32 %v626_v37, %v514_v35  ;;  %560 = vmatmul.f32.gmra.mxu0 %v273_v33  ;;  %1048 = vmatmul.msk.f32.gmra.mxu3 %vm371_vm1, %v276_v36  ;;  %v296_v33 = vld [vmem:[%s1289_s4 + $0x3b8] sm:$0xff]  ;;  %v294_v35 = vld [vmem:[%s1289_s4 + $0x3a8] sm:$0xff] }
  0xee   : > { %673 = vmatmul.f32.gmra.mxu1 %v274_v38  ;;  %v739_v40 = vpop.f32.mrf.mxu2 }
  0xef   : > { %v740_v41 = vadd.f32 %v739_v40, %v627_v39  ;;  %v852_v42 = vpop.f32.mrf.mxu3 }
  0xf1   : > { %v516_v43 = vpop.f32.mrf.mxu0  ;;  %v853_v46 = vadd.f32 %v852_v42, %v740_v41  ;;  %v299_v41 = vld [vmem:[%s1289_s4 + $0x3d0] sm:$0xff]  ;;  %v297_v42 = vld [vmem:[%s1289_s4 + $0x3c0] sm:$0xff] }
  0xf2   : > { %v517_v47 = vadd.f32 %v1389_v62, %v516_v43 }
  0xf3   : > { %v629_v49 = vpop.f32.mrf.mxu1  ;;  %933 = vst.msk [vmem:[%s1401_s23 + $0x40] sm:$0xff] %vm924_vm2, %v853_v46  ;;  %789 = vmatmul.f32.gmra.mxu2 %v279_v44 }
  0xf4   : > { %v630_v51 = vadd.f32 %v629_v49, %v517_v47  ;;  %563 = vmatmul.f32.gmra.mxu0 %v277_v45  ;;  %1049 = vmatmul.msk.f32.gmra.mxu3 %vm371_vm1, %v280_v48  ;;  %v300_v45 = vld [vmem:[%s1289_s4 + $0x3d8] sm:$0xff]  ;;  %v298_v47 = vld [vmem:[%s1289_s4 + $0x3c8] sm:$0xff] }
  0xf6   : > { %676 = vmatmul.f32.gmra.mxu1 %v278_v50  ;;  %v742_v52 = vpop.f32.mrf.mxu2 }
  0xf7   : > { %v743_v53 = vadd.f32 %v742_v52, %v630_v51  ;;  %v855_v54 = vpop.f32.mrf.mxu3 }
  0xf9   : > { %v519_v55 = vpop.f32.mrf.mxu0  ;;  %v856_v58 = vadd.f32 %v855_v54, %v743_v53  ;;  %v303_v53 = vld [vmem:[%s1289_s4 + $0x3f0] sm:$0xff]  ;;  %v301_v54 = vld [vmem:[%s1289_s4 + $0x3e0] sm:$0xff] }
  0xfa   : > { %v520_v59 = vadd.f32 %v1389_v62, %v519_v55 }
  0xfb   : > { %v632_v61 = vpop.f32.mrf.mxu1  ;;  %934 = vst.msk [vmem:[%s1401_s23 + $0x48] sm:$0xff] %vm924_vm2, %v856_v58  ;;  %792 = vmatmul.f32.gmra.mxu2 %v283_v56 }
  0xfc   : > { %v633_v0 = vadd.f32 %v632_v61, %v520_v59  ;;  %566 = vmatmul.f32.gmra.mxu0 %v281_v57  ;;  %1050 = vmatmul.msk.f32.gmra.mxu3 %vm371_vm1, %v284_v60  ;;  %v304_v57 = vld [vmem:[%s1289_s4 + $0x3f8] sm:$0xff]  ;;  %v302_v59 = vld [vmem:[%s1289_s4 + $0x3e8] sm:$0xff] }
  0xfe   : > { %679 = vmatmul.f32.gmra.mxu1 %v282_v63  ;;  %v745_v1 = vpop.f32.mrf.mxu2 }
  0xff   : > { %v746_v2 = vadd.f32 %v745_v1, %v633_v0  ;;  %v858_v3 = vpop.f32.mrf.mxu3 }
 0x101   : > { %v522_v4 = vpop.f32.mrf.mxu0  ;;  %v859_v7 = vadd.f32 %v858_v3, %v746_v2 }
 0x102   : > { %v523_v8 = vadd.f32 %v1389_v62, %v522_v4 }
 0x103   : > { %v635_v10 = vpop.f32.mrf.mxu1  ;;  %935 = vst.msk [vmem:[%s1401_s23 + $0x50] sm:$0xff] %vm924_vm2, %v859_v7  ;;  %795 = vmatmul.f32.gmra.mxu2 %v287_v5 }
 0x104   : > { %v636_v12 = vadd.f32 %v635_v10, %v523_v8  ;;  %569 = vmatmul.f32.gmra.mxu0 %v285_v6  ;;  %1051 = vmatmul.msk.f32.gmra.mxu3 %vm371_vm1, %v288_v9 }
 0x106   : > { %682 = vmatmul.f32.gmra.mxu1 %v286_v11  ;;  %v748_v13 = vpop.f32.mrf.mxu2 }
 0x107   : > { %v749_v14 = vadd.f32 %v748_v13, %v636_v12  ;;  %v861_v15 = vpop.f32.mrf.mxu3 }
 0x109   : > { %v525_v16 = vpop.f32.mrf.mxu0  ;;  %v862_v19 = vadd.f32 %v861_v15, %v749_v14 }
 0x10a   : > { %v526_v20 = vadd.f32 %v1389_v62, %v525_v16 }
 0x10b   : > { %v638_v22 = vpop.f32.mrf.mxu1  ;;  %936 = vst.msk [vmem:[%s1401_s23 + $0x58] sm:$0xff] %vm924_vm2, %v862_v19  ;;  %798 = vmatmul.f32.gmra.mxu2 %v291_v17 }
 0x10c   : > { %v639_v24 = vadd.f32 %v638_v22, %v526_v20  ;;  %572 = vmatmul.f32.gmra.mxu0 %v289_v18  ;;  %1052 = vmatmul.msk.f32.gmra.mxu3 %vm371_vm1, %v292_v21 }
 0x10e   : > { %685 = vmatmul.f32.gmra.mxu1 %v290_v23  ;;  %v751_v25 = vpop.f32.mrf.mxu2 }
 0x10f   : > { %v752_v26 = vadd.f32 %v751_v25, %v639_v24  ;;  %v864_v27 = vpop.f32.mrf.mxu3 }
 0x111   : > { %v528_v28 = vpop.f32.mrf.mxu0  ;;  %v865_v31 = vadd.f32 %v864_v27, %v752_v26 }
 0x112   : > { %v529_v32 = vadd.f32 %v1389_v62, %v528_v28 }
 0x113   : > { %v641_v34 = vpop.f32.mrf.mxu1  ;;  %937 = vst.msk [vmem:[%s1401_s23 + $0x60] sm:$0xff] %vm924_vm2, %v865_v31  ;;  %801 = vmatmul.f32.gmra.mxu2 %v295_v29 }
 0x114   : > { %v642_v36 = vadd.f32 %v641_v34, %v529_v32  ;;  %575 = vmatmul.f32.gmra.mxu0 %v293_v30  ;;  %1053 = vmatmul.msk.f32.gmra.mxu3 %vm371_vm1, %v296_v33 }
 0x116   : > { %688 = vmatmul.f32.gmra.mxu1 %v294_v35  ;;  %v754_v37 = vpop.f32.mrf.mxu2 }
 0x117   : > { %v755_v38 = vadd.f32 %v754_v37, %v642_v36  ;;  %v867_v39 = vpop.f32.mrf.mxu3 }
 0x119   : > { %v531_v40 = vpop.f32.mrf.mxu0  ;;  %v868_v43 = vadd.f32 %v867_v39, %v755_v38 }
 0x11a   : > { %v532_v44 = vadd.f32 %v1389_v62, %v531_v40 }
 0x11b   : > { %v644_v46 = vpop.f32.mrf.mxu1  ;;  %938 = vst.msk [vmem:[%s1401_s23 + $0x68] sm:$0xff] %vm924_vm2, %v868_v43  ;;  %804 = vmatmul.f32.gmra.mxu2 %v299_v41 }
 0x11c   : > { %v645_v48 = vadd.f32 %v644_v46, %v532_v44  ;;  %578 = vmatmul.f32.gmra.mxu0 %v297_v42  ;;  %1054 = vmatmul.msk.f32.gmra.mxu3 %vm371_vm1, %v300_v45 }
 0x11e   : > { %691 = vmatmul.f32.gmra.mxu1 %v298_v47  ;;  %v757_v49 = vpop.f32.mrf.mxu2 }
 0x11f   : > { %v758_v50 = vadd.f32 %v757_v49, %v645_v48  ;;  %v870_v51 = vpop.f32.mrf.mxu3 }
 0x121   : > { %v534_v52 = vpop.f32.mrf.mxu0  ;;  %v871_v55 = vadd.f32 %v870_v51, %v758_v50 }
 0x122   : > { %v535_v56 = vadd.f32 %v1389_v62, %v534_v52 }
 0x123   : > { %v647_v58 = vpop.f32.mrf.mxu1  ;;  %939 = vst.msk [vmem:[%s1401_s23 + $0x70] sm:$0xff] %vm924_vm2, %v871_v55  ;;  %807 = vmatmul.f32.gmra.mxu2 %v303_v53 }
 0x124   : > { %v648_v60 = vadd.f32 %v647_v58, %v535_v56  ;;  %581 = vmatmul.f32.gmra.mxu0 %v301_v54  ;;  %1055 = vmatmul.msk.f32.gmra.mxu3 %vm371_vm1, %v304_v57 }
 0x126   : > { %694 = vmatmul.f32.gmra.mxu1 %v302_v59  ;;  %v760_v61 = vpop.f32.mrf.mxu2 }
 0x127   : > { %v761_v63 = vadd.f32 %v760_v61, %v648_v60  ;;  %v873_v0 = vpop.f32.mrf.mxu3 }
 0x129   : > { %v537_v1 = vpop.f32.mrf.mxu0  ;;  %v874_v2 = vadd.f32 %v873_v0, %v761_v63 }
 0x12a   : > { %v538_v3 = vadd.f32 %v1389_v62, %v537_v1 }
 0x12b   : > { %v650_v4 = vpop.f32.mrf.mxu1  ;;  %940 = vst.msk [vmem:[%s1401_s23 + $0x78] sm:$0xff] %vm924_vm2, %v874_v2 }
 0x12c   : > { %v651_v5 = vadd.f32 %v650_v4, %v538_v3 }
 0x12e   : > { %v763_v6 = vpop.f32.mrf.mxu2 }
 0x12f   : > { %v764_v7 = vadd.f32 %v763_v6, %v651_v5  ;;  %v876_v8 = vpop.f32.mrf.mxu3 }
 0x131   : > { %v540_v9 = vpop.f32.mrf.mxu0  ;;  %v877_v10 = vadd.f32 %v876_v8, %v764_v7 }
 0x132   : > { %v541_v11 = vadd.f32 %v1389_v62, %v540_v9 }
 0x133   : > { %v653_v12 = vpop.f32.mrf.mxu1  ;;  %941 = vst.msk [vmem:[%s1401_s23 + $0x80] sm:$0xff] %vm924_vm2, %v877_v10 }
 0x134   : > { %v654_v13 = vadd.f32 %v653_v12, %v541_v11 }
 0x136   : > { %v766_v14 = vpop.f32.mrf.mxu2 }
 0x137   : > { %v767_v15 = vadd.f32 %v766_v14, %v654_v13  ;;  %v879_v16 = vpop.f32.mrf.mxu3 }
 0x139   : > { %v543_v17 = vpop.f32.mrf.mxu0  ;;  %v880_v18 = vadd.f32 %v879_v16, %v767_v15 }
 0x13a   : > { %v544_v19 = vadd.f32 %v1389_v62, %v543_v17 }
 0x13b   : > { %v656_v20 = vpop.f32.mrf.mxu1  ;;  %942 = vst.msk [vmem:[%s1401_s23 + $0x88] sm:$0xff] %vm924_vm2, %v880_v18 }
 0x13c   : > { %v657_v21 = vadd.f32 %v656_v20, %v544_v19 }
 0x13e   : > { %v769_v22 = vpop.f32.mrf.mxu2 }
 0x13f   : > { %v770_v23 = vadd.f32 %v769_v22, %v657_v21  ;;  %v882_v24 = vpop.f32.mrf.mxu3 }
 0x141   : > { %v546_v25 = vpop.f32.mrf.mxu0  ;;  %v883_v26 = vadd.f32 %v882_v24, %v770_v23 }
 0x142   : > { %v547_v27 = vadd.f32 %v1389_v62, %v546_v25 }
 0x143   : > { %v659_v28 = vpop.f32.mrf.mxu1  ;;  %943 = vst.msk [vmem:[%s1401_s23 + $0x90] sm:$0xff] %vm924_vm2, %v883_v26 }
 0x144   : > { %v660_v29 = vadd.f32 %v659_v28, %v547_v27 }
 0x146   : > { %v772_v30 = vpop.f32.mrf.mxu2 }
 0x147   : > { %v773_v31 = vadd.f32 %v772_v30, %v660_v29  ;;  %v885_v32 = vpop.f32.mrf.mxu3 }
 0x149   : > { %v549_v33 = vpop.f32.mrf.mxu0  ;;  %v886_v34 = vadd.f32 %v885_v32, %v773_v31 }
 0x14a   : > { %v550_v35 = vadd.f32 %v1389_v62, %v549_v33 }
 0x14b   : > { %v662_v36 = vpop.f32.mrf.mxu1  ;;  %944 = vst.msk [vmem:[%s1401_s23 + $0x98] sm:$0xff] %vm924_vm2, %v886_v34 }
 0x14c   : > { %v663_v37 = vadd.f32 %v662_v36, %v550_v35 }
 0x14e   : > { %v775_v38 = vpop.f32.mrf.mxu2 }
 0x14f   : > { %v776_v39 = vadd.f32 %v775_v38, %v663_v37  ;;  %v888_v40 = vpop.f32.mrf.mxu3 }
 0x151   : > { %v552_v41 = vpop.f32.mrf.mxu0  ;;  %v889_v42 = vadd.f32 %v888_v40, %v776_v39 }
 0x152   : > { %v553_v43 = vadd.f32 %v1389_v62, %v552_v41 }
 0x153   : > { %v665_v44 = vpop.f32.mrf.mxu1  ;;  %945 = vst.msk [vmem:[%s1401_s23 + $0xa0] sm:$0xff] %vm924_vm2, %v889_v42 }
 0x154   : > { %v666_v45 = vadd.f32 %v665_v44, %v553_v43 }
 0x156   : > { %v778_v46 = vpop.f32.mrf.mxu2 }
 0x157   : > { %v779_v47 = vadd.f32 %v778_v46, %v666_v45  ;;  %v891_v48 = vpop.f32.mrf.mxu3 }
 0x159   : > { %v555_v49 = vpop.f32.mrf.mxu0  ;;  %v892_v50 = vadd.f32 %v891_v48, %v779_v47 }
 0x15a   : > { %v556_v51 = vadd.f32 %v1389_v62, %v555_v49 }
 0x15b   : > { %v668_v52 = vpop.f32.mrf.mxu1  ;;  %946 = vst.msk [vmem:[%s1401_s23 + $0xa8] sm:$0xff] %vm924_vm2, %v892_v50 }
 0x15c   : > { %v669_v53 = vadd.f32 %v668_v52, %v556_v51 }
 0x15e   : > { %v781_v54 = vpop.f32.mrf.mxu2 }
 0x15f   : > { %v782_v55 = vadd.f32 %v781_v54, %v669_v53  ;;  %v894_v56 = vpop.f32.mrf.mxu3 }
 0x161   : > { %v558_v57 = vpop.f32.mrf.mxu0  ;;  %v895_v58 = vadd.f32 %v894_v56, %v782_v55 }
 0x162   : > { %v559_v59 = vadd.f32 %v1389_v62, %v558_v57 }
 0x163   : > { %v671_v60 = vpop.f32.mrf.mxu1  ;;  %947 = vst.msk [vmem:[%s1401_s23 + $0xb0] sm:$0xff] %vm924_vm2, %v895_v58 }
 0x164   : > { %v672_v61 = vadd.f32 %v671_v60, %v559_v59 }
 0x166   : > { %v784_v63 = vpop.f32.mrf.mxu2 }
 0x167   : > { %v785_v0 = vadd.f32 %v784_v63, %v672_v61  ;;  %v897_v1 = vpop.f32.mrf.mxu3 }
 0x169   : > { %v561_v2 = vpop.f32.mrf.mxu0  ;;  %v898_v3 = vadd.f32 %v897_v1, %v785_v0 }
 0x16a   : > { %v562_v4 = vadd.f32 %v1389_v62, %v561_v2 }
 0x16b   : > { %v674_v5 = vpop.f32.mrf.mxu1  ;;  %948 = vst.msk [vmem:[%s1401_s23 + $0xb8] sm:$0xff] %vm924_vm2, %v898_v3 }
 0x16c   : > { %v675_v6 = vadd.f32 %v674_v5, %v562_v4 }
 0x16e   : > { %v787_v7 = vpop.f32.mrf.mxu2 }
 0x16f   : > { %v788_v8 = vadd.f32 %v787_v7, %v675_v6  ;;  %v900_v9 = vpop.f32.mrf.mxu3 }
 0x171   : > { %v564_v10 = vpop.f32.mrf.mxu0  ;;  %v901_v11 = vadd.f32 %v900_v9, %v788_v8 }
 0x172   : > { %v565_v12 = vadd.f32 %v1389_v62, %v564_v10 }
 0x173   : > { %v677_v13 = vpop.f32.mrf.mxu1  ;;  %949 = vst.msk [vmem:[%s1401_s23 + $0xc0] sm:$0xff] %vm924_vm2, %v901_v11 }
 0x174   : > { %v678_v14 = vadd.f32 %v677_v13, %v565_v12 }
 0x176   : > { %v790_v15 = vpop.f32.mrf.mxu2 }
 0x177   : > { %v791_v16 = vadd.f32 %v790_v15, %v678_v14  ;;  %v903_v17 = vpop.f32.mrf.mxu3 }
 0x179   : > { %v567_v18 = vpop.f32.mrf.mxu0  ;;  %v904_v19 = vadd.f32 %v903_v17, %v791_v16 }
 0x17a   : > { %v568_v20 = vadd.f32 %v1389_v62, %v567_v18 }
 0x17b   : > { %v680_v21 = vpop.f32.mrf.mxu1  ;;  %950 = vst.msk [vmem:[%s1401_s23 + $0xc8] sm:$0xff] %vm924_vm2, %v904_v19 }
 0x17c   : > { %v681_v22 = vadd.f32 %v680_v21, %v568_v20 }
 0x17e   : > { %v793_v23 = vpop.f32.mrf.mxu2 }
 0x17f   : > { %v794_v24 = vadd.f32 %v793_v23, %v681_v22  ;;  %v906_v25 = vpop.f32.mrf.mxu3 }
 0x181   : > { %v570_v26 = vpop.f32.mrf.mxu0  ;;  %v907_v27 = vadd.f32 %v906_v25, %v794_v24 }
 0x182   : > { %v571_v28 = vadd.f32 %v1389_v62, %v570_v26 }
 0x183   : > { %v683_v29 = vpop.f32.mrf.mxu1  ;;  %951 = vst.msk [vmem:[%s1401_s23 + $0xd0] sm:$0xff] %vm924_vm2, %v907_v27 }
 0x184   : > { %v684_v30 = vadd.f32 %v683_v29, %v571_v28 }
 0x186   : > { %v796_v31 = vpop.f32.mrf.mxu2 }
 0x187   : > { %v797_v32 = vadd.f32 %v796_v31, %v684_v30  ;;  %v909_v33 = vpop.f32.mrf.mxu3 }
 0x189   : > { %v573_v34 = vpop.f32.mrf.mxu0  ;;  %v910_v35 = vadd.f32 %v909_v33, %v797_v32 }
 0x18a   : > { %v574_v36 = vadd.f32 %v1389_v62, %v573_v34 }
 0x18b   : > { %v686_v37 = vpop.f32.mrf.mxu1  ;;  %952 = vst.msk [vmem:[%s1401_s23 + $0xd8] sm:$0xff] %vm924_vm2, %v910_v35 }
 0x18c   : > { %v687_v38 = vadd.f32 %v686_v37, %v574_v36 }
 0x18e   : > { %v799_v39 = vpop.f32.mrf.mxu2 }
 0x18f   : > { %v800_v40 = vadd.f32 %v799_v39, %v687_v38  ;;  %v912_v41 = vpop.f32.mrf.mxu3 }
 0x191   : > { %v576_v42 = vpop.f32.mrf.mxu0  ;;  %v913_v43 = vadd.f32 %v912_v41, %v800_v40 }
 0x192   : > { %v577_v44 = vadd.f32 %v1389_v62, %v576_v42 }
 0x193   : > { %v689_v45 = vpop.f32.mrf.mxu1  ;;  %953 = vst.msk [vmem:[%s1401_s23 + $0xe0] sm:$0xff] %vm924_vm2, %v913_v43 }
 0x194   : > { %v690_v46 = vadd.f32 %v689_v45, %v577_v44 }
 0x196   : > { %v802_v47 = vpop.f32.mrf.mxu2 }
 0x197   : > { %v803_v48 = vadd.f32 %v802_v47, %v690_v46  ;;  %v915_v49 = vpop.f32.mrf.mxu3 }
 0x199   : > { %v579_v50 = vpop.f32.mrf.mxu0  ;;  %v916_v51 = vadd.f32 %v915_v49, %v803_v48 }
 0x19a   : > { %v580_v52 = vadd.f32 %v1389_v62, %v579_v50 }
 0x19b   : > { %v692_v53 = vpop.f32.mrf.mxu1  ;;  %954 = vst.msk [vmem:[%s1401_s23 + $0xe8] sm:$0xff] %vm924_vm2, %v916_v51 }
 0x19c   : > { %v693_v54 = vadd.f32 %v692_v53, %v580_v52 }
 0x19e   : > { %v805_v55 = vpop.f32.mrf.mxu2 }
 0x19f   : > { %v806_v56 = vadd.f32 %v805_v55, %v693_v54  ;;  %v918_v57 = vpop.f32.mrf.mxu3 }
 0x1a1   : > { %v582_v58 = vpop.f32.mrf.mxu0  ;;  %v919_v59 = vadd.f32 %v918_v57, %v806_v56 }
 0x1a2   : > { %v583_v60 = vadd.f32 %v1389_v62, %v582_v58 }
 0x1a3   : > { %v695_v61 = vpop.f32.mrf.mxu1  ;;  %955 = vst.msk [vmem:[%s1401_s23 + $0xf0] sm:$0xff] %vm924_vm2, %v919_v59 }
 0x1a4   : > { %v696_v63 = vadd.f32 %v695_v61, %v583_v60 }
 0x1a6   : > { %v808_v0 = vpop.f32.mrf.mxu2 }
 0x1a7   : > { %v809_v1 = vadd.f32 %v808_v0, %v696_v63  ;;  %v921_v2 = vpop.f32.mrf.mxu3 }
 0x1a9   : > { %v922_v3 = vadd.f32 %v921_v2, %v809_v1 }
 0x1ab   : > { %956 = vst.msk [vmem:[%s1401_s23 + $0xf8] sm:$0xff] %vm924_vm2, %v922_v3 }
 0x1ac PF: > { %s13_s12 = sadd.s32 1, %s1074_s12  }
 0x1ad   : > { %p10_p4 = scmp.ge.s32.totalorder %s13_s12, 4  }
 0x1af   :  { %12 = sbr.rel (!%p10_p4) target bundleno = 1 (0x1), region = 62 }

// kernel: model_forward.6
= control target key start
LH: loop header
LB: loop body
LE: loop exit
PB: predicated region body
PF: predicated region fallthrough
CT: control target
= control target key end

     0   :  { %s1273_s12 = smov 0   ;;  %s1275_s13 = smov 0   ;;  %s1732_s0 = inlined_call_operand.vmem [shape: f32[392,180], index: 0, kind: input, shape index: {}]   ;;  %s1733_s1 = inlined_call_operand.vmem [shape: f32[180,30], index: 1, kind: input, shape index: {}]   ;;  %s1734_s2 = inlined_call_operand.vmem [shape: f32[1,30], index: 2, kind: input, shape index: {}]   ;;  %s1735_s3 = inlined_call_operand.vmem [shape: f32[392,30], index: 3, kind: output, shape index: {}]  }
   0x1   :  { %s1277_s14 = smov 0  }
   0x2 LB: > { %s1286_s15 = sadd.s32 4294967295, %s1219_s14   ;;  %s1288_s16 = sadd.s32 1, %s1219_s14   ;;  %s1219_s14 = sphi %s1277_s14, %s1744_s14   ;;  %s1215_s13 = sphi %s1275_s13, %s1743_s13   ;;  %s1211_s12 = sphi %s1273_s12, %s1742_s12  }
   0x3   : > { %s85_s17 = ssub.s32 %s1219_s14, %s1288_s16  ;;  %s88_s18 = sadd.s32 1, %s1215_s13 }
   0x4   : > { %p86_p0 = scmp.eq.s32.totalorder %s85_s17, 0  ;;  %p98_p1 = scmp.ne.s32.totalorder %s1215_s13, %s1211_s12 }
   0x5   : > { %p99_p2 = scmp.eq.s32.totalorder %s1286_s15, 1  ;;  %p994_p3 = scmp.ge.s32.totalorder %s1219_s14, 1 }
   0x6   : > { %s1296_s19 = scalar_select %p86_p0, %s1215_s13, %s88_s18  }
   0x7   : > { %p1298_p4 = por %p99_p2, %p98_p1  ;;  %p149_p5 = scmp.lt.s32.totalorder %s1219_s14, 3 }
   0x9   : > { %p150_p6 = pnand %p994_p3, %p149_p5 }
   0xa   : > { %s1312_s27 = sshll.u32 (!%p150_p6), %s1286_s15, 5 }
   0xb   : > { %153 = sbr.rel (%p150_p6) target bundleno = 378 (0x17a), region = 32  ;;  %p184_p7 = scmp.lt.s32.totalorder (!%p150_p6), %s1312_s27, 48 }
  0x10   : > { %v279_v0 = vld [vmem:[%s1733_s1 + $0x78] sm:$0xff]  ;;  %v286_v1 = vld [vmem:[%s1733_s1 + $0xb0] sm:$0xf]  ;;  %vm388_vm0 = vcmask 1043456   ;;  %v285_v3 = vld [vmem:[%s1733_s1 + $0xa8] sm:$0xff]  ;;  %s185_s7 = scalar_select %p184_p7, %s1312_s27, 48 }
  0x11   : > { %v278_v2 = vld [vmem:[%s1733_s1 + $0x70] sm:$0xff]  ;;  %392 = vmatpush.msra.mxu0 %v279_v0  ;;  %1053 = vmatpush.msra.mxu2 %v279_v0  ;;  %v277_v4 = vld [vmem:[%s1733_s1 + $0x68] sm:$0xff]  ;;  %v284_v5 = vld [vmem:[%s1733_s1 + $0xa0] sm:$0xff]  ;;  %vm291_vm1 = vcmask 424960   ;;  %vm618_vm2 = vcmask 244736  }
  0x12   : > { %999 = vmatpush.msk.msra.mxu1 %vm388_vm0, %v286_v1  ;;  %1069 = vmatpush.msk.msra.mxu3 %vm388_vm0, %v286_v1  ;;  %v276_v6 = vld [vmem:[%s1733_s1 + $0x60] sm:$0xff]  ;;  %v283_v7 = vld [vmem:[%s1733_s1 + $0x98] sm:$0xff]  ;;  %s1049_s18 = sshll.u32 %s185_s7, 4  ;;  %v282_v9 = vld [vmem:[%s1733_s1 + $0x90] sm:$0xff]  ;;  %s175_s7 = sand.u32 1, %s1211_s12  }
  0x13   : > { %393 = vmatpush.msra.mxu0 %v278_v2  ;;  %1054 = vmatpush.msra.mxu2 %v278_v2  ;;  %v275_v8 = vld [vmem:[%s1733_s1 + $0x58] sm:$0xff]  ;;  %v274_v10 = vld [vmem:[%s1733_s1 + $0x50] sm:$0xff]  ;;  %v281_v11 = vld [vmem:[%s1733_s1 + $0x88] sm:$0xff]  ;;  %s1346_s30 = scalar_lea.vmem %s1732_s0, %s1049_s18  ;;  %s995_s10 = sshll.u32 %s175_s7, 8 }
  0x14   : > { %515 = vmatpush.msra.mxu1 %v285_v3  ;;  %1070 = vmatpush.msra.mxu3 %v285_v3  ;;  %v273_v12 = vld [vmem:[%s1733_s1 + $0x48] sm:$0xff]  ;;  %v280_v13 = vld [vmem:[%s1733_s1 + $0x80] sm:$0xff]  ;;  %v271_v16 = vld [vmem:[%s1733_s1 + $0x38] sm:$0xff]  ;;  %s1484_s11 = scalar_lea.vmem [#allocation2], %s995_s10   ;;  %s659_s12 = ssub.s32 (%p1298_p4), 49, %s1312_s27 }
  0x15   : > { %394 = vmatpush.msra.mxu0 %v277_v4  ;;  %1055 = vmatpush.msra.mxu2 %v277_v4  ;;  %v201_v14 = vld [vmem:[%s1346_s30 + $0x8] sm:$0xff]  ;;  %v272_v15 = vld [vmem:[%s1733_s1 + $0x40] sm:$0xff]  ;;  %v270_v17 = vld [vmem:[%s1733_s1 + $0x30] sm:$0xff]  ;;  %p660_p8 = scmp.lt.s32.totalorder (%p1298_p4), %s659_s12, 32 }
  0x16   : > { %516 = vmatpush.msra.mxu1 %v284_v5  ;;  %1071 = vmatpush.msra.mxu3 %v284_v5  ;;  %v269_v18 = vld [vmem:[%s1733_s1 + $0x28] sm:$0xff]  ;;  %v203_v19 = vld [vmem:[%s1346_s30 + $0x18] sm:$0xff]  ;;  %v268_v20 = vld [vmem:[%s1733_s1 + $0x20] sm:$0xff] }
  0x17   : > { %395 = vmatpush.msra.mxu0 %v276_v6  ;;  %1056 = vmatpush.msra.mxu2 %v276_v6  ;;  %v267_v21 = vld [vmem:[%s1733_s1 + $0x18] sm:$0xff]  ;;  %v266_v22 = vld [vmem:[%s1733_s1 + $0x10] sm:$0xff]  ;;  %v237_v23 = vld [vmem:[%s1346_s30 + $0x128] sm:$0xff] }
  0x18   : > { %517 = vmatpush.msra.mxu1 %v283_v7  ;;  %1072 = vmatpush.msra.mxu3 %v283_v7  ;;  %v265_v24 = vld [vmem:[%s1733_s1 + $0x8] sm:$0xff]  ;;  %v264_v26 = vld [vmem:[%s1733_s1] sm:$0xff]  ;;  %v230_v28 = vld [vmem:[%s1346_s30 + $0xf0] sm:$0xff] }
  0x19   : > { %396 = vmatpush.msra.mxu0 %v275_v8  ;;  %1057 = vmatpush.msra.mxu2 %v275_v8  ;;  %v205_v25 = vld [vmem:[%s1346_s30 + $0x28] sm:$0xff]  ;;  %v200_v27 = vld [vmem:[%s1346_s30] sm:$0xff]  ;;  %v239_v29 = vld [vmem:[%s1346_s30 + $0x138] sm:$0xff] }
  0x1a   : > { %518 = vmatpush.msra.mxu1 %v282_v9  ;;  %1073 = vmatpush.msra.mxu3 %v282_v9  ;;  %v207_v30 = vld [vmem:[%s1346_s30 + $0x38] sm:$0xff]  ;;  %v202_v31 = vld [vmem:[%s1346_s30 + $0x10] sm:$0xff]  ;;  %v232_v32 = vld [vmem:[%s1346_s30 + $0x100] sm:$0xff] }
  0x1b   : > { %397 = vmatpush.msra.mxu0 %v274_v10  ;;  %1058 = vmatpush.msra.mxu2 %v274_v10  ;;  %v241_v33 = vld [vmem:[%s1346_s30 + $0x148] sm:$0xff]  ;;  %v204_v35 = vld [vmem:[%s1346_s30 + $0x20] sm:$0xff]  ;;  %v234_v36 = vld [vmem:[%s1346_s30 + $0x110] sm:$0xff] }
  0x1c   : > { %519 = vmatpush.msra.mxu1 %v281_v11  ;;  %1074 = vmatpush.msra.mxu3 %v281_v11  ;;  %v209_v34 = vld [vmem:[%s1346_s30 + $0x48] sm:$0xff]  ;;  %v243_v37 = vld [vmem:[%s1346_s30 + $0x158] sm:$0xff]  ;;  %v206_v39 = vld [vmem:[%s1346_s30 + $0x30] sm:$0xff] }
  0x1d   : > { %398 = vmatpush.msra.mxu0 %v273_v12  ;;  %1059 = vmatpush.msra.mxu2 %v273_v12  ;;  %v211_v38 = vld [vmem:[%s1346_s30 + $0x58] sm:$0xff]  ;;  %v236_v40 = vld [vmem:[%s1346_s30 + $0x120] sm:$0xff]  ;;  %v245_v41 = vld [vmem:[%s1346_s30 + $0x168] sm:$0xff] }
  0x1e   : > { %520 = vmatpush.msra.mxu1 %v280_v13  ;;  %1075 = vmatpush.msra.mxu3 %v280_v13  ;;  %v213_v42 = vld [vmem:[%s1346_s30 + $0x68] sm:$0xff]  ;;  %v208_v43 = vld [vmem:[%s1346_s30 + $0x40] sm:$0xff]  ;;  %v238_v44 = vld [vmem:[%s1346_s30 + $0x130] sm:$0xff] }
  0x1f   : > { %1000 = vmatmul.msk.f32.vlgmr.msra.gmra.mxu1 %vm291_vm1, %v201_v14  ;;  %399 = vmatpush.msra.mxu0 %v272_v15  ;;  %v247_v45 = vld [vmem:[%s1346_s30 + $0x178] sm:$0xff]  ;;  %v210_v47 = vld [vmem:[%s1346_s30 + $0x50] sm:$0xff]  ;;  %v240_v48 = vld [vmem:[%s1346_s30 + $0x140] sm:$0xff] }
  0x20   : > { %1060 = vmatpush.msra.mxu2 %v272_v15  ;;  %1018 = vmatmul.msk.f32.vlgmr.msra.gmra.mxu3 %vm291_vm1, %v237_v23  ;;  %v215_v46 = vld [vmem:[%s1346_s30 + $0x78] sm:$0xff]  ;;  %v249_v49 = vld [vmem:[%s1346_s30 + $0x188] sm:$0xff]  ;;  %v212_v51 = vld [vmem:[%s1346_s30 + $0x60] sm:$0xff] }
  0x21   : > { %400 = vmatpush.msra.mxu0 %v271_v16  ;;  %v217_v50 = vld [vmem:[%s1346_s30 + $0x88] sm:$0xff]  ;;  %v242_v52 = vld [vmem:[%s1346_s30 + $0x150] sm:$0xff]  ;;  %v251_v53 = vld [vmem:[%s1346_s30 + $0x198] sm:$0xff] }
  0x22   : > { %1061 = vmatpush.msra.mxu2 %v271_v16  ;;  %v219_v54 = vld [vmem:[%s1346_s30 + $0x98] sm:$0xff]  ;;  %v214_v55 = vld [vmem:[%s1346_s30 + $0x70] sm:$0xff]  ;;  %v244_v56 = vld [vmem:[%s1346_s30 + $0x160] sm:$0xff] }
  0x23   : > { %401 = vmatpush.msra.mxu0 %v270_v17  ;;  %v253_v57 = vld [vmem:[%s1346_s30 + $0x1a8] sm:$0xff]  ;;  %v216_v59 = vld [vmem:[%s1346_s30 + $0x80] sm:$0xff]  ;;  %v246_v60 = vld [vmem:[%s1346_s30 + $0x170] sm:$0xff] }
  0x24   : > { %1062 = vmatpush.msra.mxu2 %v270_v17  ;;  %v221_v58 = vld [vmem:[%s1346_s30 + $0xa8] sm:$0xff]  ;;  %v255_v61 = vld [vmem:[%s1346_s30 + $0x1b8] sm:$0xff]  ;;  %v218_v63 = vld [vmem:[%s1346_s30 + $0x90] sm:$0xff] }
  0x25   : > { %402 = vmatpush.msra.mxu0 %v269_v18  ;;  %v223_v62 = vld [vmem:[%s1346_s30 + $0xb8] sm:$0xff]  ;;  %v248_v0 = vld [vmem:[%s1346_s30 + $0x180] sm:$0xff]  ;;  %v257_v1 = vld [vmem:[%s1346_s30 + $0x1c8] sm:$0xff] }
  0x26   : > { %1063 = vmatpush.msra.mxu2 %v269_v18  ;;  %v225_v2 = vld [vmem:[%s1346_s30 + $0xc8] sm:$0xff]  ;;  %v220_v3 = vld [vmem:[%s1346_s30 + $0xa0] sm:$0xff]  ;;  %v250_v4 = vld [vmem:[%s1346_s30 + $0x190] sm:$0xff] }
  0x27   : > { %1001 = vmatmul.msk.f32.gmra.mxu1 %vm291_vm1, %v203_v19  ;;  %403 = vmatpush.msra.mxu0 %v268_v20  ;;  %v259_v5 = vld [vmem:[%s1346_s30 + $0x1d8] sm:$0xff]  ;;  %v222_v7 = vld [vmem:[%s1346_s30 + $0xb0] sm:$0xff]  ;;  %v252_v8 = vld [vmem:[%s1346_s30 + $0x1a0] sm:$0xff] }
  0x28   : > { %1064 = vmatpush.msra.mxu2 %v268_v20  ;;  %1019 = vmatmul.msk.f32.gmra.mxu3 %vm291_vm1, %v239_v29  ;;  %v227_v6 = vld [vmem:[%s1346_s30 + $0xd8] sm:$0xff]  ;;  %v261_v9 = vld [vmem:[%s1346_s30 + $0x1e8] sm:$0xff]  ;;  %v224_v11 = vld [vmem:[%s1346_s30 + $0xc0] sm:$0xff] }
  0x29   : > { %404 = vmatpush.msra.mxu0 %v267_v21  ;;  %v229_v10 = vld [vmem:[%s1346_s30 + $0xe8] sm:$0xff]  ;;  %v254_v12 = vld [vmem:[%s1346_s30 + $0x1b0] sm:$0xff]  ;;  %v263_v13 = vld [vmem:[%s1346_s30 + $0x1f8] sm:$0xff] }
  0x2a   : > { %1065 = vmatpush.msra.mxu2 %v267_v21  ;;  %v231_v14 = vld [vmem:[%s1346_s30 + $0xf8] sm:$0xff]  ;;  %v226_v15 = vld [vmem:[%s1346_s30 + $0xd0] sm:$0xff]  ;;  %v256_v16 = vld [vmem:[%s1346_s30 + $0x1c0] sm:$0xff] }
  0x2b   : > { %405 = vmatpush.msra.mxu0 %v266_v22  ;;  %v233_v18 = vld [vmem:[%s1346_s30 + $0x108] sm:$0xff]  ;;  %v228_v19 = vld [vmem:[%s1346_s30 + $0xe0] sm:$0xff]  ;;  %v258_v20 = vld [vmem:[%s1346_s30 + $0x1d0] sm:$0xff] }
  0x2c   : > { %1066 = vmatpush.msra.mxu2 %v266_v22  ;;  %v235_v22 = vld [vmem:[%s1346_s30 + $0x118] sm:$0xff]  ;;  %v260_v23 = vld [vmem:[%s1346_s30 + $0x1e0] sm:$0xff] }
  0x2d   : > { %406 = vmatpush.msra.mxu0 %v265_v24 }
  0x2e   : > { %1067 = vmatpush.msra.mxu2 %v265_v24  ;;  %v1480_v24 = vld [vmem:[%s1734_s2] ss:$0 sm:$0xff] }
  0x2f   : > { %1002 = vmatmul.msk.f32.gmra.mxu1 %vm291_vm1, %v205_v25  ;;  %407 = vmatpush.msra.mxu0 %v264_v26 }
  0x30   : > { %1068 = vmatpush.msra.mxu2 %v264_v26  ;;  %408 = vmatmul.f32.vlgmr.msra.gmra.mxu0 %v200_v27 }
  0x31   : > { %453 = vmatmul.f32.vlgmr.msra.gmra.mxu2 %v230_v28  ;;  %1020 = vmatmul.msk.f32.gmra.mxu3 %vm291_vm1, %v241_v33  ;;  %v262_v28 = vld [vmem:[%s1346_s30 + $0x1f0] sm:$0xff]  ;;  %s1050_s30 = sshll.u32 (%p1298_p4), %s1286_s15, 8 }
  0x32   : > { %s1597_s18 = scalar_lea.vmem (%p1298_p4), %s1735_s3, %s1050_s30  }
  0x37   : > { %1003 = vmatmul.msk.f32.gmra.mxu1 %vm291_vm1, %v207_v30 }
  0x38   : > { %411 = vmatmul.f32.gmra.mxu0 %v202_v31 }
  0x39   : > { %456 = vmatmul.f32.gmra.mxu2 %v232_v32  ;;  %1021 = vmatmul.msk.f32.gmra.mxu3 %vm291_vm1, %v243_v37 }
  0x3f   : > { %1004 = vmatmul.msk.f32.gmra.mxu1 %vm291_vm1, %v209_v34 }
  0x40   : > { %414 = vmatmul.f32.gmra.mxu0 %v204_v35 }
  0x41   : > { %459 = vmatmul.f32.gmra.mxu2 %v234_v36  ;;  %1022 = vmatmul.msk.f32.gmra.mxu3 %vm291_vm1, %v245_v41 }
  0x47   : > { %1005 = vmatmul.msk.f32.gmra.mxu1 %vm291_vm1, %v211_v38 }
  0x48   : > { %417 = vmatmul.f32.gmra.mxu0 %v206_v39 }
  0x49   : > { %462 = vmatmul.f32.gmra.mxu2 %v236_v40  ;;  %1023 = vmatmul.msk.f32.gmra.mxu3 %vm291_vm1, %v247_v45 }
  0x4f   : > { %1006 = vmatmul.msk.f32.gmra.mxu1 %vm291_vm1, %v213_v42 }
  0x50   : > { %420 = vmatmul.f32.gmra.mxu0 %v208_v43 }
  0x51   : > { %465 = vmatmul.f32.gmra.mxu2 %v238_v44  ;;  %1024 = vmatmul.msk.f32.gmra.mxu3 %vm291_vm1, %v249_v49 }
  0x57   : > { %1007 = vmatmul.msk.f32.gmra.mxu1 %vm291_vm1, %v215_v46 }
  0x58   : > { %423 = vmatmul.f32.gmra.mxu0 %v210_v47 }
  0x59   : > { %468 = vmatmul.f32.gmra.mxu2 %v240_v48  ;;  %1025 = vmatmul.msk.f32.gmra.mxu3 %vm291_vm1, %v251_v53 }
  0x5f   : > { %1008 = vmatmul.msk.f32.gmra.mxu1 %vm291_vm1, %v217_v50 }
  0x60   : > { %426 = vmatmul.f32.gmra.mxu0 %v212_v51 }
  0x61   : > { %471 = vmatmul.f32.gmra.mxu2 %v242_v52  ;;  %1026 = vmatmul.msk.f32.gmra.mxu3 %vm291_vm1, %v253_v57 }
  0x67   : > { %1009 = vmatmul.msk.f32.gmra.mxu1 %vm291_vm1, %v219_v54 }
  0x68   : > { %429 = vmatmul.f32.gmra.mxu0 %v214_v55 }
  0x69   : > { %474 = vmatmul.f32.gmra.mxu2 %v244_v56  ;;  %1027 = vmatmul.msk.f32.gmra.mxu3 %vm291_vm1, %v255_v61 }
  0x6f   : > { %1010 = vmatmul.msk.f32.gmra.mxu1 %vm291_vm1, %v221_v58 }
  0x70   : > { %432 = vmatmul.f32.gmra.mxu0 %v216_v59 }
  0x71   : > { %477 = vmatmul.f32.gmra.mxu2 %v246_v60  ;;  %1028 = vmatmul.msk.f32.gmra.mxu3 %vm291_vm1, %v257_v1 }
  0x77   : > { %1011 = vmatmul.msk.f32.gmra.mxu1 %vm291_vm1, %v223_v62 }
  0x78   : > { %435 = vmatmul.f32.gmra.mxu0 %v218_v63 }
  0x79   : > { %480 = vmatmul.f32.gmra.mxu2 %v248_v0  ;;  %1029 = vmatmul.msk.f32.gmra.mxu3 %vm291_vm1, %v259_v5 }
  0x7f   : > { %1012 = vmatmul.msk.f32.gmra.mxu1 %vm291_vm1, %v225_v2 }
  0x80   : > { %438 = vmatmul.f32.gmra.mxu0 %v220_v3 }
  0x81   : > { %483 = vmatmul.f32.gmra.mxu2 %v250_v4  ;;  %1030 = vmatmul.msk.f32.gmra.mxu3 %vm291_vm1, %v261_v9 }
  0x87   : > { %1013 = vmatmul.msk.f32.gmra.mxu1 %vm291_vm1, %v227_v6 }
  0x88   : > { %441 = vmatmul.f32.gmra.mxu0 %v222_v7 }
  0x89   : > { %486 = vmatmul.f32.gmra.mxu2 %v252_v8  ;;  %1031 = vmatmul.msk.f32.gmra.mxu3 %vm291_vm1, %v263_v13 }
  0x8f   : > { %1014 = vmatmul.msk.f32.gmra.mxu1 %vm291_vm1, %v229_v10 }
  0x90   : > { %444 = vmatmul.f32.gmra.mxu0 %v224_v11 }
  0x91   : > { %489 = vmatmul.f32.gmra.mxu2 %v254_v12 }
  0x97   : > { %1015 = vmatmul.msk.f32.gmra.mxu1 %vm291_vm1, %v231_v14 }
  0x98   : > { %447 = vmatmul.f32.gmra.mxu0 %v226_v15 }
  0x99   : > { %492 = vmatmul.f32.gmra.mxu2 %v256_v16 }
  0x9c   : > { %v522_v17 = vpop.f32.mrf.mxu1 }
  0x9f   : > { %1016 = vmatmul.msk.f32.gmra.mxu1 %vm291_vm1, %v233_v18 }
  0xa0   : > { %450 = vmatmul.f32.gmra.mxu0 %v228_v19 }
  0xa1   : > { %495 = vmatmul.f32.gmra.mxu2 %v258_v20 }
  0xa3   : > { %v576_v30 = vpop.f32.mrf.mxu3 }
  0xa4   : > { %v525_v21 = vpop.f32.mrf.mxu1 }
  0xa7   : > { %1017 = vmatmul.msk.f32.gmra.mxu1 %vm291_vm1, %v235_v22 }
  0xa9   : > { %498 = vmatmul.f32.gmra.mxu2 %v260_v23 }
  0xab   : > { %v579_v36 = vpop.f32.mrf.mxu3 }
  0xac   : > { %v528_v25 = vpop.f32.mrf.mxu1 }
  0xad   : > { %v409_v26 = vpop.f32.mrf.mxu0 }
  0xae   : > { %v410_v27 = vadd.f32 %v1480_v24, %v409_v26 }
  0xb0   : > { %v523_v29 = vadd.f32 %v522_v17, %v410_v27 }
  0xb1   : > { %501 = vmatmul.f32.gmra.mxu2 %v262_v28 }
  0xb2   : > { %619 = vst.msk [vmem:[%s1484_s11] sm:$0xff] %vm618_vm2, %v523_v29 }
  0xb4   : > { %v1488_v31 = vpop.f32.mrf.mxu2  ;;  %v531_v32 = vpop.f32.mrf.mxu1 }
  0xb5   : > { %v412_v33 = vpop.f32.mrf.mxu0  ;;  %v582_v45 = vpop.f32.mrf.mxu3 }
  0xb6   : > { %v413_v34 = vadd.f32 %v1480_v24, %v412_v33 }
  0xb8   : > { %v526_v35 = vadd.f32 %v525_v21, %v413_v34 }
  0xba   : > { %620 = vst.msk [vmem:[%s1484_s11 + $0x8] sm:$0xff] %vm618_vm2, %v526_v35 }
  0xbc   : > { %v1493_v37 = vpop.f32.mrf.mxu2  ;;  %v534_v38 = vpop.f32.mrf.mxu1 }
  0xbd   : > { %v415_v39 = vpop.f32.mrf.mxu0  ;;  %v585_v54 = vpop.f32.mrf.mxu3 }
  0xbe   : > { %v416_v40 = vadd.f32 %v1480_v24, %v415_v39 }
  0xc0   : > { %v529_v41 = vadd.f32 %v528_v25, %v416_v40 }
  0xc2   : > { %621 = vst.msk [vmem:[%s1484_s11 + $0x10] sm:$0xff] %vm618_vm2, %v529_v41 }
  0xc4   : > { %v1498_v42 = vpop.f32.mrf.mxu2  ;;  %v537_v43 = vpop.f32.mrf.mxu1 }
  0xc5   : > { %v418_v44 = vpop.f32.mrf.mxu0  ;;  %v588_v63 = vpop.f32.mrf.mxu3 }
  0xc6   : > { %v419_v46 = vadd.f32 %v1480_v24, %v418_v44 }
  0xc8   : > { %v532_v47 = vadd.f32 %v531_v32, %v419_v46 }
  0xca   : > { %622 = vst.msk [vmem:[%s1484_s11 + $0x18] sm:$0xff] %vm618_vm2, %v532_v47 }
  0xcc   : > { %v463_v48 = vpop.f32.mrf.mxu2  ;;  %v540_v49 = vpop.f32.mrf.mxu1 }
  0xcd   : > { %v464_v50 = vadd.f32 %v1480_v24, %v463_v48  ;;  %v421_v51 = vpop.f32.mrf.mxu0  ;;  %v591_v7 = vpop.f32.mrf.mxu3 }
  0xce   : > { %v422_v52 = vadd.f32 %v1480_v24, %v421_v51 }
  0xcf   : > { %v577_v53 = vadd.f32 %v576_v30, %v464_v50 }
  0xd0   : > { %v535_v55 = vadd.f32 %v534_v38, %v422_v52 }
  0xd1   : > { %637 = vst.msk [vmem:[%s1484_s11 + $0x90] sm:$0xff] %vm618_vm2, %v577_v53 }
  0xd2   : > { %623 = vst.msk [vmem:[%s1484_s11 + $0x20] sm:$0xff] %vm618_vm2, %v535_v55 }
  0xd4   : > { %v466_v56 = vpop.f32.mrf.mxu2  ;;  %v543_v57 = vpop.f32.mrf.mxu1 }
  0xd5   : > { %v467_v58 = vadd.f32 %v1480_v24, %v466_v56  ;;  %v424_v59 = vpop.f32.mrf.mxu0  ;;  %v594_v19 = vpop.f32.mrf.mxu3 }
  0xd6   : > { %v425_v60 = vadd.f32 %v1480_v24, %v424_v59 }
  0xd7   : > { %v580_v61 = vadd.f32 %v579_v36, %v467_v58  ;;  %v455_v58 = vadd.f32 %v1480_v24, %v1488_v31  ;;  %v458_v31 = vadd.f32 %v1480_v24, %v1493_v37  ;;  %v461_v37 = vadd.f32 %v1480_v24, %v1498_v42 }
  0xd8   : > { %v538_v62 = vadd.f32 %v537_v43, %v425_v60 }
  0xd9   : > { %638 = vst.msk [vmem:[%s1484_s11 + $0x98] sm:$0xff] %vm618_vm2, %v580_v61 }
  0xda   : > { %624 = vst.msk [vmem:[%s1484_s11 + $0x28] sm:$0xff] %vm618_vm2, %v538_v62 }
  0xdc   : > { %v469_v0 = vpop.f32.mrf.mxu2  ;;  %v546_v1 = vpop.f32.mrf.mxu1 }
  0xdd   : > { %v470_v2 = vadd.f32 %v1480_v24, %v469_v0  ;;  %v427_v3 = vpop.f32.mrf.mxu0  ;;  %v597_v30 = vpop.f32.mrf.mxu3 }
  0xde   : > { %v428_v4 = vadd.f32 %v1480_v24, %v427_v3 }
  0xdf   : > { %v583_v5 = vadd.f32 %v582_v45, %v470_v2 }
  0xe0   : > { %v541_v6 = vadd.f32 %v540_v49, %v428_v4 }
  0xe1   : > { %639 = vst.msk [vmem:[%s1484_s11 + $0xa0] sm:$0xff] %vm618_vm2, %v583_v5 }
  0xe2   : > { %625 = vst.msk [vmem:[%s1484_s11 + $0x30] sm:$0xff] %vm618_vm2, %v541_v6 }
  0xe4   : > { %v472_v8 = vpop.f32.mrf.mxu2  ;;  %v549_v9 = vpop.f32.mrf.mxu1 }
  0xe5   : > { %v473_v10 = vadd.f32 %v1480_v24, %v472_v8  ;;  %v430_v11 = vpop.f32.mrf.mxu0  ;;  %v600_v41 = vpop.f32.mrf.mxu3 }
  0xe6   : > { %v431_v12 = vadd.f32 %v1480_v24, %v430_v11 }
  0xe7   : > { %v586_v13 = vadd.f32 %v585_v54, %v473_v10 }
  0xe8   : > { %v544_v14 = vadd.f32 %v543_v57, %v431_v12 }
  0xe9   : > { %640 = vst.msk [vmem:[%s1484_s11 + $0xa8] sm:$0xff] %vm618_vm2, %v586_v13 }
  0xea   : > { %626 = vst.msk [vmem:[%s1484_s11 + $0x38] sm:$0xff] %vm618_vm2, %v544_v14 }
  0xec   : > { %v475_v15 = vpop.f32.mrf.mxu2  ;;  %v552_v16 = vpop.f32.mrf.mxu1 }
  0xed   : > { %v476_v17 = vadd.f32 %v1480_v24, %v475_v15  ;;  %v433_v18 = vpop.f32.mrf.mxu0  ;;  %v603_v50 = vpop.f32.mrf.mxu3 }
  0xee   : > { %v434_v20 = vadd.f32 %v1480_v24, %v433_v18 }
  0xef   : > { %v589_v21 = vadd.f32 %v588_v63, %v476_v17 }
  0xf0   : > { %v547_v22 = vadd.f32 %v546_v1, %v434_v20 }
  0xf1   : > { %641 = vst.msk [vmem:[%s1484_s11 + $0xb0] sm:$0xff] %vm618_vm2, %v589_v21 }
  0xf2   : > { %627 = vst.msk [vmem:[%s1484_s11 + $0x40] sm:$0xff] %vm618_vm2, %v547_v22 }
  0xf4   : > { %v478_v23 = vpop.f32.mrf.mxu2  ;;  %v555_v25 = vpop.f32.mrf.mxu1 }
  0xf5   : > { %v479_v26 = vadd.f32 %v1480_v24, %v478_v23  ;;  %v436_v27 = vpop.f32.mrf.mxu0  ;;  %v606_v1 = vpop.f32.mrf.mxu3 }
  0xf6   : > { %v437_v28 = vadd.f32 %v1480_v24, %v436_v27 }
  0xf7   : > { %v592_v29 = vadd.f32 %v591_v7, %v479_v26 }
  0xf8   : > { %v550_v32 = vadd.f32 %v549_v9, %v437_v28 }
  0xf9   : > { %642 = vst.msk [vmem:[%s1484_s11 + $0xb8] sm:$0xff] %vm618_vm2, %v592_v29 }
  0xfa   : > { %628 = vst.msk [vmem:[%s1484_s11 + $0x48] sm:$0xff] %vm618_vm2, %v550_v32 }
  0xfc   : > { %v481_v33 = vpop.f32.mrf.mxu2  ;;  %v558_v34 = vpop.f32.mrf.mxu1 }
  0xfd   : > { %v482_v35 = vadd.f32 %v1480_v24, %v481_v33  ;;  %v439_v36 = vpop.f32.mrf.mxu0  ;;  %v609_v12 = vpop.f32.mrf.mxu3 }
  0xfe   : > { %v440_v38 = vadd.f32 %v1480_v24, %v439_v36 }
  0xff   : > { %v595_v39 = vadd.f32 %v594_v19, %v482_v35 }
 0x100   : > { %v553_v40 = vadd.f32 %v552_v16, %v440_v38 }
 0x101   : > { %643 = vst.msk [vmem:[%s1484_s11 + $0xc0] sm:$0xff] %vm618_vm2, %v595_v39 }
 0x102   : > { %629 = vst.msk [vmem:[%s1484_s11 + $0x50] sm:$0xff] %vm618_vm2, %v553_v40 }
 0x104   : > { %v484_v43 = vpop.f32.mrf.mxu2  ;;  %v561_v44 = vpop.f32.mrf.mxu1 }
 0x105   : > { %v485_v45 = vadd.f32 %v1480_v24, %v484_v43  ;;  %v442_v46 = vpop.f32.mrf.mxu0  ;;  %v612_v18 = vpop.f32.mrf.mxu3 }
 0x106   : > { %v443_v47 = vadd.f32 %v1480_v24, %v442_v46 }
 0x107   : > { %v598_v48 = vadd.f32 %v597_v30, %v485_v45 }
 0x108   : > { %v556_v49 = vadd.f32 %v555_v25, %v443_v47 }
 0x109   : > { %644 = vst.msk [vmem:[%s1484_s11 + $0xc8] sm:$0xff] %vm618_vm2, %v598_v48 }
 0x10a   : > { %630 = vst.msk [vmem:[%s1484_s11 + $0x58] sm:$0xff] %vm618_vm2, %v556_v49 }
 0x10c   : > { %v487_v51 = vpop.f32.mrf.mxu2  ;;  %v564_v52 = vpop.f32.mrf.mxu1 }
 0x10d   : > { %v488_v53 = vadd.f32 %v1480_v24, %v487_v51  ;;  %v445_v54 = vpop.f32.mrf.mxu0  ;;  %v615_v42 = vpop.f32.mrf.mxu3 }
 0x10e   : > { %v446_v55 = vadd.f32 %v1480_v24, %v445_v54 }
 0x10f   : > { %v601_v56 = vadd.f32 %v600_v41, %v488_v53 }
 0x110   : > { %v559_v57 = vadd.f32 %v558_v34, %v446_v55 }
 0x111   : > { %645 = vst.msk [vmem:[%s1484_s11 + $0xd0] sm:$0xff] %vm618_vm2, %v601_v56 }
 0x112   : > { %631 = vst.msk [vmem:[%s1484_s11 + $0x60] sm:$0xff] %vm618_vm2, %v559_v57 }
 0x114   : > { %v490_v59 = vpop.f32.mrf.mxu2  ;;  %v567_v60 = vpop.f32.mrf.mxu1 }
 0x115   : > { %v491_v61 = vadd.f32 %v1480_v24, %v490_v59  ;;  %v568_v62 = vadd.f32 %v567_v60, %v455_v58  ;;  %v448_v63 = vpop.f32.mrf.mxu0 }
 0x116   : > { %v449_v0 = vadd.f32 %v1480_v24, %v448_v63 }
 0x117   : > { %634 = vst.msk [vmem:[%s1484_s11 + $0x78] sm:$0xff] %vm618_vm2, %v568_v62  ;;  %v604_v2 = vadd.f32 %v603_v50, %v491_v61 }
 0x118   : > { %v562_v3 = vadd.f32 %v561_v44, %v449_v0 }
 0x119   : > { %646 = vst.msk [vmem:[%s1484_s11 + $0xd8] sm:$0xff] %vm618_vm2, %v604_v2 }
 0x11a   : > { %632 = vst.msk [vmem:[%s1484_s11 + $0x68] sm:$0xff] %vm618_vm2, %v562_v3 }
 0x11c   : > { %v493_v4 = vpop.f32.mrf.mxu2  ;;  %v570_v5 = vpop.f32.mrf.mxu1 }
 0x11d   : > { %v494_v6 = vadd.f32 %v1480_v24, %v493_v4  ;;  %v571_v7 = vadd.f32 %v570_v5, %v458_v31  ;;  %v451_v8 = vpop.f32.mrf.mxu0 }
 0x11e   : > { %v452_v9 = vadd.f32 %v1480_v24, %v451_v8 }
 0x11f   : > { %635 = vst.msk [vmem:[%s1484_s11 + $0x80] sm:$0xff] %vm618_vm2, %v571_v7  ;;  %v607_v10 = vadd.f32 %v606_v1, %v494_v6 }
 0x120   : > { %v565_v11 = vadd.f32 %v564_v52, %v452_v9 }
 0x121   : > { %647 = vst.msk [vmem:[%s1484_s11 + $0xe0] sm:$0xff] %vm618_vm2, %v607_v10 }
 0x122   : > { %633 = vst.msk [vmem:[%s1484_s11 + $0x70] sm:$0xff] %vm618_vm2, %v565_v11 }
 0x124   : > { %v496_v13 = vpop.f32.mrf.mxu2  ;;  %v573_v14 = vpop.f32.mrf.mxu1 }
 0x125   : > { %v497_v15 = vadd.f32 %v1480_v24, %v496_v13  ;;  %v574_v16 = vadd.f32 %v573_v14, %v461_v37 }
 0x127   : > { %636 = vst.msk [vmem:[%s1484_s11 + $0x88] sm:$0xff] %vm618_vm2, %v574_v16  ;;  %v610_v17 = vadd.f32 %v609_v12, %v497_v15 }
 0x129   : > { %648 = vst.msk [vmem:[%s1484_s11 + $0xe8] sm:$0xff] %vm618_vm2, %v610_v17 }
 0x12c   : > { %v499_v19 = vpop.f32.mrf.mxu2 }
 0x12d   : > { %v500_v20 = vadd.f32 %v1480_v24, %v499_v19 }
 0x12f   : > { %v613_v21 = vadd.f32 %v612_v18, %v500_v20 }
 0x131   : > { %649 = vst.msk [vmem:[%s1484_s11 + $0xf0] sm:$0xff] %vm618_vm2, %v613_v21 }
 0x134   : > { %v502_v22 = vpop.f32.mrf.mxu2 }
 0x135   : > { %v503_v23 = vadd.f32 %v1480_v24, %v502_v22  ;;  %657 = sbr.rel (!%p1298_p4) target bundleno = 378 (0x17a), region = 36 }
 0x137   : > { %v616_v25 = vadd.f32 %v615_v42, %v503_v23 }
 0x139   : > { %650 = vst.msk [vmem:[%s1484_s11 + $0xf8] sm:$0xff] %vm618_vm2, %v616_v25 }
 0x13a   : > { %s1746_s12 = smov (!%p660_p8, %s659_s12), 32 }
 0x13b   : > { %s1034_s21 = sshll.u32 %s1746_s12, 3 }
 0x13c   : > { %p1037_p9 = scmp.eq.s32.totalorder %s1034_s21, 0 }
 0x13d   : > { %s1603_s22 = sshrl.u32 (!%p1037_p9), %s1746_s12, 5 }
 0x13e   : > { %668 = sbr.rel (%p1037_p9) target bundleno = 378 (0x17a), region = 40  ;;  %p1038_p10 = scmp.le.s32.totalorder (!%p1037_p9), %s1603_s22, 0 }
 0x143   : > { %947 = sbr.rel (%p1038_p10) target bundleno = 361 (0x169), region = 116  ;;  %s1737_s15 = smov (!%p1038_p10), %s1597_s18 }
 0x144   : > { %s1738_s20 = smov (!%p1038_p10), %s1484_s11  ;;  %s1612_s27 = smov (!%p1038_p10), 0  }
 0x145   : > { %s1614_s23 = smov (!%p1038_p10), 0  }
 0x148 LB: >> { %v793_v24 = vld [vmem:[%s1227_s20] sm:$0xff]  ;;  %v795_v26 = vld [vmem:[%s1227_s20 + $0x8] sm:$0xff]  ;;  %v797_v27 = vld [vmem:[%s1227_s20 + $0x10] sm:$0xff]  ;;  %s857_s24 = sadd.s32 1, %s1231_s27  ;;  %s787_s23 = sadd.s32 1, %s1235_s23   ;;  %s1235_s23 = sphi %s1614_s23, %s787_s23   ;;  %s1231_s27 = sphi %s1612_s27, %s1741_s27   ;;  %s1227_s20 = sphi %s1738_s20, %s1740_s20   ;;  %s1223_s15 = sphi %s1737_s15, %s1739_s15  }
 0x149   : >> { %794 = vst [vmem:[%s1223_s15] sm:$0xff] %v793_v24  ;;  %v799_v28 = vld [vmem:[%s1227_s20 + $0x18] sm:$0xff]  ;;  %p858_p11 = scmp.ge.s32.totalorder %s857_s24, %s1603_s22  ;;  %v801_v29 = vld [vmem:[%s1227_s20 + $0x20] sm:$0xff]  ;;  %v803_v30 = vld [vmem:[%s1227_s20 + $0x28] sm:$0xff]  ;;  %p786_p12 = scmp.ge.s32.totalorder %s787_s23, %s1603_s22 }
 0x14a   : >> { %796 = vst [vmem:[%s1223_s15 + $0x8] sm:$0xff] %v795_v26  ;;  %v805_v32 = vld [vmem:[%s1227_s20 + $0x30] sm:$0xff]  ;;  %v807_v33 = vld [vmem:[%s1227_s20 + $0x38] sm:$0xff]  ;;  %v809_v34 = vld [vmem:[%s1227_s20 + $0x40] sm:$0xff] }
 0x14b   : >> { %798 = vst [vmem:[%s1223_s15 + $0x10] sm:$0xff] %v797_v27  ;;  %s1748_s24 = smov (%p858_p11, %s857_s24), 0  ;;  %v811_v35 = vld [vmem:[%s1227_s20 + $0x48] sm:$0xff]  ;;  %v813_v36 = vld [vmem:[%s1227_s20 + $0x50] sm:$0xff]  ;;  %v815_v38 = vld [vmem:[%s1227_s20 + $0x58] sm:$0xff] }
 0x14c   : >> { %800 = vst [vmem:[%s1223_s15 + $0x18] sm:$0xff] %v799_v28  ;;  %s1039_s25 = sshll.u32 %s1748_s24, 8  ;;  %v817_v39 = vld [vmem:[%s1227_s20 + $0x60] sm:$0xff]  ;;  %v819_v40 = vld [vmem:[%s1227_s20 + $0x68] sm:$0xff]  ;;  %v821_v41 = vld [vmem:[%s1227_s20 + $0x70] sm:$0xff]  ;;  %s1741_s27 = smov %s1748_s24 }
 0x14d   : >> { %802 = vst [vmem:[%s1223_s15 + $0x20] sm:$0xff] %v801_v29  ;;  %s1646_s26 = scalar_lea.vmem %s1484_s11, %s1039_s25 [#allocation2]   ;;  %s1649_s28 = scalar_lea.vmem %s1597_s18, %s1039_s25   ;;  %v823_v43 = vld [vmem:[%s1227_s20 + $0x78] sm:$0xff]  ;;  %v825_v44 = vld [vmem:[%s1227_s20 + $0x80] sm:$0xff]  ;;  %v827_v45 = vld [vmem:[%s1227_s20 + $0x88] sm:$0xff] }
 0x14e   : >> { %804 = vst [vmem:[%s1223_s15 + $0x28] sm:$0xff] %v803_v30  ;;  %v829_v46 = vld [vmem:[%s1227_s20 + $0x90] sm:$0xff]  ;;  %v831_v47 = vld [vmem:[%s1227_s20 + $0x98] sm:$0xff]  ;;  %v833_v48 = vld [vmem:[%s1227_s20 + $0xa0] sm:$0xff] }
 0x14f   : >> { %806 = vst [vmem:[%s1223_s15 + $0x30] sm:$0xff] %v805_v32  ;;  %v835_v49 = vld [vmem:[%s1227_s20 + $0xa8] sm:$0xff]  ;;  %v837_v50 = vld [vmem:[%s1227_s20 + $0xb0] sm:$0xff]  ;;  %v839_v51 = vld [vmem:[%s1227_s20 + $0xb8] sm:$0xff] }
 0x150   : >> { %808 = vst [vmem:[%s1223_s15 + $0x38] sm:$0xff] %v807_v33  ;;  %v841_v52 = vld [vmem:[%s1227_s20 + $0xc0] sm:$0xff]  ;;  %v843_v53 = vld [vmem:[%s1227_s20 + $0xc8] sm:$0xff]  ;;  %v845_v54 = vld [vmem:[%s1227_s20 + $0xd0] sm:$0xff] }
 0x151   : >> { %810 = vst [vmem:[%s1223_s15 + $0x40] sm:$0xff] %v809_v34  ;;  %v847_v55 = vld [vmem:[%s1227_s20 + $0xd8] sm:$0xff]  ;;  %v849_v56 = vld [vmem:[%s1227_s20 + $0xe0] sm:$0xff]  ;;  %v851_v57 = vld [vmem:[%s1227_s20 + $0xe8] sm:$0xff] }
 0x152   : >> { %812 = vst [vmem:[%s1223_s15 + $0x48] sm:$0xff] %v811_v35  ;;  %v853_v58 = vld [vmem:[%s1227_s20 + $0xf0] sm:$0xff]  ;;  %v855_v59 = vld [vmem:[%s1227_s20 + $0xf8] sm:$0xff]  ;;  %s1740_s20 = smov %s1646_s26 }
 0x153   : >> { %814 = vst [vmem:[%s1223_s15 + $0x50] sm:$0xff] %v813_v36 }
 0x154   : >> { %816 = vst [vmem:[%s1223_s15 + $0x58] sm:$0xff] %v815_v38 }
 0x155   : >> { %818 = vst [vmem:[%s1223_s15 + $0x60] sm:$0xff] %v817_v39 }
 0x156   : >> { %820 = vst [vmem:[%s1223_s15 + $0x68] sm:$0xff] %v819_v40 }
 0x157   : >> { %822 = vst [vmem:[%s1223_s15 + $0x70] sm:$0xff] %v821_v41 }
 0x158   : >> { %824 = vst [vmem:[%s1223_s15 + $0x78] sm:$0xff] %v823_v43 }
 0x159   : >> { %826 = vst [vmem:[%s1223_s15 + $0x80] sm:$0xff] %v825_v44 }
 0x15a   : >> { %828 = vst [vmem:[%s1223_s15 + $0x88] sm:$0xff] %v827_v45 }
 0x15b   : >> { %830 = vst [vmem:[%s1223_s15 + $0x90] sm:$0xff] %v829_v46 }
 0x15c   : >> { %832 = vst [vmem:[%s1223_s15 + $0x98] sm:$0xff] %v831_v47 }
 0x15d   : >> { %834 = vst [vmem:[%s1223_s15 + $0xa0] sm:$0xff] %v833_v48 }
 0x15e   : >> { %836 = vst [vmem:[%s1223_s15 + $0xa8] sm:$0xff] %v835_v49 }
 0x15f   : >> { %838 = vst [vmem:[%s1223_s15 + $0xb0] sm:$0xff] %v837_v50 }
 0x160   : >> { %840 = vst [vmem:[%s1223_s15 + $0xb8] sm:$0xff] %v839_v51 }
 0x161   : >> { %842 = vst [vmem:[%s1223_s15 + $0xc0] sm:$0xff] %v841_v52 }
 0x162   : >> { %844 = vst [vmem:[%s1223_s15 + $0xc8] sm:$0xff] %v843_v53 }
 0x163   : >> { %846 = vst [vmem:[%s1223_s15 + $0xd0] sm:$0xff] %v845_v54 }
 0x164   : >> { %848 = vst [vmem:[%s1223_s15 + $0xd8] sm:$0xff] %v847_v55  ;;  %789 = sbr.rel (!%p786_p12) target bundleno = 328 (0x148), region = 122 }
 0x165   : >> { %850 = vst [vmem:[%s1223_s15 + $0xe0] sm:$0xff] %v849_v56 }
 0x166   : >> { %852 = vst [vmem:[%s1223_s15 + $0xe8] sm:$0xff] %v851_v57 }
 0x167   : >> { %854 = vst [vmem:[%s1223_s15 + $0xf0] sm:$0xff] %v853_v58 }
 0x168   : >> { %856 = vst [vmem:[%s1223_s15 + $0xf8] sm:$0xff] %v855_v59  ;;  %s1739_s15 = smov %s1649_s28 }
 0x169 PF: > { %s1714_s29 = sand.u32 31, %s1746_s12   ;;  %s1051_s4 = sshll.u32 %s1603_s22, 8 }
 0x16a   : > { %s868_s5 = scalar_lea.vmem %s1484_s11, %s1051_s4 [#allocation2]   ;;  %s870_s6 = scalar_lea.vmem %s1597_s18, %s1051_s4  }
 0x16b   : > { %p1044_p13 = scmp.le.s32.totalorder %s1714_s29, 0 }
 0x16c   : > { %s1237_s7 = smov (!%p1044_p13), %s870_s6   ;;  %s1241_s8 = smov (!%p1044_p13), %s868_s5  }
 0x16d   : > { %961 = sbr.rel (%p1044_p13) target bundleno = 378 (0x17a), region = 127  ;;  %s1245_s9 = smov (!%p1044_p13), 0  }
 0x16e   : > { %s1249_s10 = smov (!%p1044_p13), 0  }
 0x172 LB: >> { %v880_v60 = vld [vmem:[%s1243_s8] sm:$0xff]  ;;  %s882_s12 = sadd.s32 1, %s1247_s9  ;;  %s874_s10 = sadd.s32 1, %s1251_s10   ;;  %s1251_s10 = sphi %s1249_s10, %s874_s10   ;;  %s1247_s9 = sphi %s1245_s9, %s1246_s9   ;;  %s1243_s8 = sphi %s1241_s8, %s887_s8   ;;  %s1239_s7 = sphi %s1237_s7, %s888_s7  }
 0x173   : >> { %881 = vst [vmem:[%s1239_s7] sm:$0xff] %v880_v60  ;;  %p883_p0 = scmp.ge.s32.totalorder %s882_s12, %s1714_s29  ;;  %p873_p1 = scmp.ge.s32.totalorder %s874_s10, %s1714_s29 }
 0x175   : >> { %s1750_s12 = smov (%p883_p0, %s882_s12), 0  ;;  %876 = sbr.rel (!%p873_p1) target bundleno = 370 (0x172), region = 133 }
 0x176   : >> { %s1045_s11 = sshll.u32 %s1750_s12, 3  ;;  %s1246_s9 = smov %s1750_s12  }
 0x177   : >> { %s887_s8 = scalar_lea.vmem %s868_s5, %s1045_s11 [#allocation2]   ;;  %s888_s7 = scalar_lea.vmem %s870_s6, %s1045_s11  }
 0x17a PF: > { %p10_p2 = scmp.ge.s32.totalorder %s1288_s16, 4   ;;  %s1742_s12 = smov %s1215_s13 }
 0x17b   : > { %s1743_s13 = smov %s1296_s19  ;;  %s1744_s14 = smov %s1288_s16 }
 0x17c   :  { %12 = sbr.rel (!%p10_p2) target bundleno = 2 (0x2), region = 144 }

// kernel: model_forward.7
= control target key start
LH: loop header
LB: loop body
LE: loop exit
PB: predicated region body
PF: predicated region fallthrough
CT: control target
= control target key end

     0   :  { %s4355_s0 = inlined_call_operand.vmem [shape: f32[2,5880], index: 0, kind: input, shape index: {}]   ;;  %s4356_s1 = inlined_call_operand.vmem [shape: f32[5880,75], index: 1, kind: input, shape index: {}]   ;;  %s4357_s2 = inlined_call_operand.vmem [shape: f32[1,75], index: 2, kind: input, shape index: {}]   ;;  %s4358_s3 = inlined_call_operand.vmem [shape: f32[75,10], index: 3, kind: input, shape index: {}]   ;;  %s4359_s4 = inlined_call_operand.vmem [shape: f32[1,10], index: 4, kind: input, shape index: {}]   ;;  %s4360_s5 = inlined_call_operand.vmem [shape: f32[10,10], index: 5, kind: input, shape index: {}]   ;;  %s4361_s6 = inlined_call_operand.vmem [shape: f32[1,10], index: 6, kind: input, shape index: {}]   ;;  %s4362_s7 = inlined_call_operand.hbm [shape: f32[2,10], index: 7, kind: output, shape index: {}]  }
   0x1   :  { %v54_v0 = vld [vmem:[%s4356_s1 + $0x78] sm:$0xff]  ;;  %v53_v2 = vld [vmem:[%s4356_s1 + $0x70] sm:$0xff]  ;;  %v52_v6 = vld [vmem:[%s4356_s1 + $0x68] sm:$0xff] }
   0x2   :  { %v86_v1 = vld [vmem:[%s4356_s1 + $0x178] sm:$0xff]  ;;  %897 = vmatpush.msra.mxu0 %v54_v0  ;;  %v85_v4 = vld [vmem:[%s4356_s1 + $0x170] sm:$0xff]  ;;  %v84_v8 = vld [vmem:[%s4356_s1 + $0x168] sm:$0xff] }
   0x3   :  { %937 = vmatpush.msra.mxu2 %v86_v1  ;;  %v70_v3 = vld [vmem:[%s4356_s1 + $0xf8] sm:$0xff]  ;;  %v69_v7 = vld [vmem:[%s4356_s1 + $0xf0] sm:$0xff]  ;;  %v68_v10 = vld [vmem:[%s4356_s1 + $0xe8] sm:$0xff] }
   0x4   :  { %v102_v5 = vld [vmem:[%s4356_s1 + $0x1f8] sm:$0xff]  ;;  %917 = vmatpush.msra.mxu1 %v70_v3  ;;  %898 = vmatpush.msra.mxu0 %v53_v2  ;;  %v101_v9 = vld [vmem:[%s4356_s1 + $0x1f0] sm:$0xff]  ;;  %v51_v11 = vld [vmem:[%s4356_s1 + $0x60] sm:$0xff] }
   0x5   :  { %957 = vmatpush.msra.mxu3 %v102_v5  ;;  %938 = vmatpush.msra.mxu2 %v85_v4  ;;  %v83_v12 = vld [vmem:[%s4356_s1 + $0x160] sm:$0xff]  ;;  %v100_v13 = vld [vmem:[%s4356_s1 + $0x1e8] sm:$0xff]  ;;  %v50_v16 = vld [vmem:[%s4356_s1 + $0x58] sm:$0xff] }
   0x6   :  { %918 = vmatpush.msra.mxu1 %v69_v7  ;;  %899 = vmatpush.msra.mxu0 %v52_v6  ;;  %v67_v14 = vld [vmem:[%s4356_s1 + $0xe0] sm:$0xff]  ;;  %v82_v17 = vld [vmem:[%s4356_s1 + $0x158] sm:$0xff]  ;;  %v49_v20 = vld [vmem:[%s4356_s1 + $0x50] sm:$0xff] }
   0x7   :  { %958 = vmatpush.msra.mxu3 %v101_v9  ;;  %939 = vmatpush.msra.mxu2 %v84_v8  ;;  %v99_v15 = vld [vmem:[%s4356_s1 + $0x1e0] sm:$0xff]  ;;  %v66_v18 = vld [vmem:[%s4356_s1 + $0xd8] sm:$0xff]  ;;  %v81_v21 = vld [vmem:[%s4356_s1 + $0x150] sm:$0xff] }
   0x8   :  { %919 = vmatpush.msra.mxu1 %v68_v10  ;;  %900 = vmatpush.msra.mxu0 %v51_v11  ;;  %v98_v19 = vld [vmem:[%s4356_s1 + $0x1d8] sm:$0xff]  ;;  %v65_v22 = vld [vmem:[%s4356_s1 + $0xd0] sm:$0xff]  ;;  %v48_v24 = vld [vmem:[%s4356_s1 + $0x48] sm:$0xff] }
   0x9   :  { %959 = vmatpush.msra.mxu3 %v100_v13  ;;  %940 = vmatpush.msra.mxu2 %v83_v12  ;;  %v97_v23 = vld [vmem:[%s4356_s1 + $0x1d0] sm:$0xff]  ;;  %v80_v25 = vld [vmem:[%s4356_s1 + $0x148] sm:$0xff]  ;;  %v47_v28 = vld [vmem:[%s4356_s1 + $0x40] sm:$0xff] }
   0xa   :  { %920 = vmatpush.msra.mxu1 %v67_v14  ;;  %901 = vmatpush.msra.mxu0 %v50_v16  ;;  %v64_v26 = vld [vmem:[%s4356_s1 + $0xc8] sm:$0xff]  ;;  %v79_v29 = vld [vmem:[%s4356_s1 + $0x140] sm:$0xff]  ;;  %v46_v32 = vld [vmem:[%s4356_s1 + $0x38] sm:$0xff] }
   0xb   :  { %960 = vmatpush.msra.mxu3 %v99_v15  ;;  %941 = vmatpush.msra.mxu2 %v82_v17  ;;  %v96_v27 = vld [vmem:[%s4356_s1 + $0x1c8] sm:$0xff]  ;;  %v63_v30 = vld [vmem:[%s4356_s1 + $0xc0] sm:$0xff]  ;;  %v78_v33 = vld [vmem:[%s4356_s1 + $0x138] sm:$0xff] }
   0xc   :  { %921 = vmatpush.msra.mxu1 %v66_v18  ;;  %902 = vmatpush.msra.mxu0 %v49_v20  ;;  %v95_v31 = vld [vmem:[%s4356_s1 + $0x1c0] sm:$0xff]  ;;  %v62_v34 = vld [vmem:[%s4356_s1 + $0xb8] sm:$0xff]  ;;  %v45_v36 = vld [vmem:[%s4356_s1 + $0x30] sm:$0xff] }
   0xd   :  { %961 = vmatpush.msra.mxu3 %v98_v19  ;;  %942 = vmatpush.msra.mxu2 %v81_v21  ;;  %v94_v35 = vld [vmem:[%s4356_s1 + $0x1b8] sm:$0xff]  ;;  %v77_v37 = vld [vmem:[%s4356_s1 + $0x130] sm:$0xff]  ;;  %v44_v40 = vld [vmem:[%s4356_s1 + $0x28] sm:$0xff] }
   0xe   :  { %922 = vmatpush.msra.mxu1 %v65_v22  ;;  %903 = vmatpush.msra.mxu0 %v48_v24  ;;  %v61_v38 = vld [vmem:[%s4356_s1 + $0xb0] sm:$0xff]  ;;  %v76_v41 = vld [vmem:[%s4356_s1 + $0x128] sm:$0xff]  ;;  %v43_v44 = vld [vmem:[%s4356_s1 + $0x20] sm:$0xff] }
   0xf   :  { %962 = vmatpush.msra.mxu3 %v97_v23  ;;  %943 = vmatpush.msra.mxu2 %v80_v25  ;;  %v93_v39 = vld [vmem:[%s4356_s1 + $0x1b0] sm:$0xff]  ;;  %v60_v42 = vld [vmem:[%s4356_s1 + $0xa8] sm:$0xff]  ;;  %v75_v45 = vld [vmem:[%s4356_s1 + $0x120] sm:$0xff] }
  0x10   :  { %923 = vmatpush.msra.mxu1 %v64_v26  ;;  %904 = vmatpush.msra.mxu0 %v47_v28  ;;  %v92_v43 = vld [vmem:[%s4356_s1 + $0x1a8] sm:$0xff]  ;;  %v59_v46 = vld [vmem:[%s4356_s1 + $0xa0] sm:$0xff]  ;;  %v42_v48 = vld [vmem:[%s4356_s1 + $0x18] sm:$0xff] }
  0x11   :  { %963 = vmatpush.msra.mxu3 %v96_v27  ;;  %944 = vmatpush.msra.mxu2 %v79_v29  ;;  %v91_v47 = vld [vmem:[%s4356_s1 + $0x1a0] sm:$0xff]  ;;  %v74_v49 = vld [vmem:[%s4356_s1 + $0x118] sm:$0xff]  ;;  %v41_v52 = vld [vmem:[%s4356_s1 + $0x10] sm:$0xff] }
  0x12   :  { %924 = vmatpush.msra.mxu1 %v63_v30  ;;  %905 = vmatpush.msra.mxu0 %v46_v32  ;;  %v58_v50 = vld [vmem:[%s4356_s1 + $0x98] sm:$0xff]  ;;  %v73_v53 = vld [vmem:[%s4356_s1 + $0x110] sm:$0xff]  ;;  %v40_v56 = vld [vmem:[%s4356_s1 + $0x8] sm:$0xff] }
  0x13   :  { %964 = vmatpush.msra.mxu3 %v95_v31  ;;  %945 = vmatpush.msra.mxu2 %v78_v33  ;;  %v90_v51 = vld [vmem:[%s4356_s1 + $0x198] sm:$0xff]  ;;  %v57_v54 = vld [vmem:[%s4356_s1 + $0x90] sm:$0xff]  ;;  %v72_v57 = vld [vmem:[%s4356_s1 + $0x108] sm:$0xff] }
  0x14   :  { %925 = vmatpush.msra.mxu1 %v62_v34  ;;  %906 = vmatpush.msra.mxu0 %v45_v36  ;;  %v89_v55 = vld [vmem:[%s4356_s1 + $0x190] sm:$0xff]  ;;  %v56_v58 = vld [vmem:[%s4356_s1 + $0x88] sm:$0xff]  ;;  %v39_v60 = vld [vmem:[%s4356_s1] sm:$0xff] }
  0x15   :  { %965 = vmatpush.msra.mxu3 %v94_v35  ;;  %946 = vmatpush.msra.mxu2 %v77_v37  ;;  %v88_v59 = vld [vmem:[%s4356_s1 + $0x188] sm:$0xff]  ;;  %v71_v61 = vld [vmem:[%s4356_s1 + $0x100] sm:$0xff]  ;;  %v118_v62 = vld [vmem:[%s4356_s1 + $0x278] sm:$0xff] }
  0x16   :  { %926 = vmatpush.msra.mxu1 %v61_v38  ;;  %907 = vmatpush.msra.mxu0 %v44_v40  ;;  %v150_v63 = vld [vmem:[%s4356_s1 + $0x378] sm:$0xff]  ;;  %v55_v0 = vld [vmem:[%s4356_s1 + $0x80] sm:$0xff]  ;;  %v117_v2 = vld [vmem:[%s4356_s1 + $0x270] sm:$0xff] }
  0x17   :  { %966 = vmatpush.msra.mxu3 %v93_v39  ;;  %947 = vmatpush.msra.mxu2 %v76_v41  ;;  %v87_v1 = vld [vmem:[%s4356_s1 + $0x180] sm:$0xff]  ;;  %v134_v3 = vld [vmem:[%s4356_s1 + $0x2f8] sm:$0xff]  ;;  %v149_v4 = vld [vmem:[%s4356_s1 + $0x370] sm:$0xff] }
  0x18   :  { %927 = vmatpush.msra.mxu1 %v60_v42  ;;  %908 = vmatpush.msra.mxu0 %v43_v44  ;;  %v166_v5 = vld [vmem:[%s4356_s1 + $0x3f8] sm:$0xff]  ;;  %v116_v6 = vld [vmem:[%s4356_s1 + $0x268] sm:$0xff]  ;;  %v133_v7 = vld [vmem:[%s4356_s1 + $0x2f0] sm:$0xff] }
  0x19   :  { %967 = vmatpush.msra.mxu3 %v92_v43  ;;  %948 = vmatpush.msra.mxu2 %v75_v45  ;;  %v148_v8 = vld [vmem:[%s4356_s1 + $0x368] sm:$0xff]  ;;  %v165_v9 = vld [vmem:[%s4356_s1 + $0x3f0] sm:$0xff]  ;;  %v115_v10 = vld [vmem:[%s4356_s1 + $0x260] sm:$0xff] }
  0x1a   :  { %928 = vmatpush.msra.mxu1 %v59_v46  ;;  %909 = vmatpush.msra.mxu0 %v42_v48  ;;  %v132_v11 = vld [vmem:[%s4356_s1 + $0x2e8] sm:$0xff]  ;;  %v147_v12 = vld [vmem:[%s4356_s1 + $0x360] sm:$0xff]  ;;  %v114_v14 = vld [vmem:[%s4356_s1 + $0x258] sm:$0xff] }
  0x1b   :  { %968 = vmatpush.msra.mxu3 %v91_v47  ;;  %949 = vmatpush.msra.mxu2 %v74_v49  ;;  %v164_v13 = vld [vmem:[%s4356_s1 + $0x3e8] sm:$0xff]  ;;  %v131_v15 = vld [vmem:[%s4356_s1 + $0x2e0] sm:$0xff]  ;;  %v146_v16 = vld [vmem:[%s4356_s1 + $0x358] sm:$0xff] }
  0x1c   :  { %929 = vmatpush.msra.mxu1 %v58_v50  ;;  %910 = vmatpush.msra.mxu0 %v41_v52  ;;  %v163_v17 = vld [vmem:[%s4356_s1 + $0x3e0] sm:$0xff]  ;;  %v113_v18 = vld [vmem:[%s4356_s1 + $0x250] sm:$0xff]  ;;  %v130_v19 = vld [vmem:[%s4356_s1 + $0x2d8] sm:$0xff] }
  0x1d   :  { %969 = vmatpush.msra.mxu3 %v90_v51  ;;  %950 = vmatpush.msra.mxu2 %v73_v53  ;;  %v145_v20 = vld [vmem:[%s4356_s1 + $0x350] sm:$0xff]  ;;  %v162_v21 = vld [vmem:[%s4356_s1 + $0x3d8] sm:$0xff]  ;;  %v27_v22 = vld [vmem:[%s4355_s0] sm:$0xff] }
  0x1e   :  { %930 = vmatpush.msra.mxu1 %v57_v54  ;;  %911 = vmatpush.msra.mxu0 %v40_v56  ;;  %v112_v23 = vld [vmem:[%s4356_s1 + $0x248] sm:$0xff]  ;;  %v129_v24 = vld [vmem:[%s4356_s1 + $0x2d0] sm:$0xff]  ;;  %790 = vst [vmem:[#allocation1] ss:$4 sm:$0xff] %v27_v22  ;;  %v111_v27 = vld [vmem:[%s4356_s1 + $0x240] sm:$0xff] }
  0x1f   :  { %970 = vmatpush.msra.mxu3 %v89_v55  ;;  %951 = vmatpush.msra.mxu2 %v72_v57  ;;  %v144_v25 = vld [vmem:[%s4356_s1 + $0x348] sm:$0xff]  ;;  %v161_v26 = vld [vmem:[%s4356_s1 + $0x3d0] sm:$0xff]  ;;  %v143_v29 = vld [vmem:[%s4356_s1 + $0x340] sm:$0xff] }
  0x20   :  { %931 = vmatpush.msra.mxu1 %v56_v58  ;;  %912 = vmatpush.msra.mxu0 %v39_v60  ;;  %v128_v28 = vld [vmem:[%s4356_s1 + $0x2c8] sm:$0xff]  ;;  %v110_v31 = vld [vmem:[%s4356_s1 + $0x238] sm:$0xff]  ;;  %v127_v32 = vld [vmem:[%s4356_s1 + $0x2c0] sm:$0xff] }
  0x21   :  { %971 = vmatpush.msra.mxu3 %v88_v59  ;;  %952 = vmatpush.msra.mxu2 %v71_v61  ;;  %v160_v30 = vld [vmem:[%s4356_s1 + $0x3c8] sm:$0xff]  ;;  %v142_v33 = vld [vmem:[%s4356_s1 + $0x338] sm:$0xff]  ;;  %v159_v34 = vld [vmem:[%s4356_s1 + $0x3c0] sm:$0xff] }
  0x22   :  { %977 = vmatpush.msrb.mxu0 %v118_v62  ;;  %932 = vmatpush.msra.mxu1 %v55_v0  ;;  %v109_v35 = vld [vmem:[%s4356_s1 + $0x230] sm:$0xff]  ;;  %v126_v36 = vld [vmem:[%s4356_s1 + $0x2b8] sm:$0xff]  ;;  %v28_v39 = vld [vmem:[%s4355_s0 + $0x8] sm:$0xff] }
  0x23   :  { %1017 = vmatpush.msrb.mxu2 %v150_v63  ;;  %972 = vmatpush.msra.mxu3 %v87_v1  ;;  %v141_v37 = vld [vmem:[%s4356_s1 + $0x330] sm:$0xff]  ;;  %v158_v38 = vld [vmem:[%s4356_s1 + $0x3b8] sm:$0xff]  ;;  %v108_v40 = vld [vmem:[%s4356_s1 + $0x228] sm:$0xff]  ;;  %792 = vst [vmem:[#allocation1 + $0x20] ss:$4 sm:$0xff] %v28_v39 }
  0x24   :  { %978 = vmatpush.msrb.mxu0 %v117_v2  ;;  %997 = vmatpush.msrb.mxu1 %v134_v3  ;;  %v125_v41 = vld [vmem:[%s4356_s1 + $0x2b0] sm:$0xff]  ;;  %v140_v43 = vld [vmem:[%s4356_s1 + $0x328] sm:$0xff]  ;;  %v107_v49 = vld [vmem:[%s4356_s1 + $0x220] sm:$0xff] }
  0x25   :  { %1018 = vmatpush.msrb.mxu2 %v149_v4  ;;  %1037 = vmatpush.msrb.mxu3 %v166_v5  ;;  %v29_v42 = vld [vmem:[%s4355_s0 + $0x10] sm:$0xff]  ;;  %v2342_v45 = vld.sshfl [vmem:[#allocation1] sm:$0xff pattern:$0x73625140]  ;;  %v124_v50 = vld [vmem:[%s4356_s1 + $0x2a8] sm:$0xff] }
  0x26   :  { %979 = vmatpush.msrb.mxu0 %v116_v6  ;;  %998 = vmatpush.msrb.mxu1 %v133_v7  ;;  %v795_v44 = vld.sshfl [vmem:[#allocation1 + $0x10] sm:$0xff pattern:$0x73625140]  ;;  %v2344_v46 = vld.sshfl [vmem:[#allocation1 + $0x18] sm:$0xff pattern:$0x73625140] }
  0x27   :  { %1019 = vmatpush.msrb.mxu2 %v148_v8  ;;  %1038 = vmatpush.msrb.mxu3 %v165_v9  ;;  %v2346_v47 = vld.sshfl [vmem:[#allocation1 + $0x8] sm:$0xff pattern:$0x73625140]  ;;  %v157_v48 = vld [vmem:[%s4356_s1 + $0x3b0] sm:$0xff]  ;;  %v139_v51 = vld [vmem:[%s4356_s1 + $0x320] sm:$0xff] }
  0x28   :  { %980 = vmatpush.msrb.mxu0 %v115_v10  ;;  %999 = vmatpush.msrb.mxu1 %v132_v11  ;;  %801 = vst [vmem:[#allocation1] ss:$4 sm:$0xff] %v29_v42  ;;  %v156_v52 = vld [vmem:[%s4356_s1 + $0x3a8] sm:$0xff]  ;;  %v106_v53 = vld [vmem:[%s4356_s1 + $0x218] sm:$0xff]  ;;  %v123_v54 = vld [vmem:[%s4356_s1 + $0x2a0] sm:$0xff] }
  0x29   :  { %1020 = vmatpush.msrb.mxu2 %v147_v12  ;;  %1039 = vmatpush.msrb.mxu3 %v164_v13  ;;  %v138_v55 = vld [vmem:[%s4356_s1 + $0x318] sm:$0xff]  ;;  %v155_v56 = vld [vmem:[%s4356_s1 + $0x3a0] sm:$0xff]  ;;  %v105_v57 = vld [vmem:[%s4356_s1 + $0x210] sm:$0xff] }
  0x2a   :  { %981 = vmatpush.msrb.mxu0 %v114_v14  ;;  %1000 = vmatpush.msrb.mxu1 %v131_v15  ;;  %v122_v58 = vld [vmem:[%s4356_s1 + $0x298] sm:$0xff]  ;;  %v2384_v60 = vld.sshfl [vmem:[#allocation1 + $0x30] sm:$0xff pattern:$0x73625140]  ;;  %v104_v2 = vld [vmem:[%s4356_s1 + $0x208] sm:$0xff] }
  0x2b   :  { %1021 = vmatpush.msrb.mxu2 %v146_v16  ;;  %1040 = vmatpush.msrb.mxu3 %v163_v17  ;;  %v30_v59 = vld [vmem:[%s4355_s0 + $0x18] sm:$0xff]  ;;  %v2386_v61 = vld.sshfl [vmem:[#allocation1 + $0x20] sm:$0xff pattern:$0x73625140]  ;;  %v137_v0 = vld [vmem:[%s4356_s1 + $0x310] sm:$0xff] }
  0x2c   :  { %982 = vmatpush.msrb.mxu0 %v113_v18  ;;  %1001 = vmatpush.msrb.mxu1 %v130_v19  ;;  %v2388_v62 = vld.sshfl [vmem:[#allocation1 + $0x38] sm:$0xff pattern:$0x73625140]  ;;  %v2390_v63 = vld.sshfl [vmem:[#allocation1 + $0x28] sm:$0xff pattern:$0x73625140] }
  0x2d   :  { %1022 = vmatpush.msrb.mxu2 %v145_v20  ;;  %1041 = vmatpush.msrb.mxu3 %v162_v21  ;;  %v154_v1 = vld [vmem:[%s4356_s1 + $0x398] sm:$0xff]  ;;  %802 = vst [vmem:[#allocation1 + $0x20] ss:$4 sm:$0xff] %v30_v59  ;;  %v121_v3 = vld [vmem:[%s4356_s1 + $0x290] sm:$0xff]  ;;  %v136_v4 = vld [vmem:[%s4356_s1 + $0x308] sm:$0xff] }
  0x2e   :  { %983 = vmatpush.msrb.mxu0 %v112_v23  ;;  %1002 = vmatpush.msrb.mxu1 %v129_v24  ;;  %v153_v5 = vld [vmem:[%s4356_s1 + $0x390] sm:$0xff]  ;;  %v103_v6 = vld [vmem:[%s4356_s1 + $0x200] sm:$0xff]  ;;  %v120_v7 = vld [vmem:[%s4356_s1 + $0x288] sm:$0xff] }
  0x2f   :  { %1023 = vmatpush.msrb.mxu2 %v144_v25  ;;  %1042 = vmatpush.msrb.mxu3 %v161_v26  ;;  %v135_v8 = vld [vmem:[%s4356_s1 + $0x300] sm:$0xff]  ;;  %v152_v9 = vld [vmem:[%s4356_s1 + $0x388] sm:$0xff]  ;;  %v182_v10 = vld [vmem:[%s4356_s1 + $0x478] sm:$0xff] }
  0x30   :  { %984 = vmatpush.msrb.mxu0 %v111_v27  ;;  %1003 = vmatpush.msrb.mxu1 %v128_v28  ;;  %v214_v11 = vld [vmem:[%s4356_s1 + $0x578] sm:$0xff]  ;;  %v119_v12 = vld [vmem:[%s4356_s1 + $0x280] sm:$0xff]  ;;  %v181_v14 = vld [vmem:[%s4356_s1 + $0x470] sm:$0xff] }
  0x31   :  { %1024 = vmatpush.msrb.mxu2 %v143_v29  ;;  %1043 = vmatpush.msrb.mxu3 %v160_v30  ;;  %v151_v13 = vld [vmem:[%s4356_s1 + $0x380] sm:$0xff]  ;;  %v198_v15 = vld [vmem:[%s4356_s1 + $0x4f8] sm:$0xff]  ;;  %v213_v16 = vld [vmem:[%s4356_s1 + $0x570] sm:$0xff] }
  0x32   :  { %985 = vmatpush.msrb.mxu0 %v110_v31  ;;  %1004 = vmatpush.msrb.mxu1 %v127_v32  ;;  %v230_v17 = vld [vmem:[%s4356_s1 + $0x5f8] sm:$0xff]  ;;  %v180_v18 = vld [vmem:[%s4356_s1 + $0x468] sm:$0xff]  ;;  %v197_v19 = vld [vmem:[%s4356_s1 + $0x4f0] sm:$0xff] }
  0x33   :  { %1025 = vmatpush.msrb.mxu2 %v142_v33  ;;  %1044 = vmatpush.msrb.mxu3 %v159_v34  ;;  %v212_v20 = vld [vmem:[%s4356_s1 + $0x568] sm:$0xff]  ;;  %v229_v21 = vld [vmem:[%s4356_s1 + $0x5f0] sm:$0xff]  ;;  %v179_v22 = vld [vmem:[%s4356_s1 + $0x460] sm:$0xff] }
  0x34   :  { %986 = vmatpush.msrb.mxu0 %v109_v35  ;;  %1005 = vmatpush.msrb.mxu1 %v126_v36  ;;  %v196_v23 = vld [vmem:[%s4356_s1 + $0x4e8] sm:$0xff]  ;;  %v211_v24 = vld [vmem:[%s4356_s1 + $0x560] sm:$0xff]  ;;  %v2472_v26 = vld.sshfl [vmem:[#allocation1 + $0x10] sm:$0xff pattern:$0x73625140] }
  0x35   :  { %1026 = vmatpush.msrb.mxu2 %v141_v37  ;;  %1045 = vmatpush.msrb.mxu3 %v158_v38  ;;  %v2470_v25 = vld.sshfl [vmem:[#allocation1] sm:$0xff pattern:$0x73625140]  ;;  %v2474_v27 = vld.sshfl [vmem:[#allocation1 + $0x8] sm:$0xff pattern:$0x73625140] }
  0x36   :  { %987 = vmatpush.msrb.mxu0 %v108_v40  ;;  %1006 = vmatpush.msrb.mxu1 %v125_v41  ;;  %v228_v28 = vld [vmem:[%s4356_s1 + $0x5e8] sm:$0xff]  ;;  %v31_v29 = vld [vmem:[%s4355_s0 + $0x20] sm:$0xff]  ;;  %v2482_v30 = vld.sshfl [vmem:[#allocation1 + $0x18] sm:$0xff pattern:$0x73625140] }
  0x37   :  { %1027 = vmatpush.msrb.mxu2 %v140_v43  ;;  %1046 = vmatpush.msrb.mxu3 %v157_v48  ;;  %v178_v31 = vld [vmem:[%s4356_s1 + $0x458] sm:$0xff]  ;;  %v195_v32 = vld [vmem:[%s4356_s1 + $0x4e0] sm:$0xff]  ;;  %811 = vst [vmem:[#allocation1] ss:$4 sm:$0xff] %v31_v29  ;;  %v177_v35 = vld [vmem:[%s4356_s1 + $0x450] sm:$0xff] }
  0x38   :  { %988 = vmatpush.msrb.mxu0 %v107_v49  ;;  %1007 = vmatpush.msrb.mxu1 %v124_v50  ;;  %v210_v33 = vld [vmem:[%s4356_s1 + $0x558] sm:$0xff]  ;;  %v227_v34 = vld [vmem:[%s4356_s1 + $0x5e0] sm:$0xff] }
  0x39   :  { %1028 = vmatpush.msrb.mxu2 %v139_v51  ;;  %1047 = vmatpush.msrb.mxu3 %v156_v52  ;;  %v194_v36 = vld [vmem:[%s4356_s1 + $0x4d8] sm:$0xff] }
  0x3a   :  { %989 = vmatpush.msrb.mxu0 %v106_v53  ;;  %1008 = vmatpush.msrb.mxu1 %v123_v54 }
  0x3b   :  { %1029 = vmatpush.msrb.mxu2 %v138_v55  ;;  %1048 = vmatpush.msrb.mxu3 %v155_v56 }
  0x3c   :  { %990 = vmatpush.msrb.mxu0 %v105_v57  ;;  %1009 = vmatpush.msrb.mxu1 %v122_v58 }
  0x3d   :  { %1030 = vmatpush.msrb.mxu2 %v137_v0  ;;  %1049 = vmatpush.msrb.mxu3 %v154_v1 }
  0x3e   :  { %991 = vmatpush.msrb.mxu0 %v104_v2  ;;  %1010 = vmatpush.msrb.mxu1 %v121_v3 }
  0x3f   :  { %1031 = vmatpush.msrb.mxu2 %v136_v4  ;;  %1050 = vmatpush.msrb.mxu3 %v153_v5 }
  0x40   :  { %953 = vmatmul.f32.vlgmr.msra.gmra.mxu2 %v795_v44  ;;  %992 = vmatpush.msrb.mxu0 %v103_v6 }
  0x41   :  { %1011 = vmatpush.msrb.mxu1 %v120_v7  ;;  %1032 = vmatpush.msrb.mxu2 %v135_v8 }
  0x42   :  { %1051 = vmatpush.msrb.mxu3 %v152_v9  ;;  %913 = vmatmul.f32.vlgmr.msra.gmra.mxu0 %v2342_v45 }
  0x43   :  { %973 = vmatmul.f32.vlgmr.msra.gmra.mxu3 %v2344_v46  ;;  %1057 = vmatpush.msra.mxu0 %v182_v10 }
  0x44   :  { %1097 = vmatpush.msra.mxu2 %v214_v11  ;;  %1012 = vmatpush.msrb.mxu1 %v119_v12 }
  0x45   :  { %1052 = vmatpush.msrb.mxu3 %v151_v13  ;;  %933 = vmatmul.f32.vlgmr.msra.gmra.mxu1 %v2346_v47 }
  0x46   :  { %1058 = vmatpush.msra.mxu0 %v181_v14  ;;  %1077 = vmatpush.msra.mxu1 %v198_v15 }
  0x47   :  { %1098 = vmatpush.msra.mxu2 %v213_v16  ;;  %1117 = vmatpush.msra.mxu3 %v230_v17 }
  0x48   :  { %1059 = vmatpush.msra.mxu0 %v180_v18  ;;  %1078 = vmatpush.msra.mxu1 %v197_v19 }
  0x49   :  { %1099 = vmatpush.msra.mxu2 %v212_v20  ;;  %1118 = vmatpush.msra.mxu3 %v229_v21 }
  0x4a   :  { %1033 = vmatmul.f32.vlgmr.msrb.gmra.mxu2 %v2384_v60  ;;  %1060 = vmatpush.msra.mxu0 %v179_v22 }
  0x4b   :  { %1079 = vmatpush.msra.mxu1 %v196_v23  ;;  %1100 = vmatpush.msra.mxu2 %v211_v24 }
  0x4c   :  { %1119 = vmatpush.msra.mxu3 %v228_v28  ;;  %993 = vmatmul.f32.vlgmr.msrb.gmra.mxu0 %v2386_v61 }
  0x4d   :  { %1053 = vmatmul.f32.vlgmr.msrb.gmra.mxu3 %v2388_v62  ;;  %1061 = vmatpush.msra.mxu0 %v178_v31 }
  0x4e   :  { %12 = vsyncpa [#allocation3], 0  ;;  %1080 = vmatpush.msra.mxu1 %v195_v32  ;;  %1101 = vmatpush.msra.mxu2 %v210_v33  ;;  %v209_v37 = vld [vmem:[%s4356_s1 + $0x550] sm:$0xff]  ;;  %v226_v38 = vld [vmem:[%s4356_s1 + $0x5d8] sm:$0xff]  ;;  %vm894_vm0 = vcmask 982016   ;;  %vm1836_vm1 = vcmask 1042432  }
  0x4f   :  { %1120 = vmatpush.msra.mxu3 %v227_v34  ;;  %1013 = vmatmul.f32.vlgmr.msrb.gmra.mxu1 %v2390_v63  ;;  %v176_v39 = vld [vmem:[%s4356_s1 + $0x448] sm:$0xff]  ;;  %v193_v40 = vld [vmem:[%s4356_s1 + $0x4d0] sm:$0xff]  ;;  %v175_v43 = vld [vmem:[%s4356_s1 + $0x440] sm:$0xff]  ;;  %vm1871_vm2 = vcmask 1041408   ;;  %vm1832_vm3 = vcmask 613376   ;;  %vm1867_vm4 = vcmask 80896  }
  0x50   :  { %1062 = vmatpush.msra.mxu0 %v177_v35  ;;  %1081 = vmatpush.msra.mxu1 %v194_v36  ;;  %v208_v41 = vld [vmem:[%s4356_s1 + $0x548] sm:$0xff]  ;;  %v225_v42 = vld [vmem:[%s4356_s1 + $0x5d0] sm:$0xff]  ;;  %v207_v45 = vld [vmem:[%s4356_s1 + $0x540] sm:$0xff]  ;;  %vm1896_vm5 = vcmask 74752   ;;  %s1929_s21 = sshll.u32 %s4362_s7, 4  ;;  %s1930_s21 = int_to_ptr.hbm [resolvable:$true] %s1929_s21 }
  0x51   :  { %1102 = vmatpush.msra.mxu2 %v209_v37  ;;  %1121 = vmatpush.msra.mxu3 %v226_v38  ;;  %v192_v44 = vld [vmem:[%s4356_s1 + $0x4c8] sm:$0xff]  ;;  %v174_v47 = vld [vmem:[%s4356_s1 + $0x438] sm:$0xff]  ;;  %v191_v48 = vld [vmem:[%s4356_s1 + $0x4c0] sm:$0xff] }
  0x52   :  { %1063 = vmatpush.msra.mxu0 %v176_v39  ;;  %1082 = vmatpush.msra.mxu1 %v193_v40  ;;  %v224_v46 = vld [vmem:[%s4356_s1 + $0x5c8] sm:$0xff]  ;;  %v206_v49 = vld [vmem:[%s4356_s1 + $0x538] sm:$0xff]  ;;  %v223_v50 = vld [vmem:[%s4356_s1 + $0x5c0] sm:$0xff] }
  0x53   :  { %1103 = vmatpush.msra.mxu2 %v208_v41  ;;  %1122 = vmatpush.msra.mxu3 %v225_v42  ;;  %v173_v51 = vld [vmem:[%s4356_s1 + $0x430] sm:$0xff]  ;;  %v190_v52 = vld [vmem:[%s4356_s1 + $0x4b8] sm:$0xff]  ;;  %v172_v55 = vld [vmem:[%s4356_s1 + $0x428] sm:$0xff] }
  0x54   :  { %1064 = vmatpush.msra.mxu0 %v175_v43  ;;  %1083 = vmatpush.msra.mxu1 %v192_v44  ;;  %v205_v53 = vld [vmem:[%s4356_s1 + $0x530] sm:$0xff]  ;;  %v222_v54 = vld [vmem:[%s4356_s1 + $0x5b8] sm:$0xff]  ;;  %v204_v57 = vld [vmem:[%s4356_s1 + $0x528] sm:$0xff] }
  0x55   :  { %1104 = vmatpush.msra.mxu2 %v207_v45  ;;  %1123 = vmatpush.msra.mxu3 %v224_v46  ;;  %v189_v56 = vld [vmem:[%s4356_s1 + $0x4b0] sm:$0xff]  ;;  %v171_v59 = vld [vmem:[%s4356_s1 + $0x420] sm:$0xff]  ;;  %v188_v60 = vld [vmem:[%s4356_s1 + $0x4a8] sm:$0xff] }
  0x56   :  { %1065 = vmatpush.msra.mxu0 %v174_v47  ;;  %1084 = vmatpush.msra.mxu1 %v191_v48  ;;  %v221_v58 = vld [vmem:[%s4356_s1 + $0x5b0] sm:$0xff]  ;;  %v203_v61 = vld [vmem:[%s4356_s1 + $0x520] sm:$0xff]  ;;  %v220_v62 = vld [vmem:[%s4356_s1 + $0x5a8] sm:$0xff] }
  0x57   :  { %1105 = vmatpush.msra.mxu2 %v206_v49  ;;  %1124 = vmatpush.msra.mxu3 %v223_v50  ;;  %v170_v63 = vld [vmem:[%s4356_s1 + $0x418] sm:$0xff]  ;;  %v187_v0 = vld [vmem:[%s4356_s1 + $0x4a0] sm:$0xff]  ;;  %v169_v3 = vld [vmem:[%s4356_s1 + $0x410] sm:$0xff] }
  0x58   :  { %1066 = vmatpush.msra.mxu0 %v173_v51  ;;  %1085 = vmatpush.msra.mxu1 %v190_v52  ;;  %v202_v1 = vld [vmem:[%s4356_s1 + $0x518] sm:$0xff]  ;;  %v219_v2 = vld [vmem:[%s4356_s1 + $0x5a0] sm:$0xff]  ;;  %v201_v5 = vld [vmem:[%s4356_s1 + $0x510] sm:$0xff] }
  0x59   :  { %1106 = vmatpush.msra.mxu2 %v205_v53  ;;  %1125 = vmatpush.msra.mxu3 %v222_v54  ;;  %v186_v4 = vld [vmem:[%s4356_s1 + $0x498] sm:$0xff]  ;;  %v168_v7 = vld [vmem:[%s4356_s1 + $0x408] sm:$0xff]  ;;  %v185_v8 = vld [vmem:[%s4356_s1 + $0x490] sm:$0xff] }
  0x5a   :  { %1067 = vmatpush.msra.mxu0 %v172_v55  ;;  %1086 = vmatpush.msra.mxu1 %v189_v56  ;;  %v218_v6 = vld [vmem:[%s4356_s1 + $0x598] sm:$0xff]  ;;  %v200_v9 = vld [vmem:[%s4356_s1 + $0x508] sm:$0xff]  ;;  %v217_v10 = vld [vmem:[%s4356_s1 + $0x590] sm:$0xff] }
  0x5b   :  { %1107 = vmatpush.msra.mxu2 %v204_v57  ;;  %1126 = vmatpush.msra.mxu3 %v221_v58  ;;  %v167_v11 = vld [vmem:[%s4356_s1 + $0x400] sm:$0xff]  ;;  %v184_v12 = vld [vmem:[%s4356_s1 + $0x488] sm:$0xff]  ;;  %v246_v15 = vld [vmem:[%s4356_s1 + $0x678] sm:$0xff] }
  0x5c   :  { %1068 = vmatpush.msra.mxu0 %v171_v59  ;;  %1087 = vmatpush.msra.mxu1 %v188_v60  ;;  %v199_v13 = vld [vmem:[%s4356_s1 + $0x500] sm:$0xff]  ;;  %v216_v14 = vld [vmem:[%s4356_s1 + $0x588] sm:$0xff]  ;;  %v278_v16 = vld [vmem:[%s4356_s1 + $0x778] sm:$0xff] }
  0x5d   :  { %1108 = vmatpush.msra.mxu2 %v203_v61  ;;  %1127 = vmatpush.msra.mxu3 %v220_v62  ;;  %v183_v17 = vld [vmem:[%s4356_s1 + $0x480] sm:$0xff]  ;;  %v245_v19 = vld [vmem:[%s4356_s1 + $0x670] sm:$0xff]  ;;  %v262_v20 = vld [vmem:[%s4356_s1 + $0x6f8] sm:$0xff] }
  0x5e   :  { %1069 = vmatpush.msra.mxu0 %v170_v63  ;;  %1088 = vmatpush.msra.mxu1 %v187_v0  ;;  %v215_v18 = vld [vmem:[%s4356_s1 + $0x580] sm:$0xff]  ;;  %v277_v21 = vld [vmem:[%s4356_s1 + $0x770] sm:$0xff]  ;;  %v294_v22 = vld [vmem:[%s4356_s1 + $0x7f8] sm:$0xff] }
  0x5f   :  { %1109 = vmatpush.msra.mxu2 %v202_v1  ;;  %1128 = vmatpush.msra.mxu3 %v219_v2  ;;  %v244_v23 = vld [vmem:[%s4356_s1 + $0x668] sm:$0xff]  ;;  %v261_v24 = vld [vmem:[%s4356_s1 + $0x6f0] sm:$0xff]  ;;  %v243_v28 = vld [vmem:[%s4356_s1 + $0x660] sm:$0xff] }
  0x60   :  { %1070 = vmatpush.msra.mxu0 %v169_v3  ;;  %1089 = vmatpush.msra.mxu1 %v186_v4  ;;  %v2675_v29 = vld.sshfl [vmem:[#allocation1 + $0x20] sm:$0xff pattern:$0x73625140]  ;;  %v2677_v31 = vld.sshfl [vmem:[#allocation1 + $0x30] sm:$0xff pattern:$0x73625140] }
  0x61   :  { %1110 = vmatpush.msra.mxu2 %v201_v5  ;;  %1129 = vmatpush.msra.mxu3 %v218_v6  ;;  %v2679_v32 = vld.sshfl [vmem:[#allocation1 + $0x28] sm:$0xff pattern:$0x73625140]  ;;  %v2687_v33 = vld.sshfl [vmem:[#allocation1 + $0x38] sm:$0xff pattern:$0x73625140] }
  0x62   :  { %1071 = vmatpush.msra.mxu0 %v168_v7  ;;  %1090 = vmatpush.msra.mxu1 %v185_v8  ;;  %v275_v34 = vld [vmem:[%s4356_s1 + $0x760] sm:$0xff]  ;;  %v292_v35 = vld [vmem:[%s4356_s1 + $0x7e8] sm:$0xff]  ;;  %v242_v36 = vld [vmem:[%s4356_s1 + $0x658] sm:$0xff] }
  0x63   :  { %1111 = vmatpush.msra.mxu2 %v200_v9  ;;  %1130 = vmatpush.msra.mxu3 %v217_v10  ;;  %v259_v37 = vld [vmem:[%s4356_s1 + $0x6e0] sm:$0xff]  ;;  %v274_v38 = vld [vmem:[%s4356_s1 + $0x758] sm:$0xff]  ;;  %v241_v40 = vld [vmem:[%s4356_s1 + $0x650] sm:$0xff] }
  0x64   :  { %1072 = vmatpush.msra.mxu0 %v167_v11  ;;  %1091 = vmatpush.msra.mxu1 %v184_v12  ;;  %v291_v39 = vld [vmem:[%s4356_s1 + $0x7e0] sm:$0xff]  ;;  %v258_v41 = vld [vmem:[%s4356_s1 + $0x6d8] sm:$0xff]  ;;  %v273_v42 = vld [vmem:[%s4356_s1 + $0x750] sm:$0xff] }
  0x65   :  { %1112 = vmatpush.msra.mxu2 %v199_v13  ;;  %1131 = vmatpush.msra.mxu3 %v216_v14  ;;  %v290_v43 = vld [vmem:[%s4356_s1 + $0x7d8] sm:$0xff]  ;;  %v240_v44 = vld [vmem:[%s4356_s1 + $0x648] sm:$0xff]  ;;  %v257_v45 = vld [vmem:[%s4356_s1 + $0x6d0] sm:$0xff] }
  0x66   :  { %1073 = vmatmul.f32.vlgmr.msra.gmra.mxu0 %v2470_v25  ;;  %1113 = vmatmul.f32.vlgmr.msra.gmra.mxu2 %v2472_v26  ;;  %v276_v25 = vld [vmem:[%s4356_s1 + $0x768] sm:$0xff]  ;;  %v293_v26 = vld [vmem:[%s4356_s1 + $0x7f0] sm:$0xff]  ;;  %v239_v48 = vld [vmem:[%s4356_s1 + $0x640] sm:$0xff] }
  0x67   :  { %1137 = vmatpush.msrb.mxu0 %v246_v15  ;;  %1177 = vmatpush.msrb.mxu2 %v278_v16  ;;  %v272_v46 = vld [vmem:[%s4356_s1 + $0x748] sm:$0xff]  ;;  %v289_v47 = vld [vmem:[%s4356_s1 + $0x7d0] sm:$0xff]  ;;  %v271_v50 = vld [vmem:[%s4356_s1 + $0x740] sm:$0xff] }
  0x68   :  { %1092 = vmatpush.msra.mxu1 %v183_v17  ;;  %1132 = vmatpush.msra.mxu3 %v215_v18  ;;  %v256_v49 = vld [vmem:[%s4356_s1 + $0x6c8] sm:$0xff]  ;;  %v238_v52 = vld [vmem:[%s4356_s1 + $0x638] sm:$0xff]  ;;  %v255_v53 = vld [vmem:[%s4356_s1 + $0x6c0] sm:$0xff] }
  0x69   :  { %1093 = vmatmul.f32.vlgmr.msra.gmra.mxu1 %v2474_v27  ;;  %1133 = vmatmul.f32.vlgmr.msra.gmra.mxu3 %v2482_v30  ;;  %v260_v27 = vld [vmem:[%s4356_s1 + $0x6e8] sm:$0xff]  ;;  %v270_v54 = vld [vmem:[%s4356_s1 + $0x738] sm:$0xff]  ;;  %v287_v55 = vld [vmem:[%s4356_s1 + $0x7c0] sm:$0xff] }
  0x6a   :  { %1138 = vmatpush.msrb.mxu0 %v245_v19  ;;  %1157 = vmatpush.msrb.mxu1 %v262_v20  ;;  %v32_v30 = vld [vmem:[%s4355_s0 + $0x28] sm:$0xff]  ;;  %v237_v56 = vld [vmem:[%s4356_s1 + $0x630] sm:$0xff]  ;;  %v254_v57 = vld [vmem:[%s4356_s1 + $0x6b8] sm:$0xff] }
  0x6b   :  { %1178 = vmatpush.msrb.mxu2 %v277_v21  ;;  %1197 = vmatpush.msrb.mxu3 %v294_v22  ;;  %812 = vst [vmem:[#allocation1 + $0x20] ss:$4 sm:$0xff] %v32_v30  ;;  %v288_v51 = vld [vmem:[%s4356_s1 + $0x7c8] sm:$0xff]  ;;  %v269_v58 = vld [vmem:[%s4356_s1 + $0x730] sm:$0xff]  ;;  %v286_v59 = vld [vmem:[%s4356_s1 + $0x7b8] sm:$0xff] }
  0x6c   :  { %1139 = vmatpush.msrb.mxu0 %v244_v23  ;;  %1158 = vmatpush.msrb.mxu1 %v261_v24  ;;  %v236_v60 = vld [vmem:[%s4356_s1 + $0x628] sm:$0xff]  ;;  %v253_v61 = vld [vmem:[%s4356_s1 + $0x6b0] sm:$0xff]  ;;  %v235_v0 = vld [vmem:[%s4356_s1 + $0x620] sm:$0xff] }
  0x6d   :  { %1179 = vmatpush.msrb.mxu2 %v276_v25  ;;  %1198 = vmatpush.msrb.mxu3 %v293_v26  ;;  %v268_v62 = vld [vmem:[%s4356_s1 + $0x728] sm:$0xff]  ;;  %v285_v63 = vld [vmem:[%s4356_s1 + $0x7b0] sm:$0xff]  ;;  %v267_v2 = vld [vmem:[%s4356_s1 + $0x720] sm:$0xff] }
  0x6e   :  { %1140 = vmatpush.msrb.mxu0 %v243_v28  ;;  %1159 = vmatpush.msrb.mxu1 %v260_v27  ;;  %v252_v1 = vld [vmem:[%s4356_s1 + $0x6a8] sm:$0xff]  ;;  %v234_v4 = vld [vmem:[%s4356_s1 + $0x618] sm:$0xff]  ;;  %v251_v5 = vld [vmem:[%s4356_s1 + $0x6a0] sm:$0xff] }
  0x6f   :  { %1180 = vmatpush.msrb.mxu2 %v275_v34  ;;  %1199 = vmatpush.msrb.mxu3 %v292_v35  ;;  %v284_v3 = vld [vmem:[%s4356_s1 + $0x7a8] sm:$0xff]  ;;  %v266_v6 = vld [vmem:[%s4356_s1 + $0x718] sm:$0xff]  ;;  %v283_v7 = vld [vmem:[%s4356_s1 + $0x7a0] sm:$0xff] }
  0x70   :  { %1141 = vmatpush.msrb.mxu0 %v242_v36  ;;  %1160 = vmatpush.msrb.mxu1 %v259_v37  ;;  %v233_v8 = vld [vmem:[%s4356_s1 + $0x610] sm:$0xff]  ;;  %v250_v9 = vld [vmem:[%s4356_s1 + $0x698] sm:$0xff]  ;;  %v232_v12 = vld [vmem:[%s4356_s1 + $0x608] sm:$0xff] }
  0x71   :  { %1181 = vmatpush.msrb.mxu2 %v274_v38  ;;  %1200 = vmatpush.msrb.mxu3 %v291_v39  ;;  %v265_v10 = vld [vmem:[%s4356_s1 + $0x710] sm:$0xff]  ;;  %v282_v11 = vld [vmem:[%s4356_s1 + $0x798] sm:$0xff]  ;;  %v264_v14 = vld [vmem:[%s4356_s1 + $0x708] sm:$0xff] }
  0x72   :  { %1142 = vmatpush.msrb.mxu0 %v241_v40  ;;  %1161 = vmatpush.msrb.mxu1 %v258_v41  ;;  %v249_v13 = vld [vmem:[%s4356_s1 + $0x690] sm:$0xff]  ;;  %v231_v16 = vld [vmem:[%s4356_s1 + $0x600] sm:$0xff]  ;;  %v248_v17 = vld [vmem:[%s4356_s1 + $0x688] sm:$0xff] }
  0x73   :  { %1182 = vmatpush.msrb.mxu2 %v273_v42  ;;  %1201 = vmatpush.msrb.mxu3 %v290_v43  ;;  %v281_v15 = vld [vmem:[%s4356_s1 + $0x790] sm:$0xff]  ;;  %v263_v18 = vld [vmem:[%s4356_s1 + $0x700] sm:$0xff]  ;;  %v280_v19 = vld [vmem:[%s4356_s1 + $0x788] sm:$0xff] }
  0x74   :  { %1143 = vmatpush.msrb.mxu0 %v240_v44  ;;  %1162 = vmatpush.msrb.mxu1 %v257_v45  ;;  %v310_v20 = vld [vmem:[%s4356_s1 + $0x878] sm:$0xff]  ;;  %v247_v22 = vld [vmem:[%s4356_s1 + $0x680] sm:$0xff]  ;;  %v309_v24 = vld [vmem:[%s4356_s1 + $0x870] sm:$0xff] }
  0x75   :  { %1183 = vmatpush.msrb.mxu2 %v272_v46  ;;  %1202 = vmatpush.msrb.mxu3 %v289_v47  ;;  %v342_v21 = vld [vmem:[%s4356_s1 + $0x978] sm:$0xff]  ;;  %v279_v23 = vld [vmem:[%s4356_s1 + $0x780] sm:$0xff]  ;;  %v341_v26 = vld [vmem:[%s4356_s1 + $0x970] sm:$0xff] }
  0x76   :  { %1144 = vmatpush.msrb.mxu0 %v239_v48  ;;  %1163 = vmatpush.msrb.mxu1 %v256_v49  ;;  %v326_v25 = vld [vmem:[%s4356_s1 + $0x8f8] sm:$0xff]  ;;  %v340_v27 = vld [vmem:[%s4356_s1 + $0x968] sm:$0xff]  ;;  %v307_v30 = vld [vmem:[%s4356_s1 + $0x860] sm:$0xff] }
  0x77   :  { %1184 = vmatpush.msrb.mxu2 %v271_v50  ;;  %1203 = vmatpush.msrb.mxu3 %v288_v51  ;;  %v358_v28 = vld [vmem:[%s4356_s1 + $0x9f8] sm:$0xff]  ;;  %v339_v34 = vld [vmem:[%s4356_s1 + $0x960] sm:$0xff]  ;;  %v356_v35 = vld [vmem:[%s4356_s1 + $0x9e8] sm:$0xff] }
  0x78   :  { %1145 = vmatpush.msrb.mxu0 %v238_v52  ;;  %1164 = vmatpush.msrb.mxu1 %v255_v53  ;;  %v306_v36 = vld [vmem:[%s4356_s1 + $0x858] sm:$0xff]  ;;  %v323_v37 = vld [vmem:[%s4356_s1 + $0x8e0] sm:$0xff]  ;;  %v305_v40 = vld [vmem:[%s4356_s1 + $0x850] sm:$0xff] }
  0x79   :  { %1185 = vmatpush.msrb.mxu2 %v270_v54  ;;  %1204 = vmatpush.msrb.mxu3 %v287_v55  ;;  %v338_v38 = vld [vmem:[%s4356_s1 + $0x958] sm:$0xff]  ;;  %v355_v39 = vld [vmem:[%s4356_s1 + $0x9e0] sm:$0xff]  ;;  %v337_v42 = vld [vmem:[%s4356_s1 + $0x950] sm:$0xff] }
  0x7a   :  { %1146 = vmatpush.msrb.mxu0 %v237_v56  ;;  %1165 = vmatpush.msrb.mxu1 %v254_v57  ;;  %v322_v41 = vld [vmem:[%s4356_s1 + $0x8d8] sm:$0xff]  ;;  %v304_v44 = vld [vmem:[%s4356_s1 + $0x848] sm:$0xff]  ;;  %v321_v45 = vld [vmem:[%s4356_s1 + $0x8d0] sm:$0xff] }
  0x7b   :  { %1186 = vmatpush.msrb.mxu2 %v269_v58  ;;  %1205 = vmatpush.msrb.mxu3 %v286_v59  ;;  %v354_v43 = vld [vmem:[%s4356_s1 + $0x9d8] sm:$0xff]  ;;  %v336_v46 = vld [vmem:[%s4356_s1 + $0x948] sm:$0xff]  ;;  %v353_v47 = vld [vmem:[%s4356_s1 + $0x9d0] sm:$0xff] }
  0x7c   :  { %1147 = vmatpush.msrb.mxu0 %v236_v60  ;;  %1166 = vmatpush.msrb.mxu1 %v253_v61  ;;  %v303_v48 = vld [vmem:[%s4356_s1 + $0x840] sm:$0xff]  ;;  %v320_v49 = vld [vmem:[%s4356_s1 + $0x8c8] sm:$0xff]  ;;  %v302_v52 = vld [vmem:[%s4356_s1 + $0x838] sm:$0xff] }
  0x7d   :  { %1187 = vmatpush.msrb.mxu2 %v268_v62  ;;  %1206 = vmatpush.msrb.mxu3 %v285_v63  ;;  %v335_v50 = vld [vmem:[%s4356_s1 + $0x940] sm:$0xff]  ;;  %v352_v51 = vld [vmem:[%s4356_s1 + $0x9c8] sm:$0xff]  ;;  %v334_v54 = vld [vmem:[%s4356_s1 + $0x938] sm:$0xff] }
  0x7e   :  { %1148 = vmatpush.msrb.mxu0 %v235_v0  ;;  %1167 = vmatpush.msrb.mxu1 %v252_v1  ;;  %v319_v53 = vld [vmem:[%s4356_s1 + $0x8c0] sm:$0xff]  ;;  %v301_v56 = vld [vmem:[%s4356_s1 + $0x830] sm:$0xff]  ;;  %v318_v57 = vld [vmem:[%s4356_s1 + $0x8b8] sm:$0xff] }
  0x7f   :  { %1188 = vmatpush.msrb.mxu2 %v267_v2  ;;  %1207 = vmatpush.msrb.mxu3 %v284_v3  ;;  %v351_v55 = vld [vmem:[%s4356_s1 + $0x9c0] sm:$0xff]  ;;  %v333_v58 = vld [vmem:[%s4356_s1 + $0x930] sm:$0xff]  ;;  %v350_v59 = vld [vmem:[%s4356_s1 + $0x9b8] sm:$0xff] }
  0x80   :  { %1149 = vmatpush.msrb.mxu0 %v234_v4  ;;  %1168 = vmatpush.msrb.mxu1 %v251_v5  ;;  %v300_v60 = vld [vmem:[%s4356_s1 + $0x828] sm:$0xff]  ;;  %v317_v61 = vld [vmem:[%s4356_s1 + $0x8b0] sm:$0xff]  ;;  %v299_v0 = vld [vmem:[%s4356_s1 + $0x820] sm:$0xff] }
  0x81   :  { %1189 = vmatpush.msrb.mxu2 %v266_v6  ;;  %1208 = vmatpush.msrb.mxu3 %v283_v7  ;;  %v332_v62 = vld [vmem:[%s4356_s1 + $0x928] sm:$0xff]  ;;  %v349_v63 = vld [vmem:[%s4356_s1 + $0x9b0] sm:$0xff]  ;;  %v331_v2 = vld [vmem:[%s4356_s1 + $0x920] sm:$0xff] }
  0x82   :  { %1150 = vmatpush.msrb.mxu0 %v233_v8  ;;  %1169 = vmatpush.msrb.mxu1 %v250_v9  ;;  %v316_v1 = vld [vmem:[%s4356_s1 + $0x8a8] sm:$0xff]  ;;  %v298_v4 = vld [vmem:[%s4356_s1 + $0x818] sm:$0xff]  ;;  %v315_v5 = vld [vmem:[%s4356_s1 + $0x8a0] sm:$0xff] }
  0x83   :  { %1190 = vmatpush.msrb.mxu2 %v265_v10  ;;  %1209 = vmatpush.msrb.mxu3 %v282_v11  ;;  %v348_v3 = vld [vmem:[%s4356_s1 + $0x9a8] sm:$0xff]  ;;  %v330_v6 = vld [vmem:[%s4356_s1 + $0x918] sm:$0xff]  ;;  %v347_v7 = vld [vmem:[%s4356_s1 + $0x9a0] sm:$0xff] }
  0x84   :  { %1151 = vmatpush.msrb.mxu0 %v232_v12  ;;  %1170 = vmatpush.msrb.mxu1 %v249_v13  ;;  %v297_v8 = vld [vmem:[%s4356_s1 + $0x810] sm:$0xff]  ;;  %v314_v9 = vld [vmem:[%s4356_s1 + $0x898] sm:$0xff]  ;;  %v296_v12 = vld [vmem:[%s4356_s1 + $0x808] sm:$0xff] }
  0x85   :  { %1191 = vmatpush.msrb.mxu2 %v264_v14  ;;  %1210 = vmatpush.msrb.mxu3 %v281_v15  ;;  %v329_v10 = vld [vmem:[%s4356_s1 + $0x910] sm:$0xff]  ;;  %v346_v11 = vld [vmem:[%s4356_s1 + $0x998] sm:$0xff]  ;;  %v328_v14 = vld [vmem:[%s4356_s1 + $0x908] sm:$0xff] }
  0x86   :  { %1152 = vmatpush.msrb.mxu0 %v231_v16  ;;  %1171 = vmatpush.msrb.mxu1 %v248_v17  ;;  %v313_v13 = vld [vmem:[%s4356_s1 + $0x890] sm:$0xff]  ;;  %v295_v16 = vld [vmem:[%s4356_s1 + $0x800] sm:$0xff]  ;;  %v312_v17 = vld [vmem:[%s4356_s1 + $0x888] sm:$0xff] }
  0x87   :  { %1192 = vmatpush.msrb.mxu2 %v263_v18  ;;  %1211 = vmatpush.msrb.mxu3 %v280_v19  ;;  %v345_v15 = vld [vmem:[%s4356_s1 + $0x990] sm:$0xff]  ;;  %v327_v18 = vld [vmem:[%s4356_s1 + $0x900] sm:$0xff]  ;;  %v344_v19 = vld [vmem:[%s4356_s1 + $0x988] sm:$0xff] }
  0x88   :  { %1153 = vmatmul.f32.vlgmr.msrb.gmra.mxu0 %v2675_v29  ;;  %1193 = vmatmul.f32.vlgmr.msrb.gmra.mxu2 %v2677_v31  ;;  %v308_v29 = vld [vmem:[%s4356_s1 + $0x868] sm:$0xff]  ;;  %v325_v31 = vld [vmem:[%s4356_s1 + $0x8f0] sm:$0xff] }
  0x89   :  { %1217 = vmatpush.msra.mxu0 %v310_v20  ;;  %1257 = vmatpush.msra.mxu2 %v342_v21  ;;  %v813_v20 = vld.sshfl [vmem:[#allocation1] sm:$0xff pattern:$0x73625140]  ;;  %v815_v21 = vld.sshfl [vmem:[#allocation1 + $0x10] sm:$0xff pattern:$0x73625140] }
  0x8a   :  { %1172 = vmatpush.msrb.mxu1 %v247_v22  ;;  %1212 = vmatpush.msrb.mxu3 %v279_v23  ;;  %v374_v22 = vld [vmem:[%s4356_s1 + $0xa78] sm:$0xff] }
  0x8b   :  { %1173 = vmatmul.f32.vlgmr.msrb.gmra.mxu1 %v2679_v32  ;;  %1213 = vmatmul.f32.vlgmr.msrb.gmra.mxu3 %v2687_v33  ;;  %v357_v32 = vld [vmem:[%s4356_s1 + $0x9f0] sm:$0xff]  ;;  %v324_v33 = vld [vmem:[%s4356_s1 + $0x8e8] sm:$0xff]  ;;  %v406_v23 = vld [vmem:[%s4356_s1 + $0xb78] sm:$0xff] }
  0x8c   :  { %1218 = vmatpush.msra.mxu0 %v309_v24  ;;  %1237 = vmatpush.msra.mxu1 %v326_v25  ;;  %v311_v24 = vld [vmem:[%s4356_s1 + $0x880] sm:$0xff] }
  0x8d   :  { %1258 = vmatpush.msra.mxu2 %v341_v26  ;;  %1277 = vmatpush.msra.mxu3 %v358_v28  ;;  %v343_v25 = vld [vmem:[%s4356_s1 + $0x980] sm:$0xff]  ;;  %v814_v26 = vld.sshfl [vmem:[#allocation1 + $0x8] sm:$0xff pattern:$0x73625140] }
  0x8e   :  { %1219 = vmatpush.msra.mxu0 %v308_v29  ;;  %1238 = vmatpush.msra.mxu1 %v325_v31  ;;  %v816_v28 = vld.sshfl [vmem:[#allocation1 + $0x18] sm:$0xff pattern:$0x73625140]  ;;  %v373_v29 = vld [vmem:[%s4356_s1 + $0xa70] sm:$0xff] }
  0x8f   :  { %1259 = vmatpush.msra.mxu2 %v340_v27  ;;  %1278 = vmatpush.msra.mxu3 %v357_v32  ;;  %v390_v31 = vld [vmem:[%s4356_s1 + $0xaf8] sm:$0xff]  ;;  %v405_v27 = vld [vmem:[%s4356_s1 + $0xb70] sm:$0xff] }
  0x90   :  { %1220 = vmatpush.msra.mxu0 %v307_v30  ;;  %1239 = vmatpush.msra.mxu1 %v324_v33  ;;  %v422_v32 = vld [vmem:[%s4356_s1 + $0xbf8] sm:$0xff]  ;;  %v372_v30 = vld [vmem:[%s4356_s1 + $0xa68] sm:$0xff]  ;;  %v389_v33 = vld [vmem:[%s4356_s1 + $0xaf0] sm:$0xff] }
  0x91   :  { %1260 = vmatpush.msra.mxu2 %v339_v34  ;;  %1279 = vmatpush.msra.mxu3 %v356_v35  ;;  %v404_v34 = vld [vmem:[%s4356_s1 + $0xb68] sm:$0xff]  ;;  %v421_v35 = vld [vmem:[%s4356_s1 + $0xbf0] sm:$0xff] }
  0x92   :  { %1221 = vmatpush.msra.mxu0 %v306_v36  ;;  %1240 = vmatpush.msra.mxu1 %v323_v37  ;;  %v371_v36 = vld [vmem:[%s4356_s1 + $0xa60] sm:$0xff]  ;;  %v388_v37 = vld [vmem:[%s4356_s1 + $0xae8] sm:$0xff] }
  0x93   :  { %1261 = vmatpush.msra.mxu2 %v338_v38  ;;  %1280 = vmatpush.msra.mxu3 %v355_v39  ;;  %v403_v38 = vld [vmem:[%s4356_s1 + $0xb60] sm:$0xff]  ;;  %v420_v39 = vld [vmem:[%s4356_s1 + $0xbe8] sm:$0xff] }
  0x94   :  { %1222 = vmatpush.msra.mxu0 %v305_v40  ;;  %1241 = vmatpush.msra.mxu1 %v322_v41  ;;  %v370_v40 = vld [vmem:[%s4356_s1 + $0xa58] sm:$0xff]  ;;  %v387_v41 = vld [vmem:[%s4356_s1 + $0xae0] sm:$0xff] }
  0x95   :  { %1262 = vmatpush.msra.mxu2 %v337_v42  ;;  %1281 = vmatpush.msra.mxu3 %v354_v43  ;;  %v402_v42 = vld [vmem:[%s4356_s1 + $0xb58] sm:$0xff]  ;;  %v419_v43 = vld [vmem:[%s4356_s1 + $0xbe0] sm:$0xff] }
  0x96   :  { %1223 = vmatpush.msra.mxu0 %v304_v44  ;;  %1242 = vmatpush.msra.mxu1 %v321_v45  ;;  %v369_v44 = vld [vmem:[%s4356_s1 + $0xa50] sm:$0xff]  ;;  %v386_v45 = vld [vmem:[%s4356_s1 + $0xad8] sm:$0xff] }
  0x97   :  { %1263 = vmatpush.msra.mxu2 %v336_v46  ;;  %1282 = vmatpush.msra.mxu3 %v353_v47  ;;  %v401_v46 = vld [vmem:[%s4356_s1 + $0xb50] sm:$0xff]  ;;  %v418_v47 = vld [vmem:[%s4356_s1 + $0xbd8] sm:$0xff] }
  0x98   :  { %1224 = vmatpush.msra.mxu0 %v303_v48  ;;  %1243 = vmatpush.msra.mxu1 %v320_v49  ;;  %v368_v48 = vld [vmem:[%s4356_s1 + $0xa48] sm:$0xff]  ;;  %v385_v49 = vld [vmem:[%s4356_s1 + $0xad0] sm:$0xff] }
  0x99   :  { %1264 = vmatpush.msra.mxu2 %v335_v50  ;;  %1283 = vmatpush.msra.mxu3 %v352_v51  ;;  %v400_v50 = vld [vmem:[%s4356_s1 + $0xb48] sm:$0xff]  ;;  %v417_v51 = vld [vmem:[%s4356_s1 + $0xbd0] sm:$0xff] }
  0x9a   :  { %1225 = vmatpush.msra.mxu0 %v302_v52  ;;  %1244 = vmatpush.msra.mxu1 %v319_v53  ;;  %v367_v52 = vld [vmem:[%s4356_s1 + $0xa40] sm:$0xff]  ;;  %v384_v53 = vld [vmem:[%s4356_s1 + $0xac8] sm:$0xff] }
  0x9b   :  { %1265 = vmatpush.msra.mxu2 %v334_v54  ;;  %1284 = vmatpush.msra.mxu3 %v351_v55  ;;  %v399_v54 = vld [vmem:[%s4356_s1 + $0xb40] sm:$0xff]  ;;  %v416_v55 = vld [vmem:[%s4356_s1 + $0xbc8] sm:$0xff] }
  0x9c   :  { %1226 = vmatpush.msra.mxu0 %v301_v56  ;;  %1245 = vmatpush.msra.mxu1 %v318_v57  ;;  %v366_v56 = vld [vmem:[%s4356_s1 + $0xa38] sm:$0xff]  ;;  %v383_v57 = vld [vmem:[%s4356_s1 + $0xac0] sm:$0xff] }
  0x9d   :  { %1266 = vmatpush.msra.mxu2 %v333_v58  ;;  %1285 = vmatpush.msra.mxu3 %v350_v59  ;;  %v398_v58 = vld [vmem:[%s4356_s1 + $0xb38] sm:$0xff]  ;;  %v415_v59 = vld [vmem:[%s4356_s1 + $0xbc0] sm:$0xff] }
  0x9e   :  { %1227 = vmatpush.msra.mxu0 %v300_v60  ;;  %1246 = vmatpush.msra.mxu1 %v317_v61  ;;  %v365_v60 = vld [vmem:[%s4356_s1 + $0xa30] sm:$0xff]  ;;  %v382_v61 = vld [vmem:[%s4356_s1 + $0xab8] sm:$0xff] }
  0x9f   :  { %1267 = vmatpush.msra.mxu2 %v332_v62  ;;  %1286 = vmatpush.msra.mxu3 %v349_v63  ;;  %v397_v62 = vld [vmem:[%s4356_s1 + $0xb30] sm:$0xff]  ;;  %v414_v63 = vld [vmem:[%s4356_s1 + $0xbb8] sm:$0xff] }
  0xa0   :  { %1228 = vmatpush.msra.mxu0 %v299_v0  ;;  %1247 = vmatpush.msra.mxu1 %v316_v1  ;;  %v364_v0 = vld [vmem:[%s4356_s1 + $0xa28] sm:$0xff]  ;;  %v381_v1 = vld [vmem:[%s4356_s1 + $0xab0] sm:$0xff] }
  0xa1   :  { %1268 = vmatpush.msra.mxu2 %v331_v2  ;;  %1287 = vmatpush.msra.mxu3 %v348_v3  ;;  %v396_v2 = vld [vmem:[%s4356_s1 + $0xb28] sm:$0xff]  ;;  %v413_v3 = vld [vmem:[%s4356_s1 + $0xbb0] sm:$0xff] }
  0xa2   :  { %1229 = vmatpush.msra.mxu0 %v298_v4  ;;  %1248 = vmatpush.msra.mxu1 %v315_v5  ;;  %v363_v4 = vld [vmem:[%s4356_s1 + $0xa20] sm:$0xff]  ;;  %v380_v5 = vld [vmem:[%s4356_s1 + $0xaa8] sm:$0xff] }
  0xa3   :  { %1269 = vmatpush.msra.mxu2 %v330_v6  ;;  %1288 = vmatpush.msra.mxu3 %v347_v7  ;;  %v395_v6 = vld [vmem:[%s4356_s1 + $0xb20] sm:$0xff]  ;;  %v412_v7 = vld [vmem:[%s4356_s1 + $0xba8] sm:$0xff] }
  0xa4   :  { %1230 = vmatpush.msra.mxu0 %v297_v8  ;;  %1249 = vmatpush.msra.mxu1 %v314_v9  ;;  %v362_v8 = vld [vmem:[%s4356_s1 + $0xa18] sm:$0xff]  ;;  %v379_v9 = vld [vmem:[%s4356_s1 + $0xaa0] sm:$0xff] }
  0xa5   :  { %1270 = vmatpush.msra.mxu2 %v329_v10  ;;  %1289 = vmatpush.msra.mxu3 %v346_v11  ;;  %v394_v10 = vld [vmem:[%s4356_s1 + $0xb18] sm:$0xff]  ;;  %v411_v11 = vld [vmem:[%s4356_s1 + $0xba0] sm:$0xff] }
  0xa6   :  { %1231 = vmatpush.msra.mxu0 %v296_v12  ;;  %1250 = vmatpush.msra.mxu1 %v313_v13  ;;  %v361_v12 = vld [vmem:[%s4356_s1 + $0xa10] sm:$0xff]  ;;  %v378_v13 = vld [vmem:[%s4356_s1 + $0xa98] sm:$0xff] }
  0xa7   :  { %1271 = vmatpush.msra.mxu2 %v328_v14  ;;  %1290 = vmatpush.msra.mxu3 %v345_v15  ;;  %v393_v14 = vld [vmem:[%s4356_s1 + $0xb10] sm:$0xff]  ;;  %v410_v15 = vld [vmem:[%s4356_s1 + $0xb98] sm:$0xff] }
  0xa8   :  { %1232 = vmatpush.msra.mxu0 %v295_v16  ;;  %1251 = vmatpush.msra.mxu1 %v312_v17  ;;  %v360_v16 = vld [vmem:[%s4356_s1 + $0xa08] sm:$0xff]  ;;  %v377_v17 = vld [vmem:[%s4356_s1 + $0xa90] sm:$0xff] }
  0xa9   :  { %1272 = vmatpush.msra.mxu2 %v327_v18  ;;  %1291 = vmatpush.msra.mxu3 %v344_v19  ;;  %v33_v18 = vld [vmem:[%s4355_s0 + $0x30] sm:$0xff]  ;;  %v392_v19 = vld [vmem:[%s4356_s1 + $0xb08] sm:$0xff] }
  0xaa   :  { %1233 = vmatmul.f32.vlgmr.msra.gmra.mxu0 %v813_v20  ;;  %1273 = vmatmul.f32.vlgmr.msra.gmra.mxu2 %v815_v21  ;;  %v409_v20 = vld [vmem:[%s4356_s1 + $0xb90] sm:$0xff]  ;;  %821 = vst [vmem:[#allocation1] ss:$4 sm:$0xff] %v33_v18  ;;  %v359_v21 = vld [vmem:[%s4356_s1 + $0xa00] sm:$0xff]  ;;  %v442_v18 = vld [vmem:[%s4356_s1 + $0xc98] sm:$0xff] }
  0xab   :  { %1297 = vmatpush.msrb.mxu0 %v374_v22  ;;  %1337 = vmatpush.msrb.mxu2 %v406_v23  ;;  %v376_v22 = vld [vmem:[%s4356_s1 + $0xa88] sm:$0xff]  ;;  %v391_v23 = vld [vmem:[%s4356_s1 + $0xb00] sm:$0xff] }
  0xac   :  { %1252 = vmatpush.msra.mxu1 %v311_v24  ;;  %1292 = vmatpush.msra.mxu3 %v343_v25  ;;  %v408_v24 = vld [vmem:[%s4356_s1 + $0xb88] sm:$0xff]  ;;  %v817_v25 = vld.sshfl [vmem:[#allocation1 + $0x20] sm:$0xff pattern:$0x73625140] }
  0xad   :  { %1253 = vmatmul.f32.vlgmr.msra.gmra.mxu1 %v814_v26  ;;  %1293 = vmatmul.f32.vlgmr.msra.gmra.mxu3 %v816_v28  ;;  %v819_v26 = vld.sshfl [vmem:[#allocation1 + $0x30] sm:$0xff pattern:$0x73625140]  ;;  %v438_v28 = vld [vmem:[%s4356_s1 + $0xc78] sm:$0xff] }
  0xae   :  { %1298 = vmatpush.msrb.mxu0 %v373_v29  ;;  %1317 = vmatpush.msrb.mxu1 %v390_v31  ;;  %v470_v29 = vld [vmem:[%s4356_s1 + $0xd78] sm:$0xff]  ;;  %v375_v31 = vld [vmem:[%s4356_s1 + $0xa80] sm:$0xff] }
  0xaf   :  { %1338 = vmatpush.msrb.mxu2 %v405_v27  ;;  %1357 = vmatpush.msrb.mxu3 %v422_v32  ;;  %v407_v27 = vld [vmem:[%s4356_s1 + $0xb80] sm:$0xff]  ;;  %v818_v32 = vld.sshfl [vmem:[#allocation1 + $0x28] sm:$0xff pattern:$0x73625140] }
  0xb0   :  { %1299 = vmatpush.msrb.mxu0 %v372_v30  ;;  %1318 = vmatpush.msrb.mxu1 %v389_v33  ;;  %v820_v30 = vld.sshfl [vmem:[#allocation1 + $0x38] sm:$0xff pattern:$0x73625140]  ;;  %v437_v33 = vld [vmem:[%s4356_s1 + $0xc70] sm:$0xff] }
  0xb1   :  { %1339 = vmatpush.msrb.mxu2 %v404_v34  ;;  %1358 = vmatpush.msrb.mxu3 %v421_v35  ;;  %v454_v34 = vld [vmem:[%s4356_s1 + $0xcf8] sm:$0xff]  ;;  %v469_v35 = vld [vmem:[%s4356_s1 + $0xd70] sm:$0xff] }
  0xb2   :  { %1300 = vmatpush.msrb.mxu0 %v371_v36  ;;  %1319 = vmatpush.msrb.mxu1 %v388_v37  ;;  %v486_v36 = vld [vmem:[%s4356_s1 + $0xdf8] sm:$0xff]  ;;  %v436_v37 = vld [vmem:[%s4356_s1 + $0xc68] sm:$0xff] }
  0xb3   :  { %1340 = vmatpush.msrb.mxu2 %v403_v38  ;;  %1359 = vmatpush.msrb.mxu3 %v420_v39  ;;  %v453_v38 = vld [vmem:[%s4356_s1 + $0xcf0] sm:$0xff]  ;;  %v468_v39 = vld [vmem:[%s4356_s1 + $0xd68] sm:$0xff] }
  0xb4   :  { %1301 = vmatpush.msrb.mxu0 %v370_v40  ;;  %1320 = vmatpush.msrb.mxu1 %v387_v41  ;;  %v485_v40 = vld [vmem:[%s4356_s1 + $0xdf0] sm:$0xff]  ;;  %v435_v41 = vld [vmem:[%s4356_s1 + $0xc60] sm:$0xff] }
  0xb5   :  { %1341 = vmatpush.msrb.mxu2 %v402_v42  ;;  %1360 = vmatpush.msrb.mxu3 %v419_v43  ;;  %v452_v42 = vld [vmem:[%s4356_s1 + $0xce8] sm:$0xff]  ;;  %v467_v43 = vld [vmem:[%s4356_s1 + $0xd60] sm:$0xff] }
  0xb6   :  { %1302 = vmatpush.msrb.mxu0 %v369_v44  ;;  %1321 = vmatpush.msrb.mxu1 %v386_v45  ;;  %v484_v44 = vld [vmem:[%s4356_s1 + $0xde8] sm:$0xff]  ;;  %v434_v45 = vld [vmem:[%s4356_s1 + $0xc58] sm:$0xff] }
  0xb7   :  { %1342 = vmatpush.msrb.mxu2 %v401_v46  ;;  %1361 = vmatpush.msrb.mxu3 %v418_v47  ;;  %v451_v46 = vld [vmem:[%s4356_s1 + $0xce0] sm:$0xff]  ;;  %v466_v47 = vld [vmem:[%s4356_s1 + $0xd58] sm:$0xff] }
  0xb8   :  { %1303 = vmatpush.msrb.mxu0 %v368_v48  ;;  %1322 = vmatpush.msrb.mxu1 %v385_v49  ;;  %v483_v48 = vld [vmem:[%s4356_s1 + $0xde0] sm:$0xff]  ;;  %v433_v49 = vld [vmem:[%s4356_s1 + $0xc50] sm:$0xff] }
  0xb9   :  { %1343 = vmatpush.msrb.mxu2 %v400_v50  ;;  %1362 = vmatpush.msrb.mxu3 %v417_v51  ;;  %v450_v50 = vld [vmem:[%s4356_s1 + $0xcd8] sm:$0xff]  ;;  %v465_v51 = vld [vmem:[%s4356_s1 + $0xd50] sm:$0xff] }
  0xba   :  { %1304 = vmatpush.msrb.mxu0 %v367_v52  ;;  %1323 = vmatpush.msrb.mxu1 %v384_v53  ;;  %v482_v52 = vld [vmem:[%s4356_s1 + $0xdd8] sm:$0xff]  ;;  %v432_v53 = vld [vmem:[%s4356_s1 + $0xc48] sm:$0xff] }
  0xbb   :  { %1344 = vmatpush.msrb.mxu2 %v399_v54  ;;  %1363 = vmatpush.msrb.mxu3 %v416_v55  ;;  %v449_v54 = vld [vmem:[%s4356_s1 + $0xcd0] sm:$0xff]  ;;  %v464_v55 = vld [vmem:[%s4356_s1 + $0xd48] sm:$0xff] }
  0xbc   :  { %1305 = vmatpush.msrb.mxu0 %v366_v56  ;;  %1324 = vmatpush.msrb.mxu1 %v383_v57  ;;  %v481_v56 = vld [vmem:[%s4356_s1 + $0xdd0] sm:$0xff]  ;;  %v431_v57 = vld [vmem:[%s4356_s1 + $0xc40] sm:$0xff] }
  0xbd   :  { %1345 = vmatpush.msrb.mxu2 %v398_v58  ;;  %1364 = vmatpush.msrb.mxu3 %v415_v59  ;;  %v448_v58 = vld [vmem:[%s4356_s1 + $0xcc8] sm:$0xff]  ;;  %v463_v59 = vld [vmem:[%s4356_s1 + $0xd40] sm:$0xff] }
  0xbe   :  { %1306 = vmatpush.msrb.mxu0 %v365_v60  ;;  %1325 = vmatpush.msrb.mxu1 %v382_v61  ;;  %v480_v60 = vld [vmem:[%s4356_s1 + $0xdc8] sm:$0xff]  ;;  %v430_v61 = vld [vmem:[%s4356_s1 + $0xc38] sm:$0xff] }
  0xbf   :  { %1346 = vmatpush.msrb.mxu2 %v397_v62  ;;  %1365 = vmatpush.msrb.mxu3 %v414_v63  ;;  %v447_v62 = vld [vmem:[%s4356_s1 + $0xcc0] sm:$0xff]  ;;  %v462_v63 = vld [vmem:[%s4356_s1 + $0xd38] sm:$0xff] }
  0xc0   :  { %1307 = vmatpush.msrb.mxu0 %v364_v0  ;;  %1326 = vmatpush.msrb.mxu1 %v381_v1  ;;  %v479_v0 = vld [vmem:[%s4356_s1 + $0xdc0] sm:$0xff]  ;;  %v429_v1 = vld [vmem:[%s4356_s1 + $0xc30] sm:$0xff] }
  0xc1   :  { %1347 = vmatpush.msrb.mxu2 %v396_v2  ;;  %1366 = vmatpush.msrb.mxu3 %v413_v3  ;;  %v446_v2 = vld [vmem:[%s4356_s1 + $0xcb8] sm:$0xff]  ;;  %v461_v3 = vld [vmem:[%s4356_s1 + $0xd30] sm:$0xff] }
  0xc2   :  { %1308 = vmatpush.msrb.mxu0 %v363_v4  ;;  %1327 = vmatpush.msrb.mxu1 %v380_v5  ;;  %v478_v4 = vld [vmem:[%s4356_s1 + $0xdb8] sm:$0xff]  ;;  %v428_v5 = vld [vmem:[%s4356_s1 + $0xc28] sm:$0xff] }
  0xc3   :  { %1348 = vmatpush.msrb.mxu2 %v395_v6  ;;  %1367 = vmatpush.msrb.mxu3 %v412_v7  ;;  %v445_v6 = vld [vmem:[%s4356_s1 + $0xcb0] sm:$0xff]  ;;  %v460_v7 = vld [vmem:[%s4356_s1 + $0xd28] sm:$0xff] }
  0xc4   :  { %1309 = vmatpush.msrb.mxu0 %v362_v8  ;;  %1328 = vmatpush.msrb.mxu1 %v379_v9  ;;  %v477_v8 = vld [vmem:[%s4356_s1 + $0xdb0] sm:$0xff]  ;;  %v427_v9 = vld [vmem:[%s4356_s1 + $0xc20] sm:$0xff] }
  0xc5   :  { %1349 = vmatpush.msrb.mxu2 %v394_v10  ;;  %1368 = vmatpush.msrb.mxu3 %v411_v11  ;;  %v444_v10 = vld [vmem:[%s4356_s1 + $0xca8] sm:$0xff]  ;;  %v459_v11 = vld [vmem:[%s4356_s1 + $0xd20] sm:$0xff] }
  0xc6   :  { %1310 = vmatpush.msrb.mxu0 %v361_v12  ;;  %1329 = vmatpush.msrb.mxu1 %v378_v13  ;;  %v476_v12 = vld [vmem:[%s4356_s1 + $0xda8] sm:$0xff]  ;;  %v426_v13 = vld [vmem:[%s4356_s1 + $0xc18] sm:$0xff] }
  0xc7   :  { %1350 = vmatpush.msrb.mxu2 %v393_v14  ;;  %1369 = vmatpush.msrb.mxu3 %v410_v15  ;;  %v443_v14 = vld [vmem:[%s4356_s1 + $0xca0] sm:$0xff]  ;;  %v458_v15 = vld [vmem:[%s4356_s1 + $0xd18] sm:$0xff] }
  0xc8   :  { %1311 = vmatpush.msrb.mxu0 %v360_v16  ;;  %1330 = vmatpush.msrb.mxu1 %v377_v17  ;;  %v475_v16 = vld [vmem:[%s4356_s1 + $0xda0] sm:$0xff]  ;;  %v425_v17 = vld [vmem:[%s4356_s1 + $0xc10] sm:$0xff] }
  0xc9   :  { %1351 = vmatpush.msrb.mxu2 %v392_v19  ;;  %1370 = vmatpush.msrb.mxu3 %v409_v20  ;;  %v457_v19 = vld [vmem:[%s4356_s1 + $0xd10] sm:$0xff]  ;;  %v474_v20 = vld [vmem:[%s4356_s1 + $0xd98] sm:$0xff] }
  0xca   :  { %1312 = vmatpush.msrb.mxu0 %v359_v21  ;;  %1331 = vmatpush.msrb.mxu1 %v376_v22  ;;  %v424_v21 = vld [vmem:[%s4356_s1 + $0xc08] sm:$0xff]  ;;  %v441_v22 = vld [vmem:[%s4356_s1 + $0xc90] sm:$0xff] }
  0xcb   :  { %1352 = vmatpush.msrb.mxu2 %v391_v23  ;;  %1371 = vmatpush.msrb.mxu3 %v408_v24  ;;  %v34_v23 = vld [vmem:[%s4355_s0 + $0x38] sm:$0xff]  ;;  %v456_v24 = vld [vmem:[%s4356_s1 + $0xd08] sm:$0xff] }
  0xcc   :  { %1313 = vmatmul.f32.vlgmr.msrb.gmra.mxu0 %v817_v25  ;;  %1353 = vmatmul.f32.vlgmr.msrb.gmra.mxu2 %v819_v26  ;;  %v473_v25 = vld [vmem:[%s4356_s1 + $0xd90] sm:$0xff]  ;;  %822 = vst [vmem:[#allocation1 + $0x20] ss:$4 sm:$0xff] %v34_v23  ;;  %v423_v26 = vld [vmem:[%s4356_s1 + $0xc00] sm:$0xff]  ;;  %v506_v23 = vld [vmem:[%s4356_s1 + $0xe98] sm:$0xff] }
  0xcd   :  { %1377 = vmatpush.msra.mxu0 %v438_v28  ;;  %1417 = vmatpush.msra.mxu2 %v470_v29  ;;  %v440_v28 = vld [vmem:[%s4356_s1 + $0xc88] sm:$0xff]  ;;  %v455_v29 = vld [vmem:[%s4356_s1 + $0xd00] sm:$0xff] }
  0xce   :  { %1332 = vmatpush.msrb.mxu1 %v375_v31  ;;  %1372 = vmatpush.msrb.mxu3 %v407_v27  ;;  %v472_v31 = vld [vmem:[%s4356_s1 + $0xd88] sm:$0xff]  ;;  %v823_v27 = vld.sshfl [vmem:[#allocation1] sm:$0xff pattern:$0x73625140] }
  0xcf   :  { %1333 = vmatmul.f32.vlgmr.msrb.gmra.mxu1 %v818_v32  ;;  %1373 = vmatmul.f32.vlgmr.msrb.gmra.mxu3 %v820_v30  ;;  %v825_v32 = vld.sshfl [vmem:[#allocation1 + $0x10] sm:$0xff pattern:$0x73625140]  ;;  %v502_v30 = vld [vmem:[%s4356_s1 + $0xe78] sm:$0xff] }
  0xd0   :  { %1378 = vmatpush.msra.mxu0 %v437_v33  ;;  %1397 = vmatpush.msra.mxu1 %v454_v34  ;;  %v534_v33 = vld [vmem:[%s4356_s1 + $0xf78] sm:$0xff]  ;;  %v439_v34 = vld [vmem:[%s4356_s1 + $0xc80] sm:$0xff] }
  0xd1   :  { %1418 = vmatpush.msra.mxu2 %v469_v35  ;;  %1437 = vmatpush.msra.mxu3 %v486_v36  ;;  %v471_v35 = vld [vmem:[%s4356_s1 + $0xd80] sm:$0xff]  ;;  %v824_v36 = vld.sshfl [vmem:[#allocation1 + $0x8] sm:$0xff pattern:$0x73625140] }
  0xd2   :  { %1379 = vmatpush.msra.mxu0 %v436_v37  ;;  %1398 = vmatpush.msra.mxu1 %v453_v38  ;;  %v826_v37 = vld.sshfl [vmem:[#allocation1 + $0x18] sm:$0xff pattern:$0x73625140]  ;;  %v501_v38 = vld [vmem:[%s4356_s1 + $0xe70] sm:$0xff] }
  0xd3   :  { %1419 = vmatpush.msra.mxu2 %v468_v39  ;;  %1438 = vmatpush.msra.mxu3 %v485_v40  ;;  %v518_v39 = vld [vmem:[%s4356_s1 + $0xef8] sm:$0xff]  ;;  %v533_v40 = vld [vmem:[%s4356_s1 + $0xf70] sm:$0xff] }
  0xd4   :  { %1380 = vmatpush.msra.mxu0 %v435_v41  ;;  %1399 = vmatpush.msra.mxu1 %v452_v42  ;;  %v550_v41 = vld [vmem:[%s4356_s1 + $0xff8] sm:$0xff]  ;;  %v500_v42 = vld [vmem:[%s4356_s1 + $0xe68] sm:$0xff] }
  0xd5   :  { %1420 = vmatpush.msra.mxu2 %v467_v43  ;;  %1439 = vmatpush.msra.mxu3 %v484_v44  ;;  %v517_v43 = vld [vmem:[%s4356_s1 + $0xef0] sm:$0xff]  ;;  %v532_v44 = vld [vmem:[%s4356_s1 + $0xf68] sm:$0xff] }
  0xd6   :  { %1381 = vmatpush.msra.mxu0 %v434_v45  ;;  %1400 = vmatpush.msra.mxu1 %v451_v46  ;;  %v549_v45 = vld [vmem:[%s4356_s1 + $0xff0] sm:$0xff]  ;;  %v499_v46 = vld [vmem:[%s4356_s1 + $0xe60] sm:$0xff] }
  0xd7   :  { %1421 = vmatpush.msra.mxu2 %v466_v47  ;;  %1440 = vmatpush.msra.mxu3 %v483_v48  ;;  %v516_v47 = vld [vmem:[%s4356_s1 + $0xee8] sm:$0xff]  ;;  %v531_v48 = vld [vmem:[%s4356_s1 + $0xf60] sm:$0xff] }
  0xd8   :  { %1382 = vmatpush.msra.mxu0 %v433_v49  ;;  %1401 = vmatpush.msra.mxu1 %v450_v50  ;;  %v548_v49 = vld [vmem:[%s4356_s1 + $0xfe8] sm:$0xff]  ;;  %v498_v50 = vld [vmem:[%s4356_s1 + $0xe58] sm:$0xff] }
  0xd9   :  { %1422 = vmatpush.msra.mxu2 %v465_v51  ;;  %1441 = vmatpush.msra.mxu3 %v482_v52  ;;  %v515_v51 = vld [vmem:[%s4356_s1 + $0xee0] sm:$0xff]  ;;  %v530_v52 = vld [vmem:[%s4356_s1 + $0xf58] sm:$0xff] }
  0xda   :  { %1383 = vmatpush.msra.mxu0 %v432_v53  ;;  %1402 = vmatpush.msra.mxu1 %v449_v54  ;;  %v547_v53 = vld [vmem:[%s4356_s1 + $0xfe0] sm:$0xff]  ;;  %v497_v54 = vld [vmem:[%s4356_s1 + $0xe50] sm:$0xff] }
  0xdb   :  { %1423 = vmatpush.msra.mxu2 %v464_v55  ;;  %1442 = vmatpush.msra.mxu3 %v481_v56  ;;  %v514_v55 = vld [vmem:[%s4356_s1 + $0xed8] sm:$0xff]  ;;  %v529_v56 = vld [vmem:[%s4356_s1 + $0xf50] sm:$0xff] }
  0xdc   :  { %1384 = vmatpush.msra.mxu0 %v431_v57  ;;  %1403 = vmatpush.msra.mxu1 %v448_v58  ;;  %v546_v57 = vld [vmem:[%s4356_s1 + $0xfd8] sm:$0xff]  ;;  %v496_v58 = vld [vmem:[%s4356_s1 + $0xe48] sm:$0xff] }
  0xdd   :  { %1424 = vmatpush.msra.mxu2 %v463_v59  ;;  %1443 = vmatpush.msra.mxu3 %v480_v60  ;;  %v513_v59 = vld [vmem:[%s4356_s1 + $0xed0] sm:$0xff]  ;;  %v528_v60 = vld [vmem:[%s4356_s1 + $0xf48] sm:$0xff] }
  0xde   :  { %1385 = vmatpush.msra.mxu0 %v430_v61  ;;  %1404 = vmatpush.msra.mxu1 %v447_v62  ;;  %v545_v61 = vld [vmem:[%s4356_s1 + $0xfd0] sm:$0xff]  ;;  %v495_v62 = vld [vmem:[%s4356_s1 + $0xe40] sm:$0xff] }
  0xdf   :  { %1425 = vmatpush.msra.mxu2 %v462_v63  ;;  %1444 = vmatpush.msra.mxu3 %v479_v0  ;;  %v512_v63 = vld [vmem:[%s4356_s1 + $0xec8] sm:$0xff]  ;;  %v527_v0 = vld [vmem:[%s4356_s1 + $0xf40] sm:$0xff] }
  0xe0   :  { %1386 = vmatpush.msra.mxu0 %v429_v1  ;;  %1405 = vmatpush.msra.mxu1 %v446_v2  ;;  %v544_v1 = vld [vmem:[%s4356_s1 + $0xfc8] sm:$0xff]  ;;  %v494_v2 = vld [vmem:[%s4356_s1 + $0xe38] sm:$0xff] }
  0xe1   :  { %1426 = vmatpush.msra.mxu2 %v461_v3  ;;  %1445 = vmatpush.msra.mxu3 %v478_v4  ;;  %v511_v3 = vld [vmem:[%s4356_s1 + $0xec0] sm:$0xff]  ;;  %v526_v4 = vld [vmem:[%s4356_s1 + $0xf38] sm:$0xff] }
  0xe2   :  { %1387 = vmatpush.msra.mxu0 %v428_v5  ;;  %1406 = vmatpush.msra.mxu1 %v445_v6  ;;  %v543_v5 = vld [vmem:[%s4356_s1 + $0xfc0] sm:$0xff]  ;;  %v493_v6 = vld [vmem:[%s4356_s1 + $0xe30] sm:$0xff] }
  0xe3   :  { %1427 = vmatpush.msra.mxu2 %v460_v7  ;;  %1446 = vmatpush.msra.mxu3 %v477_v8  ;;  %v510_v7 = vld [vmem:[%s4356_s1 + $0xeb8] sm:$0xff]  ;;  %v525_v8 = vld [vmem:[%s4356_s1 + $0xf30] sm:$0xff] }
  0xe4   :  { %1388 = vmatpush.msra.mxu0 %v427_v9  ;;  %1407 = vmatpush.msra.mxu1 %v444_v10  ;;  %v542_v9 = vld [vmem:[%s4356_s1 + $0xfb8] sm:$0xff]  ;;  %v492_v10 = vld [vmem:[%s4356_s1 + $0xe28] sm:$0xff] }
  0xe5   :  { %1428 = vmatpush.msra.mxu2 %v459_v11  ;;  %1447 = vmatpush.msra.mxu3 %v476_v12  ;;  %v509_v11 = vld [vmem:[%s4356_s1 + $0xeb0] sm:$0xff]  ;;  %v524_v12 = vld [vmem:[%s4356_s1 + $0xf28] sm:$0xff] }
  0xe6   :  { %1389 = vmatpush.msra.mxu0 %v426_v13  ;;  %1408 = vmatpush.msra.mxu1 %v443_v14  ;;  %v541_v13 = vld [vmem:[%s4356_s1 + $0xfb0] sm:$0xff]  ;;  %v491_v14 = vld [vmem:[%s4356_s1 + $0xe20] sm:$0xff] }
  0xe7   :  { %1429 = vmatpush.msra.mxu2 %v458_v15  ;;  %1448 = vmatpush.msra.mxu3 %v475_v16  ;;  %v508_v15 = vld [vmem:[%s4356_s1 + $0xea8] sm:$0xff]  ;;  %v523_v16 = vld [vmem:[%s4356_s1 + $0xf20] sm:$0xff] }
  0xe8   :  { %1390 = vmatpush.msra.mxu0 %v425_v17  ;;  %1409 = vmatpush.msra.mxu1 %v442_v18  ;;  %v540_v17 = vld [vmem:[%s4356_s1 + $0xfa8] sm:$0xff]  ;;  %v490_v18 = vld [vmem:[%s4356_s1 + $0xe18] sm:$0xff] }
  0xe9   :  { %1430 = vmatpush.msra.mxu2 %v457_v19  ;;  %1449 = vmatpush.msra.mxu3 %v474_v20  ;;  %v507_v19 = vld [vmem:[%s4356_s1 + $0xea0] sm:$0xff]  ;;  %v522_v20 = vld [vmem:[%s4356_s1 + $0xf18] sm:$0xff] }
  0xea   :  { %1391 = vmatpush.msra.mxu0 %v424_v21  ;;  %1410 = vmatpush.msra.mxu1 %v441_v22  ;;  %v539_v21 = vld [vmem:[%s4356_s1 + $0xfa0] sm:$0xff]  ;;  %v489_v22 = vld [vmem:[%s4356_s1 + $0xe10] sm:$0xff] }
  0xeb   :  { %1431 = vmatpush.msra.mxu2 %v456_v24  ;;  %1450 = vmatpush.msra.mxu3 %v473_v25  ;;  %v521_v24 = vld [vmem:[%s4356_s1 + $0xf10] sm:$0xff]  ;;  %v538_v25 = vld [vmem:[%s4356_s1 + $0xf98] sm:$0xff] }
  0xec   :  { %1392 = vmatpush.msra.mxu0 %v423_v26  ;;  %1411 = vmatpush.msra.mxu1 %v440_v28  ;;  %v488_v26 = vld [vmem:[%s4356_s1 + $0xe08] sm:$0xff]  ;;  %v505_v28 = vld [vmem:[%s4356_s1 + $0xe90] sm:$0xff] }
  0xed   :  { %1432 = vmatpush.msra.mxu2 %v455_v29  ;;  %1451 = vmatpush.msra.mxu3 %v472_v31  ;;  %v35_v29 = vld [vmem:[%s4355_s0 + $0x40] sm:$0xff]  ;;  %v520_v31 = vld [vmem:[%s4356_s1 + $0xf08] sm:$0xff] }
  0xee   :  { %1393 = vmatmul.f32.vlgmr.msra.gmra.mxu0 %v823_v27  ;;  %1433 = vmatmul.f32.vlgmr.msra.gmra.mxu2 %v825_v32  ;;  %v537_v27 = vld [vmem:[%s4356_s1 + $0xf90] sm:$0xff]  ;;  %831 = vst [vmem:[#allocation1] ss:$4 sm:$0xff] %v35_v29  ;;  %v487_v32 = vld [vmem:[%s4356_s1 + $0xe00] sm:$0xff]  ;;  %v570_v29 = vld [vmem:[%s4356_s1 + $0x1098] sm:$0xff] }
  0xef   :  { %1457 = vmatpush.msrb.mxu0 %v502_v30  ;;  %1497 = vmatpush.msrb.mxu2 %v534_v33  ;;  %v504_v30 = vld [vmem:[%s4356_s1 + $0xe88] sm:$0xff]  ;;  %v519_v33 = vld [vmem:[%s4356_s1 + $0xf00] sm:$0xff] }
  0xf0   :  { %1412 = vmatpush.msra.mxu1 %v439_v34  ;;  %1452 = vmatpush.msra.mxu3 %v471_v35  ;;  %v536_v34 = vld [vmem:[%s4356_s1 + $0xf88] sm:$0xff]  ;;  %v827_v35 = vld.sshfl [vmem:[#allocation1 + $0x20] sm:$0xff pattern:$0x73625140] }
  0xf1   :  { %1413 = vmatmul.f32.vlgmr.msra.gmra.mxu1 %v824_v36  ;;  %1453 = vmatmul.f32.vlgmr.msra.gmra.mxu3 %v826_v37  ;;  %v829_v36 = vld.sshfl [vmem:[#allocation1 + $0x30] sm:$0xff pattern:$0x73625140]  ;;  %v566_v37 = vld [vmem:[%s4356_s1 + $0x1078] sm:$0xff] }
  0xf2   :  { %1458 = vmatpush.msrb.mxu0 %v501_v38  ;;  %1477 = vmatpush.msrb.mxu1 %v518_v39  ;;  %v598_v38 = vld [vmem:[%s4356_s1 + $0x1178] sm:$0xff]  ;;  %v503_v39 = vld [vmem:[%s4356_s1 + $0xe80] sm:$0xff] }
  0xf3   :  { %1498 = vmatpush.msrb.mxu2 %v533_v40  ;;  %1517 = vmatpush.msrb.mxu3 %v550_v41  ;;  %v535_v40 = vld [vmem:[%s4356_s1 + $0xf80] sm:$0xff]  ;;  %v828_v41 = vld.sshfl [vmem:[#allocation1 + $0x28] sm:$0xff pattern:$0x73625140] }
  0xf4   :  { %1459 = vmatpush.msrb.mxu0 %v500_v42  ;;  %1478 = vmatpush.msrb.mxu1 %v517_v43  ;;  %v830_v42 = vld.sshfl [vmem:[#allocation1 + $0x38] sm:$0xff pattern:$0x73625140]  ;;  %v565_v43 = vld [vmem:[%s4356_s1 + $0x1070] sm:$0xff] }
  0xf5   :  { %1499 = vmatpush.msrb.mxu2 %v532_v44  ;;  %1518 = vmatpush.msrb.mxu3 %v549_v45  ;;  %v582_v44 = vld [vmem:[%s4356_s1 + $0x10f8] sm:$0xff]  ;;  %v597_v45 = vld [vmem:[%s4356_s1 + $0x1170] sm:$0xff] }
  0xf6   :  { %1460 = vmatpush.msrb.mxu0 %v499_v46  ;;  %1479 = vmatpush.msrb.mxu1 %v516_v47  ;;  %v614_v46 = vld [vmem:[%s4356_s1 + $0x11f8] sm:$0xff]  ;;  %v564_v47 = vld [vmem:[%s4356_s1 + $0x1068] sm:$0xff] }
  0xf7   :  { %1500 = vmatpush.msrb.mxu2 %v531_v48  ;;  %1519 = vmatpush.msrb.mxu3 %v548_v49  ;;  %v581_v48 = vld [vmem:[%s4356_s1 + $0x10f0] sm:$0xff]  ;;  %v596_v49 = vld [vmem:[%s4356_s1 + $0x1168] sm:$0xff] }
  0xf8   :  { %1461 = vmatpush.msrb.mxu0 %v498_v50  ;;  %1480 = vmatpush.msrb.mxu1 %v515_v51  ;;  %v613_v50 = vld [vmem:[%s4356_s1 + $0x11f0] sm:$0xff]  ;;  %v563_v51 = vld [vmem:[%s4356_s1 + $0x1060] sm:$0xff] }
  0xf9   :  { %1501 = vmatpush.msrb.mxu2 %v530_v52  ;;  %1520 = vmatpush.msrb.mxu3 %v547_v53  ;;  %v580_v52 = vld [vmem:[%s4356_s1 + $0x10e8] sm:$0xff]  ;;  %v595_v53 = vld [vmem:[%s4356_s1 + $0x1160] sm:$0xff] }
  0xfa   :  { %1462 = vmatpush.msrb.mxu0 %v497_v54  ;;  %1481 = vmatpush.msrb.mxu1 %v514_v55  ;;  %v612_v54 = vld [vmem:[%s4356_s1 + $0x11e8] sm:$0xff]  ;;  %v562_v55 = vld [vmem:[%s4356_s1 + $0x1058] sm:$0xff] }
  0xfb   :  { %1502 = vmatpush.msrb.mxu2 %v529_v56  ;;  %1521 = vmatpush.msrb.mxu3 %v546_v57  ;;  %v579_v56 = vld [vmem:[%s4356_s1 + $0x10e0] sm:$0xff]  ;;  %v594_v57 = vld [vmem:[%s4356_s1 + $0x1158] sm:$0xff] }
  0xfc   :  { %1463 = vmatpush.msrb.mxu0 %v496_v58  ;;  %1482 = vmatpush.msrb.mxu1 %v513_v59  ;;  %v611_v58 = vld [vmem:[%s4356_s1 + $0x11e0] sm:$0xff]  ;;  %v561_v59 = vld [vmem:[%s4356_s1 + $0x1050] sm:$0xff] }
  0xfd   :  { %1503 = vmatpush.msrb.mxu2 %v528_v60  ;;  %1522 = vmatpush.msrb.mxu3 %v545_v61  ;;  %v578_v60 = vld [vmem:[%s4356_s1 + $0x10d8] sm:$0xff]  ;;  %v593_v61 = vld [vmem:[%s4356_s1 + $0x1150] sm:$0xff] }
  0xfe   :  { %1464 = vmatpush.msrb.mxu0 %v495_v62  ;;  %1483 = vmatpush.msrb.mxu1 %v512_v63  ;;  %v610_v62 = vld [vmem:[%s4356_s1 + $0x11d8] sm:$0xff]  ;;  %v560_v63 = vld [vmem:[%s4356_s1 + $0x1048] sm:$0xff] }
  0xff   :  { %1504 = vmatpush.msrb.mxu2 %v527_v0  ;;  %1523 = vmatpush.msrb.mxu3 %v544_v1  ;;  %v577_v0 = vld [vmem:[%s4356_s1 + $0x10d0] sm:$0xff]  ;;  %v592_v1 = vld [vmem:[%s4356_s1 + $0x1148] sm:$0xff] }
 0x100   :  { %1465 = vmatpush.msrb.mxu0 %v494_v2  ;;  %1484 = vmatpush.msrb.mxu1 %v511_v3  ;;  %v609_v2 = vld [vmem:[%s4356_s1 + $0x11d0] sm:$0xff]  ;;  %v559_v3 = vld [vmem:[%s4356_s1 + $0x1040] sm:$0xff] }
 0x101   :  { %1505 = vmatpush.msrb.mxu2 %v526_v4  ;;  %1524 = vmatpush.msrb.mxu3 %v543_v5  ;;  %v576_v4 = vld [vmem:[%s4356_s1 + $0x10c8] sm:$0xff]  ;;  %v591_v5 = vld [vmem:[%s4356_s1 + $0x1140] sm:$0xff] }
 0x102   :  { %1466 = vmatpush.msrb.mxu0 %v493_v6  ;;  %1485 = vmatpush.msrb.mxu1 %v510_v7  ;;  %v608_v6 = vld [vmem:[%s4356_s1 + $0x11c8] sm:$0xff]  ;;  %v558_v7 = vld [vmem:[%s4356_s1 + $0x1038] sm:$0xff] }
 0x103   :  { %1506 = vmatpush.msrb.mxu2 %v525_v8  ;;  %1525 = vmatpush.msrb.mxu3 %v542_v9  ;;  %v575_v8 = vld [vmem:[%s4356_s1 + $0x10c0] sm:$0xff]  ;;  %v590_v9 = vld [vmem:[%s4356_s1 + $0x1138] sm:$0xff] }
 0x104   :  { %1467 = vmatpush.msrb.mxu0 %v492_v10  ;;  %1486 = vmatpush.msrb.mxu1 %v509_v11  ;;  %v607_v10 = vld [vmem:[%s4356_s1 + $0x11c0] sm:$0xff]  ;;  %v557_v11 = vld [vmem:[%s4356_s1 + $0x1030] sm:$0xff] }
 0x105   :  { %1507 = vmatpush.msrb.mxu2 %v524_v12  ;;  %1526 = vmatpush.msrb.mxu3 %v541_v13  ;;  %v574_v12 = vld [vmem:[%s4356_s1 + $0x10b8] sm:$0xff]  ;;  %v589_v13 = vld [vmem:[%s4356_s1 + $0x1130] sm:$0xff] }
 0x106   :  { %1468 = vmatpush.msrb.mxu0 %v491_v14  ;;  %1487 = vmatpush.msrb.mxu1 %v508_v15  ;;  %v606_v14 = vld [vmem:[%s4356_s1 + $0x11b8] sm:$0xff]  ;;  %v556_v15 = vld [vmem:[%s4356_s1 + $0x1028] sm:$0xff] }
 0x107   :  { %1508 = vmatpush.msrb.mxu2 %v523_v16  ;;  %1527 = vmatpush.msrb.mxu3 %v540_v17  ;;  %v573_v16 = vld [vmem:[%s4356_s1 + $0x10b0] sm:$0xff]  ;;  %v588_v17 = vld [vmem:[%s4356_s1 + $0x1128] sm:$0xff] }
 0x108   :  { %1469 = vmatpush.msrb.mxu0 %v490_v18  ;;  %1488 = vmatpush.msrb.mxu1 %v507_v19  ;;  %v605_v18 = vld [vmem:[%s4356_s1 + $0x11b0] sm:$0xff]  ;;  %v555_v19 = vld [vmem:[%s4356_s1 + $0x1020] sm:$0xff] }
 0x109   :  { %1509 = vmatpush.msrb.mxu2 %v522_v20  ;;  %1528 = vmatpush.msrb.mxu3 %v539_v21  ;;  %v572_v20 = vld [vmem:[%s4356_s1 + $0x10a8] sm:$0xff]  ;;  %v587_v21 = vld [vmem:[%s4356_s1 + $0x1120] sm:$0xff] }
 0x10a   :  { %1470 = vmatpush.msrb.mxu0 %v489_v22  ;;  %1489 = vmatpush.msrb.mxu1 %v506_v23  ;;  %v604_v22 = vld [vmem:[%s4356_s1 + $0x11a8] sm:$0xff]  ;;  %v554_v23 = vld [vmem:[%s4356_s1 + $0x1018] sm:$0xff] }
 0x10b   :  { %1510 = vmatpush.msrb.mxu2 %v521_v24  ;;  %1529 = vmatpush.msrb.mxu3 %v538_v25  ;;  %v571_v24 = vld [vmem:[%s4356_s1 + $0x10a0] sm:$0xff]  ;;  %v586_v25 = vld [vmem:[%s4356_s1 + $0x1118] sm:$0xff] }
 0x10c   :  { %1471 = vmatpush.msrb.mxu0 %v488_v26  ;;  %1490 = vmatpush.msrb.mxu1 %v505_v28  ;;  %v603_v26 = vld [vmem:[%s4356_s1 + $0x11a0] sm:$0xff]  ;;  %v553_v28 = vld [vmem:[%s4356_s1 + $0x1010] sm:$0xff] }
 0x10d   :  { %1511 = vmatpush.msrb.mxu2 %v520_v31  ;;  %1530 = vmatpush.msrb.mxu3 %v537_v27  ;;  %v585_v31 = vld [vmem:[%s4356_s1 + $0x1110] sm:$0xff]  ;;  %v602_v27 = vld [vmem:[%s4356_s1 + $0x1198] sm:$0xff] }
 0x10e   :  { %1472 = vmatpush.msrb.mxu0 %v487_v32  ;;  %1491 = vmatpush.msrb.mxu1 %v504_v30  ;;  %v552_v32 = vld [vmem:[%s4356_s1 + $0x1008] sm:$0xff]  ;;  %v569_v30 = vld [vmem:[%s4356_s1 + $0x1090] sm:$0xff] }
 0x10f   :  { %1512 = vmatpush.msrb.mxu2 %v519_v33  ;;  %1531 = vmatpush.msrb.mxu3 %v536_v34  ;;  %v36_v33 = vld [vmem:[%s4355_s0 + $0x48] sm:$0xff] }
 0x110   :  { %1473 = vmatmul.f32.vlgmr.msrb.gmra.mxu0 %v827_v35  ;;  %1513 = vmatmul.f32.vlgmr.msrb.gmra.mxu2 %v829_v36  ;;  %v584_v34 = vld [vmem:[%s4356_s1 + $0x1108] sm:$0xff]  ;;  %v601_v35 = vld [vmem:[%s4356_s1 + $0x1190] sm:$0xff]  ;;  %832 = vst [vmem:[#allocation1 + $0x20] ss:$4 sm:$0xff] %v36_v33  ;;  %v551_v36 = vld [vmem:[%s4356_s1 + $0x1000] sm:$0xff] }
 0x111   :  { %1537 = vmatpush.msra.mxu0 %v566_v37  ;;  %1577 = vmatpush.msra.mxu2 %v598_v38  ;;  %v568_v37 = vld [vmem:[%s4356_s1 + $0x1088] sm:$0xff]  ;;  %v583_v38 = vld [vmem:[%s4356_s1 + $0x1100] sm:$0xff]  ;;  %v634_v33 = vld [vmem:[%s4356_s1 + $0x1298] sm:$0xff] }
 0x112   :  { %1492 = vmatpush.msrb.mxu1 %v503_v39  ;;  %1532 = vmatpush.msrb.mxu3 %v535_v40  ;;  %v600_v39 = vld [vmem:[%s4356_s1 + $0x1188] sm:$0xff]  ;;  %v833_v40 = vld.sshfl [vmem:[#allocation1] sm:$0xff pattern:$0x73625140] }
 0x113   :  { %1493 = vmatmul.f32.vlgmr.msrb.gmra.mxu1 %v828_v41  ;;  %1533 = vmatmul.f32.vlgmr.msrb.gmra.mxu3 %v830_v42  ;;  %v835_v41 = vld.sshfl [vmem:[#allocation1 + $0x10] sm:$0xff pattern:$0x73625140]  ;;  %v630_v42 = vld [vmem:[%s4356_s1 + $0x1278] sm:$0xff] }
 0x114   :  { %1538 = vmatpush.msra.mxu0 %v565_v43  ;;  %1557 = vmatpush.msra.mxu1 %v582_v44  ;;  %v662_v43 = vld [vmem:[%s4356_s1 + $0x1378] sm:$0xff]  ;;  %v567_v44 = vld [vmem:[%s4356_s1 + $0x1080] sm:$0xff] }
 0x115   :  { %1578 = vmatpush.msra.mxu2 %v597_v45  ;;  %1597 = vmatpush.msra.mxu3 %v614_v46  ;;  %v599_v45 = vld [vmem:[%s4356_s1 + $0x1180] sm:$0xff]  ;;  %v834_v46 = vld.sshfl [vmem:[#allocation1 + $0x8] sm:$0xff pattern:$0x73625140] }
 0x116   :  { %1539 = vmatpush.msra.mxu0 %v564_v47  ;;  %1558 = vmatpush.msra.mxu1 %v581_v48  ;;  %v836_v47 = vld.sshfl [vmem:[#allocation1 + $0x18] sm:$0xff pattern:$0x73625140]  ;;  %v629_v48 = vld [vmem:[%s4356_s1 + $0x1270] sm:$0xff] }
 0x117   :  { %1579 = vmatpush.msra.mxu2 %v596_v49  ;;  %1598 = vmatpush.msra.mxu3 %v613_v50  ;;  %v646_v49 = vld [vmem:[%s4356_s1 + $0x12f8] sm:$0xff]  ;;  %v661_v50 = vld [vmem:[%s4356_s1 + $0x1370] sm:$0xff] }
 0x118   :  { %1540 = vmatpush.msra.mxu0 %v563_v51  ;;  %1559 = vmatpush.msra.mxu1 %v580_v52  ;;  %v678_v51 = vld [vmem:[%s4356_s1 + $0x13f8] sm:$0xff]  ;;  %v628_v52 = vld [vmem:[%s4356_s1 + $0x1268] sm:$0xff] }
 0x119   :  { %1580 = vmatpush.msra.mxu2 %v595_v53  ;;  %1599 = vmatpush.msra.mxu3 %v612_v54  ;;  %v645_v53 = vld [vmem:[%s4356_s1 + $0x12f0] sm:$0xff]  ;;  %v660_v54 = vld [vmem:[%s4356_s1 + $0x1368] sm:$0xff] }
 0x11a   :  { %1541 = vmatpush.msra.mxu0 %v562_v55  ;;  %1560 = vmatpush.msra.mxu1 %v579_v56  ;;  %v677_v55 = vld [vmem:[%s4356_s1 + $0x13f0] sm:$0xff]  ;;  %v627_v56 = vld [vmem:[%s4356_s1 + $0x1260] sm:$0xff] }
 0x11b   :  { %1581 = vmatpush.msra.mxu2 %v594_v57  ;;  %1600 = vmatpush.msra.mxu3 %v611_v58  ;;  %v644_v57 = vld [vmem:[%s4356_s1 + $0x12e8] sm:$0xff]  ;;  %v659_v58 = vld [vmem:[%s4356_s1 + $0x1360] sm:$0xff] }
 0x11c   :  { %1542 = vmatpush.msra.mxu0 %v561_v59  ;;  %1561 = vmatpush.msra.mxu1 %v578_v60  ;;  %v676_v59 = vld [vmem:[%s4356_s1 + $0x13e8] sm:$0xff]  ;;  %v626_v60 = vld [vmem:[%s4356_s1 + $0x1258] sm:$0xff] }
 0x11d   :  { %1582 = vmatpush.msra.mxu2 %v593_v61  ;;  %1601 = vmatpush.msra.mxu3 %v610_v62  ;;  %v643_v61 = vld [vmem:[%s4356_s1 + $0x12e0] sm:$0xff]  ;;  %v658_v62 = vld [vmem:[%s4356_s1 + $0x1358] sm:$0xff] }
 0x11e   :  { %1543 = vmatpush.msra.mxu0 %v560_v63  ;;  %1562 = vmatpush.msra.mxu1 %v577_v0  ;;  %v675_v63 = vld [vmem:[%s4356_s1 + $0x13e0] sm:$0xff]  ;;  %v625_v0 = vld [vmem:[%s4356_s1 + $0x1250] sm:$0xff] }
 0x11f   :  { %1583 = vmatpush.msra.mxu2 %v592_v1  ;;  %1602 = vmatpush.msra.mxu3 %v609_v2  ;;  %v642_v1 = vld [vmem:[%s4356_s1 + $0x12d8] sm:$0xff]  ;;  %v657_v2 = vld [vmem:[%s4356_s1 + $0x1350] sm:$0xff] }
 0x120   :  { %1544 = vmatpush.msra.mxu0 %v559_v3  ;;  %1563 = vmatpush.msra.mxu1 %v576_v4  ;;  %v674_v3 = vld [vmem:[%s4356_s1 + $0x13d8] sm:$0xff]  ;;  %v624_v4 = vld [vmem:[%s4356_s1 + $0x1248] sm:$0xff] }
 0x121   :  { %1584 = vmatpush.msra.mxu2 %v591_v5  ;;  %1603 = vmatpush.msra.mxu3 %v608_v6  ;;  %v641_v5 = vld [vmem:[%s4356_s1 + $0x12d0] sm:$0xff]  ;;  %v656_v6 = vld [vmem:[%s4356_s1 + $0x1348] sm:$0xff] }
 0x122   :  { %1545 = vmatpush.msra.mxu0 %v558_v7  ;;  %1564 = vmatpush.msra.mxu1 %v575_v8  ;;  %v673_v7 = vld [vmem:[%s4356_s1 + $0x13d0] sm:$0xff]  ;;  %v623_v8 = vld [vmem:[%s4356_s1 + $0x1240] sm:$0xff] }
 0x123   :  { %1585 = vmatpush.msra.mxu2 %v590_v9  ;;  %1604 = vmatpush.msra.mxu3 %v607_v10  ;;  %v640_v9 = vld [vmem:[%s4356_s1 + $0x12c8] sm:$0xff]  ;;  %v655_v10 = vld [vmem:[%s4356_s1 + $0x1340] sm:$0xff] }
 0x124   :  { %1546 = vmatpush.msra.mxu0 %v557_v11  ;;  %1565 = vmatpush.msra.mxu1 %v574_v12  ;;  %v672_v11 = vld [vmem:[%s4356_s1 + $0x13c8] sm:$0xff]  ;;  %v622_v12 = vld [vmem:[%s4356_s1 + $0x1238] sm:$0xff] }
 0x125   :  { %1586 = vmatpush.msra.mxu2 %v589_v13  ;;  %1605 = vmatpush.msra.mxu3 %v606_v14  ;;  %v639_v13 = vld [vmem:[%s4356_s1 + $0x12c0] sm:$0xff]  ;;  %v654_v14 = vld [vmem:[%s4356_s1 + $0x1338] sm:$0xff] }
 0x126   :  { %1547 = vmatpush.msra.mxu0 %v556_v15  ;;  %1566 = vmatpush.msra.mxu1 %v573_v16  ;;  %v671_v15 = vld [vmem:[%s4356_s1 + $0x13c0] sm:$0xff]  ;;  %v621_v16 = vld [vmem:[%s4356_s1 + $0x1230] sm:$0xff] }
 0x127   :  { %1587 = vmatpush.msra.mxu2 %v588_v17  ;;  %1606 = vmatpush.msra.mxu3 %v605_v18  ;;  %v638_v17 = vld [vmem:[%s4356_s1 + $0x12b8] sm:$0xff]  ;;  %v653_v18 = vld [vmem:[%s4356_s1 + $0x1330] sm:$0xff] }
 0x128   :  { %1548 = vmatpush.msra.mxu0 %v555_v19  ;;  %1567 = vmatpush.msra.mxu1 %v572_v20  ;;  %v670_v19 = vld [vmem:[%s4356_s1 + $0x13b8] sm:$0xff]  ;;  %v620_v20 = vld [vmem:[%s4356_s1 + $0x1228] sm:$0xff] }
 0x129   :  { %1588 = vmatpush.msra.mxu2 %v587_v21  ;;  %1607 = vmatpush.msra.mxu3 %v604_v22  ;;  %v637_v21 = vld [vmem:[%s4356_s1 + $0x12b0] sm:$0xff]  ;;  %v652_v22 = vld [vmem:[%s4356_s1 + $0x1328] sm:$0xff] }
 0x12a   :  { %1549 = vmatpush.msra.mxu0 %v554_v23  ;;  %1568 = vmatpush.msra.mxu1 %v571_v24  ;;  %v669_v23 = vld [vmem:[%s4356_s1 + $0x13b0] sm:$0xff]  ;;  %v619_v24 = vld [vmem:[%s4356_s1 + $0x1220] sm:$0xff] }
 0x12b   :  { %1589 = vmatpush.msra.mxu2 %v586_v25  ;;  %1608 = vmatpush.msra.mxu3 %v603_v26  ;;  %v636_v25 = vld [vmem:[%s4356_s1 + $0x12a8] sm:$0xff]  ;;  %v651_v26 = vld [vmem:[%s4356_s1 + $0x1320] sm:$0xff] }
 0x12c   :  { %1550 = vmatpush.msra.mxu0 %v553_v28  ;;  %1569 = vmatpush.msra.mxu1 %v570_v29  ;;  %v668_v28 = vld [vmem:[%s4356_s1 + $0x13a8] sm:$0xff]  ;;  %v618_v29 = vld [vmem:[%s4356_s1 + $0x1218] sm:$0xff] }
 0x12d   :  { %1590 = vmatpush.msra.mxu2 %v585_v31  ;;  %1609 = vmatpush.msra.mxu3 %v602_v27  ;;  %v635_v31 = vld [vmem:[%s4356_s1 + $0x12a0] sm:$0xff]  ;;  %v650_v27 = vld [vmem:[%s4356_s1 + $0x1318] sm:$0xff] }
 0x12e   :  { %1551 = vmatpush.msra.mxu0 %v552_v32  ;;  %1570 = vmatpush.msra.mxu1 %v569_v30  ;;  %v667_v32 = vld [vmem:[%s4356_s1 + $0x13a0] sm:$0xff]  ;;  %v617_v30 = vld [vmem:[%s4356_s1 + $0x1210] sm:$0xff] }
 0x12f   :  { %1591 = vmatpush.msra.mxu2 %v584_v34  ;;  %1610 = vmatpush.msra.mxu3 %v601_v35  ;;  %v649_v34 = vld [vmem:[%s4356_s1 + $0x1310] sm:$0xff]  ;;  %v666_v35 = vld [vmem:[%s4356_s1 + $0x1398] sm:$0xff] }
 0x130   :  { %1552 = vmatpush.msra.mxu0 %v551_v36  ;;  %1571 = vmatpush.msra.mxu1 %v568_v37  ;;  %v616_v36 = vld [vmem:[%s4356_s1 + $0x1208] sm:$0xff]  ;;  %v633_v37 = vld [vmem:[%s4356_s1 + $0x1290] sm:$0xff] }
 0x131   :  { %1592 = vmatpush.msra.mxu2 %v583_v38  ;;  %1611 = vmatpush.msra.mxu3 %v600_v39  ;;  %v37_v38 = vld [vmem:[%s4355_s0 + $0x50] sm:$0xff]  ;;  %v648_v39 = vld [vmem:[%s4356_s1 + $0x1308] sm:$0xff] }
 0x132   :  { %1553 = vmatmul.f32.vlgmr.msra.gmra.mxu0 %v833_v40  ;;  %1593 = vmatmul.f32.vlgmr.msra.gmra.mxu2 %v835_v41  ;;  %v665_v40 = vld [vmem:[%s4356_s1 + $0x1390] sm:$0xff]  ;;  %841 = vst [vmem:[#allocation1] ss:$4 sm:$0xff] %v37_v38  ;;  %v615_v41 = vld [vmem:[%s4356_s1 + $0x1200] sm:$0xff]  ;;  %v698_v38 = vld [vmem:[%s4356_s1 + $0x1498] sm:$0xff] }
 0x133   :  { %1617 = vmatpush.msrb.mxu0 %v630_v42  ;;  %1657 = vmatpush.msrb.mxu2 %v662_v43  ;;  %v632_v42 = vld [vmem:[%s4356_s1 + $0x1288] sm:$0xff]  ;;  %v647_v43 = vld [vmem:[%s4356_s1 + $0x1300] sm:$0xff] }
 0x134   :  { %1572 = vmatpush.msra.mxu1 %v567_v44  ;;  %1612 = vmatpush.msra.mxu3 %v599_v45  ;;  %v664_v44 = vld [vmem:[%s4356_s1 + $0x1388] sm:$0xff]  ;;  %v837_v45 = vld.sshfl [vmem:[#allocation1 + $0x20] sm:$0xff pattern:$0x73625140] }
 0x135   :  { %1573 = vmatmul.f32.vlgmr.msra.gmra.mxu1 %v834_v46  ;;  %1613 = vmatmul.f32.vlgmr.msra.gmra.mxu3 %v836_v47  ;;  %v839_v46 = vld.sshfl [vmem:[#allocation1 + $0x30] sm:$0xff pattern:$0x73625140]  ;;  %v694_v47 = vld [vmem:[%s4356_s1 + $0x1478] sm:$0xff] }
 0x136   :  { %1618 = vmatpush.msrb.mxu0 %v629_v48  ;;  %1637 = vmatpush.msrb.mxu1 %v646_v49  ;;  %v726_v48 = vld [vmem:[%s4356_s1 + $0x1578] sm:$0xff]  ;;  %v631_v49 = vld [vmem:[%s4356_s1 + $0x1280] sm:$0xff] }
 0x137   :  { %1658 = vmatpush.msrb.mxu2 %v661_v50  ;;  %1677 = vmatpush.msrb.mxu3 %v678_v51  ;;  %v663_v50 = vld [vmem:[%s4356_s1 + $0x1380] sm:$0xff]  ;;  %v838_v51 = vld.sshfl [vmem:[#allocation1 + $0x28] sm:$0xff pattern:$0x73625140] }
 0x138   :  { %1619 = vmatpush.msrb.mxu0 %v628_v52  ;;  %1638 = vmatpush.msrb.mxu1 %v645_v53  ;;  %v840_v52 = vld.sshfl [vmem:[#allocation1 + $0x38] sm:$0xff pattern:$0x73625140]  ;;  %v693_v53 = vld [vmem:[%s4356_s1 + $0x1470] sm:$0xff] }
 0x139   :  { %1659 = vmatpush.msrb.mxu2 %v660_v54  ;;  %1678 = vmatpush.msrb.mxu3 %v677_v55  ;;  %v710_v54 = vld [vmem:[%s4356_s1 + $0x14f8] sm:$0xff]  ;;  %v725_v55 = vld [vmem:[%s4356_s1 + $0x1570] sm:$0xff] }
 0x13a   :  { %1620 = vmatpush.msrb.mxu0 %v627_v56  ;;  %1639 = vmatpush.msrb.mxu1 %v644_v57  ;;  %v742_v56 = vld [vmem:[%s4356_s1 + $0x15f8] sm:$0xff]  ;;  %v692_v57 = vld [vmem:[%s4356_s1 + $0x1468] sm:$0xff] }
 0x13b   :  { %1660 = vmatpush.msrb.mxu2 %v659_v58  ;;  %1679 = vmatpush.msrb.mxu3 %v676_v59  ;;  %v709_v58 = vld [vmem:[%s4356_s1 + $0x14f0] sm:$0xff]  ;;  %v724_v59 = vld [vmem:[%s4356_s1 + $0x1568] sm:$0xff] }
 0x13c   :  { %1621 = vmatpush.msrb.mxu0 %v626_v60  ;;  %1640 = vmatpush.msrb.mxu1 %v643_v61  ;;  %v741_v60 = vld [vmem:[%s4356_s1 + $0x15f0] sm:$0xff]  ;;  %v691_v61 = vld [vmem:[%s4356_s1 + $0x1460] sm:$0xff] }
 0x13d   :  { %1661 = vmatpush.msrb.mxu2 %v658_v62  ;;  %1680 = vmatpush.msrb.mxu3 %v675_v63  ;;  %v708_v62 = vld [vmem:[%s4356_s1 + $0x14e8] sm:$0xff]  ;;  %v723_v63 = vld [vmem:[%s4356_s1 + $0x1560] sm:$0xff] }
 0x13e   :  { %1622 = vmatpush.msrb.mxu0 %v625_v0  ;;  %1641 = vmatpush.msrb.mxu1 %v642_v1  ;;  %v740_v0 = vld [vmem:[%s4356_s1 + $0x15e8] sm:$0xff]  ;;  %v690_v1 = vld [vmem:[%s4356_s1 + $0x1458] sm:$0xff] }
 0x13f   :  { %1662 = vmatpush.msrb.mxu2 %v657_v2  ;;  %1681 = vmatpush.msrb.mxu3 %v674_v3  ;;  %v707_v2 = vld [vmem:[%s4356_s1 + $0x14e0] sm:$0xff]  ;;  %v722_v3 = vld [vmem:[%s4356_s1 + $0x1558] sm:$0xff] }
 0x140   :  { %1623 = vmatpush.msrb.mxu0 %v624_v4  ;;  %1642 = vmatpush.msrb.mxu1 %v641_v5  ;;  %v739_v4 = vld [vmem:[%s4356_s1 + $0x15e0] sm:$0xff]  ;;  %v689_v5 = vld [vmem:[%s4356_s1 + $0x1450] sm:$0xff] }
 0x141   :  { %1663 = vmatpush.msrb.mxu2 %v656_v6  ;;  %1682 = vmatpush.msrb.mxu3 %v673_v7  ;;  %v706_v6 = vld [vmem:[%s4356_s1 + $0x14d8] sm:$0xff]  ;;  %v721_v7 = vld [vmem:[%s4356_s1 + $0x1550] sm:$0xff] }
 0x142   :  { %1624 = vmatpush.msrb.mxu0 %v623_v8  ;;  %1643 = vmatpush.msrb.mxu1 %v640_v9  ;;  %v738_v8 = vld [vmem:[%s4356_s1 + $0x15d8] sm:$0xff]  ;;  %v688_v9 = vld [vmem:[%s4356_s1 + $0x1448] sm:$0xff] }
 0x143   :  { %1664 = vmatpush.msrb.mxu2 %v655_v10  ;;  %1683 = vmatpush.msrb.mxu3 %v672_v11  ;;  %v705_v10 = vld [vmem:[%s4356_s1 + $0x14d0] sm:$0xff]  ;;  %v720_v11 = vld [vmem:[%s4356_s1 + $0x1548] sm:$0xff] }
 0x144   :  { %1625 = vmatpush.msrb.mxu0 %v622_v12  ;;  %1644 = vmatpush.msrb.mxu1 %v639_v13  ;;  %v737_v12 = vld [vmem:[%s4356_s1 + $0x15d0] sm:$0xff]  ;;  %v687_v13 = vld [vmem:[%s4356_s1 + $0x1440] sm:$0xff] }
 0x145   :  { %1665 = vmatpush.msrb.mxu2 %v654_v14  ;;  %1684 = vmatpush.msrb.mxu3 %v671_v15  ;;  %v704_v14 = vld [vmem:[%s4356_s1 + $0x14c8] sm:$0xff]  ;;  %v719_v15 = vld [vmem:[%s4356_s1 + $0x1540] sm:$0xff] }
 0x146   :  { %1626 = vmatpush.msrb.mxu0 %v621_v16  ;;  %1645 = vmatpush.msrb.mxu1 %v638_v17  ;;  %v736_v16 = vld [vmem:[%s4356_s1 + $0x15c8] sm:$0xff]  ;;  %v686_v17 = vld [vmem:[%s4356_s1 + $0x1438] sm:$0xff] }
 0x147   :  { %1666 = vmatpush.msrb.mxu2 %v653_v18  ;;  %1685 = vmatpush.msrb.mxu3 %v670_v19  ;;  %v703_v18 = vld [vmem:[%s4356_s1 + $0x14c0] sm:$0xff]  ;;  %v718_v19 = vld [vmem:[%s4356_s1 + $0x1538] sm:$0xff] }
 0x148   :  { %1627 = vmatpush.msrb.mxu0 %v620_v20  ;;  %1646 = vmatpush.msrb.mxu1 %v637_v21  ;;  %v735_v20 = vld [vmem:[%s4356_s1 + $0x15c0] sm:$0xff]  ;;  %v685_v21 = vld [vmem:[%s4356_s1 + $0x1430] sm:$0xff] }
 0x149   :  { %1667 = vmatpush.msrb.mxu2 %v652_v22  ;;  %1686 = vmatpush.msrb.mxu3 %v669_v23  ;;  %v702_v22 = vld [vmem:[%s4356_s1 + $0x14b8] sm:$0xff]  ;;  %v717_v23 = vld [vmem:[%s4356_s1 + $0x1530] sm:$0xff] }
 0x14a   :  { %1628 = vmatpush.msrb.mxu0 %v619_v24  ;;  %1647 = vmatpush.msrb.mxu1 %v636_v25  ;;  %v734_v24 = vld [vmem:[%s4356_s1 + $0x15b8] sm:$0xff]  ;;  %v684_v25 = vld [vmem:[%s4356_s1 + $0x1428] sm:$0xff] }
 0x14b   :  { %1668 = vmatpush.msrb.mxu2 %v651_v26  ;;  %1687 = vmatpush.msrb.mxu3 %v668_v28  ;;  %v701_v26 = vld [vmem:[%s4356_s1 + $0x14b0] sm:$0xff]  ;;  %v716_v28 = vld [vmem:[%s4356_s1 + $0x1528] sm:$0xff] }
 0x14c   :  { %1629 = vmatpush.msrb.mxu0 %v618_v29  ;;  %1648 = vmatpush.msrb.mxu1 %v635_v31  ;;  %v733_v29 = vld [vmem:[%s4356_s1 + $0x15b0] sm:$0xff]  ;;  %v683_v31 = vld [vmem:[%s4356_s1 + $0x1420] sm:$0xff] }
 0x14d   :  { %1669 = vmatpush.msrb.mxu2 %v650_v27  ;;  %1688 = vmatpush.msrb.mxu3 %v667_v32  ;;  %v700_v27 = vld [vmem:[%s4356_s1 + $0x14a8] sm:$0xff]  ;;  %v715_v32 = vld [vmem:[%s4356_s1 + $0x1520] sm:$0xff] }
 0x14e   :  { %1630 = vmatpush.msrb.mxu0 %v617_v30  ;;  %1649 = vmatpush.msrb.mxu1 %v634_v33  ;;  %v732_v30 = vld [vmem:[%s4356_s1 + $0x15a8] sm:$0xff]  ;;  %v682_v33 = vld [vmem:[%s4356_s1 + $0x1418] sm:$0xff] }
 0x14f   :  { %1670 = vmatpush.msrb.mxu2 %v649_v34  ;;  %1689 = vmatpush.msrb.mxu3 %v666_v35  ;;  %v699_v34 = vld [vmem:[%s4356_s1 + $0x14a0] sm:$0xff]  ;;  %v714_v35 = vld [vmem:[%s4356_s1 + $0x1518] sm:$0xff] }
 0x150   :  { %1631 = vmatpush.msrb.mxu0 %v616_v36  ;;  %1650 = vmatpush.msrb.mxu1 %v633_v37  ;;  %v731_v36 = vld [vmem:[%s4356_s1 + $0x15a0] sm:$0xff]  ;;  %v681_v37 = vld [vmem:[%s4356_s1 + $0x1410] sm:$0xff] }
 0x151   :  { %1671 = vmatpush.msrb.mxu2 %v648_v39  ;;  %1690 = vmatpush.msrb.mxu3 %v665_v40  ;;  %v38_v39 = vld [vmem:[%s4355_s0 + $0x58] sm:$0xf]  ;;  %v713_v40 = vld [vmem:[%s4356_s1 + $0x1510] sm:$0xff] }
 0x152   :  { %1632 = vmatpush.msrb.mxu0 %v615_v41  ;;  %1651 = vmatpush.msrb.mxu1 %v632_v42  ;;  %v730_v41 = vld [vmem:[%s4356_s1 + $0x1598] sm:$0xff]  ;;  %842 = vst [vmem:[#allocation1 + $0x20] ss:$4 sm:$0xff] %v38_v39  ;;  %v680_v42 = vld [vmem:[%s4356_s1 + $0x1408] sm:$0xff] }
 0x153   :  { %1672 = vmatpush.msrb.mxu2 %v647_v43  ;;  %1691 = vmatpush.msrb.mxu3 %v664_v44  ;;  %v697_v43 = vld [vmem:[%s4356_s1 + $0x1490] sm:$0xff]  ;;  %v712_v44 = vld [vmem:[%s4356_s1 + $0x1508] sm:$0xff] }
 0x154   :  { %1633 = vmatmul.f32.vlgmr.msrb.gmra.mxu0 %v837_v45  ;;  %1673 = vmatmul.f32.vlgmr.msrb.gmra.mxu2 %v839_v46  ;;  %v729_v45 = vld [vmem:[%s4356_s1 + $0x1590] sm:$0xff]  ;;  %v679_v46 = vld [vmem:[%s4356_s1 + $0x1400] sm:$0xff] }
 0x155   :  { %1697 = vmatpush.msra.mxu0 %v694_v47  ;;  %1737 = vmatpush.msra.mxu2 %v726_v48  ;;  %v696_v47 = vld [vmem:[%s4356_s1 + $0x1488] sm:$0xff]  ;;  %v711_v48 = vld [vmem:[%s4356_s1 + $0x1500] sm:$0xff] }
 0x156   :  { %1652 = vmatpush.msrb.mxu1 %v631_v49  ;;  %1692 = vmatpush.msrb.mxu3 %v663_v50  ;;  %v728_v49 = vld [vmem:[%s4356_s1 + $0x1588] sm:$0xff]  ;;  %v843_v50 = vld.sshfl [vmem:[#allocation1] sm:$0xff pattern:$0x73625140] }
 0x157   :  { %1653 = vmatmul.f32.vlgmr.msrb.gmra.mxu1 %v838_v51  ;;  %1693 = vmatmul.f32.vlgmr.msrb.gmra.mxu3 %v840_v52  ;;  %v845_v51 = vld.sshfl [vmem:[#allocation1 + $0x10] sm:$0xff pattern:$0x73625140]  ;;  %v758_v52 = vld [vmem:[%s4356_s1 + $0x1678] sm:$0xff] }
 0x158   :  { %1698 = vmatpush.msra.mxu0 %v693_v53  ;;  %1717 = vmatpush.msra.mxu1 %v710_v54  ;;  %v695_v53 = vld [vmem:[%s4356_s1 + $0x1480] sm:$0xff] }
 0x159   :  { %1738 = vmatpush.msra.mxu2 %v725_v55  ;;  %1757 = vmatpush.msra.mxu3 %v742_v56  ;;  %v727_v54 = vld [vmem:[%s4356_s1 + $0x1580] sm:$0xff]  ;;  %v844_v55 = vld.sshfl [vmem:[#allocation1 + $0x8] sm:$0xff pattern:$0x73625140] }
 0x15a   :  { %1699 = vmatpush.msra.mxu0 %v692_v57  ;;  %1718 = vmatpush.msra.mxu1 %v709_v58  ;;  %v846_v56 = vld.sshfl [vmem:[#allocation1 + $0x18] sm:$0xff pattern:$0x73625140]  ;;  %v757_v57 = vld [vmem:[%s4356_s1 + $0x1670] sm:$0xff] }
 0x15b   :  { %1739 = vmatpush.msra.mxu2 %v724_v59  ;;  %1758 = vmatpush.msra.mxu3 %v741_v60  ;;  %v773_v58 = vld [vmem:[%s4356_s1 + $0x16f0] sm:$0xff]  ;;  %v756_v59 = vld [vmem:[%s4356_s1 + $0x1668] sm:$0xff] }
 0x15c   :  { %1700 = vmatpush.msra.mxu0 %v691_v61  ;;  %1719 = vmatpush.msra.mxu1 %v708_v62  ;;  %v772_v60 = vld [vmem:[%s4356_s1 + $0x16e8] sm:$0xff]  ;;  %v755_v61 = vld [vmem:[%s4356_s1 + $0x1660] sm:$0xff] }
 0x15d   :  { %1740 = vmatpush.msra.mxu2 %v723_v63  ;;  %1759 = vmatpush.msra.mxu3 %v740_v0  ;;  %v771_v62 = vld [vmem:[%s4356_s1 + $0x16e0] sm:$0xff]  ;;  %v754_v63 = vld [vmem:[%s4356_s1 + $0x1658] sm:$0xff] }
 0x15e   :  { %1701 = vmatpush.msra.mxu0 %v690_v1  ;;  %1720 = vmatpush.msra.mxu1 %v707_v2  ;;  %v770_v0 = vld [vmem:[%s4356_s1 + $0x16d8] sm:$0xff]  ;;  %v753_v1 = vld [vmem:[%s4356_s1 + $0x1650] sm:$0xff] }
 0x15f   :  { %1741 = vmatpush.msra.mxu2 %v722_v3  ;;  %1760 = vmatpush.msra.mxu3 %v739_v4  ;;  %v769_v2 = vld [vmem:[%s4356_s1 + $0x16d0] sm:$0xff]  ;;  %v752_v3 = vld [vmem:[%s4356_s1 + $0x1648] sm:$0xff] }
 0x160   :  { %1702 = vmatpush.msra.mxu0 %v689_v5  ;;  %1721 = vmatpush.msra.mxu1 %v706_v6  ;;  %v768_v4 = vld [vmem:[%s4356_s1 + $0x16c8] sm:$0xff]  ;;  %v751_v5 = vld [vmem:[%s4356_s1 + $0x1640] sm:$0xff] }
 0x161   :  { %1742 = vmatpush.msra.mxu2 %v721_v7  ;;  %1761 = vmatpush.msra.mxu3 %v738_v8  ;;  %v767_v6 = vld [vmem:[%s4356_s1 + $0x16c0] sm:$0xff]  ;;  %v750_v7 = vld [vmem:[%s4356_s1 + $0x1638] sm:$0xff] }
 0x162   :  { %1703 = vmatpush.msra.mxu0 %v688_v9  ;;  %1722 = vmatpush.msra.mxu1 %v705_v10  ;;  %v766_v8 = vld [vmem:[%s4356_s1 + $0x16b8] sm:$0xff]  ;;  %v1944_v9 = vld [vmem:[%s4357_s2] ss:$0 sm:$0xff]  ;;  %v749_v10 = vld [vmem:[%s4356_s1 + $0x1630] sm:$0xff] }
 0x163   :  { %1743 = vmatpush.msra.mxu2 %v720_v11  ;;  %1762 = vmatpush.msra.mxu3 %v737_v12  ;;  %v914_v11 = vpop.f32.mrf.mxu0  ;;  %v765_v12 = vld [vmem:[%s4356_s1 + $0x16b0] sm:$0xff] }
 0x164   :  { %1704 = vmatpush.msra.mxu0 %v687_v13  ;;  %1723 = vmatpush.msra.mxu1 %v704_v14  ;;  %v748_v13 = vld [vmem:[%s4356_s1 + $0x1628] sm:$0xff] }
 0x165   :  { %1744 = vmatpush.msra.mxu2 %v719_v15  ;;  %1763 = vmatpush.msra.mxu3 %v736_v16  ;;  %v764_v14 = vld [vmem:[%s4356_s1 + $0x16a8] sm:$0xff]  ;;  %v915_v15 = vadd.f32 %v1944_v9, %v914_v11  ;;  %v747_v16 = vld [vmem:[%s4356_s1 + $0x1620] sm:$0xff] }
 0x166   :  { %1705 = vmatpush.msra.mxu0 %v686_v17  ;;  %1724 = vmatpush.msra.mxu1 %v703_v18  ;;  %v934_v17 = vpop.f32.mrf.mxu1  ;;  %v763_v18 = vld [vmem:[%s4356_s1 + $0x16a0] sm:$0xff] }
 0x167   :  { %1745 = vmatpush.msra.mxu2 %v718_v19  ;;  %1764 = vmatpush.msra.mxu3 %v735_v20  ;;  %v746_v19 = vld [vmem:[%s4356_s1 + $0x1618] sm:$0xff] }
 0x168   :  { %1706 = vmatpush.msra.mxu0 %v685_v21  ;;  %1725 = vmatpush.msra.mxu1 %v702_v22  ;;  %v762_v20 = vld [vmem:[%s4356_s1 + $0x1698] sm:$0xff]  ;;  %v935_v21 = vadd.f32 %v934_v17, %v915_v15  ;;  %v745_v22 = vld [vmem:[%s4356_s1 + $0x1610] sm:$0xff]  ;;  %v1827_v15 = vld [vmem:[%s4358_s3 + $0x48] sm:$0x7] }
 0x169   :  { %1746 = vmatpush.msra.mxu2 %v717_v23  ;;  %1765 = vmatpush.msra.mxu3 %v734_v24  ;;  %v954_v23 = vpop.f32.mrf.mxu2  ;;  %v761_v24 = vld [vmem:[%s4356_s1 + $0x1690] sm:$0xff] }
 0x16a   :  { %1707 = vmatpush.msra.mxu0 %v684_v25  ;;  %1726 = vmatpush.msra.mxu1 %v701_v26  ;;  %v744_v25 = vld [vmem:[%s4356_s1 + $0x1608] sm:$0xff] }
 0x16b   :  { %1747 = vmatpush.msra.mxu2 %v716_v28  ;;  %1766 = vmatpush.msra.mxu3 %v733_v29  ;;  %v760_v26 = vld [vmem:[%s4356_s1 + $0x1688] sm:$0xff]  ;;  %v955_v28 = vadd.f32 %v954_v23, %v935_v21  ;;  %v743_v29 = vld [vmem:[%s4356_s1 + $0x1600] sm:$0xff]  ;;  %v1824_v21 = vld [vmem:[%s4358_s3 + $0x30] sm:$0xff] }
 0x16c   :  { %1708 = vmatpush.msra.mxu0 %v683_v31  ;;  %1727 = vmatpush.msra.mxu1 %v700_v27  ;;  %v974_v31 = vpop.f32.mrf.mxu3  ;;  %v847_v27 = vld.sshfl [vmem:[#allocation1 + $0x20] sm:$0xff pattern:$0x73625140]  ;;  %v1823_v23 = vld [vmem:[%s4358_s3 + $0x28] sm:$0xff] }
 0x16d   :  { %1748 = vmatpush.msra.mxu2 %v715_v32  ;;  %1767 = vmatpush.msra.mxu3 %v732_v30  ;;  %v759_v32 = vld [vmem:[%s4356_s1 + $0x1680] sm:$0xff]  ;;  %v848_v30 = vld.sshfl [vmem:[#allocation1 + $0x28] sm:$0xff pattern:$0x73625140] }
 0x16e   :  { %1709 = vmatpush.msra.mxu0 %v682_v33  ;;  %1728 = vmatpush.msra.mxu1 %v699_v34  ;;  %v975_v33 = vadd.f32 %v974_v31, %v955_v28  ;;  %v994_v34 = vpop.f32.mrf.mxu0 }
 0x16f   :  { %1749 = vmatpush.msra.mxu2 %v714_v35  ;;  %1768 = vmatpush.msra.mxu3 %v731_v36  ;;  %v1014_v36 = vpop.f32.mrf.mxu1 }
 0x170   :  { %1710 = vmatpush.msra.mxu0 %v681_v37  ;;  %1729 = vmatpush.msra.mxu1 %v698_v38  ;;  %v995_v35 = vadd.f32 %v994_v34, %v975_v33 }
 0x171   :  { %1750 = vmatpush.msra.mxu2 %v713_v40  ;;  %1769 = vmatpush.msra.mxu3 %v730_v41  ;;  %v1034_v38 = vpop.f32.mrf.mxu2 }
 0x172   :  { %1711 = vmatpush.msra.mxu0 %v680_v42  ;;  %1730 = vmatpush.msra.mxu1 %v697_v43  ;;  %v1015_v37 = vadd.f32 %v1014_v36, %v995_v35  ;;  %v1821_v35 = vld [vmem:[%s4358_s3 + $0x18] sm:$0xff] }
 0x173   :  { %1751 = vmatpush.msra.mxu2 %v712_v44  ;;  %1770 = vmatpush.msra.mxu3 %v729_v45 }
 0x174   :  { %1712 = vmatpush.msra.mxu0 %v679_v46  ;;  %1731 = vmatpush.msra.mxu1 %v696_v47  ;;  %v1035_v39 = vadd.f32 %v1034_v38, %v1015_v37  ;;  %v1054_v40 = vpop.f32.mrf.mxu3  ;;  %v1820_v38 = vld [vmem:[%s4358_s3 + $0x10] sm:$0xff] }
 0x175   :  { %1752 = vmatpush.msra.mxu2 %v711_v48  ;;  %1771 = vmatpush.msra.mxu3 %v728_v49 }
 0x176   :  { %1713 = vmatmul.f32.vlgmr.msra.gmra.mxu0 %v843_v50  ;;  %1753 = vmatmul.f32.vlgmr.msra.gmra.mxu2 %v845_v51  ;;  %v1074_v41 = vpop.f32.mrf.mxu0  ;;  %v1055_v42 = vadd.f32 %v1054_v40, %v1035_v39  ;;  %v1819_v40 = vld [vmem:[%s4358_s3 + $0x8] sm:$0xff] }
 0x177   :  { %1777 = vmatpush.msrb.mxu0 %v758_v52  ;;  %1732 = vmatpush.msra.mxu1 %v695_v53  ;;  %v1094_v44 = vpop.f32.mrf.mxu1 }
 0x178   :  { %1772 = vmatpush.msra.mxu3 %v727_v54  ;;  %1733 = vmatmul.f32.vlgmr.msra.gmra.mxu1 %v844_v55  ;;  %v1075_v43 = vadd.f32 %v1074_v41, %v1055_v42  ;;  %v1818_v42 = vld [vmem:[%s4358_s3] sm:$0xff] }
 0x179   :  { %1773 = vmatmul.f32.vlgmr.msra.gmra.mxu3 %v846_v56  ;;  %1778 = vmatpush.msrb.mxu0 %v757_v57  ;;  %v1114_v45 = vpop.f32.mrf.mxu2 }
 0x17a   :  { %1798 = vmatpush.msrb.mxu1 %v773_v58  ;;  %v1095_v46 = vadd.f32 %v1094_v44, %v1075_v43  ;;  %1939 = vmatpush.msk.msrb.mxu2 %vm1836_vm1, %v1827_v15 }
 0x17b   :  { %1779 = vmatpush.msrb.mxu0 %v756_v59 }
 0x17c   :  { %1799 = vmatpush.msrb.mxu1 %v772_v60  ;;  %v1115_v47 = vadd.f32 %v1114_v45, %v1095_v46  ;;  %v1134_v48 = vpop.f32.mrf.mxu3  ;;  %v1862_v45 = vld [vmem:[%s4360_s5 + $0x8] sm:$0x3] }
 0x17d   :  { %1780 = vmatpush.msrb.mxu0 %v755_v61  ;;  %1941 = vmatpush.msk.msrb.mxu3 %vm1871_vm2, %v1862_v45 }
 0x17e   :  { %1800 = vmatpush.msrb.mxu1 %v771_v62  ;;  %v1154_v49 = vpop.f32.mrf.mxu0  ;;  %v1135_v50 = vadd.f32 %v1134_v48, %v1115_v47 }
 0x17f   :  { %1781 = vmatpush.msrb.mxu0 %v754_v63  ;;  %v1174_v52 = vpop.f32.mrf.mxu1 }
 0x180   :  { %1801 = vmatpush.msrb.mxu1 %v770_v0  ;;  %v1155_v51 = vadd.f32 %v1154_v49, %v1135_v50 }
 0x181   :  { %1782 = vmatpush.msrb.mxu0 %v753_v1  ;;  %v1194_v53 = vpop.f32.mrf.mxu2 }
 0x182   :  { %1802 = vmatpush.msrb.mxu1 %v769_v2  ;;  %v1175_v54 = vadd.f32 %v1174_v52, %v1155_v51 }
 0x183   :  { %1783 = vmatpush.msrb.mxu0 %v752_v3 }
 0x184   :  { %1803 = vmatpush.msrb.mxu1 %v768_v4  ;;  %v1195_v55 = vadd.f32 %v1194_v53, %v1175_v54  ;;  %v1214_v56 = vpop.f32.mrf.mxu3 }
 0x185   :  { %1784 = vmatpush.msrb.mxu0 %v751_v5 }
 0x186   :  { %1804 = vmatpush.msrb.mxu1 %v767_v6  ;;  %v1234_v57 = vpop.f32.mrf.mxu0  ;;  %v1215_v58 = vadd.f32 %v1214_v56, %v1195_v55 }
 0x187   :  { %1785 = vmatpush.msrb.mxu0 %v750_v7  ;;  %v1254_v60 = vpop.f32.mrf.mxu1 }
 0x188   :  { %1805 = vmatpush.msrb.mxu1 %v766_v8  ;;  %v1235_v59 = vadd.f32 %v1234_v57, %v1215_v58 }
 0x189   :  { %1786 = vmatpush.msrb.mxu0 %v749_v10  ;;  %v1274_v61 = vpop.f32.mrf.mxu2 }
 0x18a   :  { %1806 = vmatpush.msrb.mxu1 %v765_v12  ;;  %v1255_v62 = vadd.f32 %v1254_v60, %v1235_v59 }
 0x18b   :  { %1787 = vmatpush.msrb.mxu0 %v748_v13 }
 0x18c   :  { %1807 = vmatpush.msrb.mxu1 %v764_v14  ;;  %v1275_v63 = vadd.f32 %v1274_v61, %v1255_v62  ;;  %v1294_v0 = vpop.f32.mrf.mxu3 }
 0x18d   :  { %1788 = vmatpush.msrb.mxu0 %v747_v16  ;;  %v1826_v16 = vld [vmem:[%s4358_s3 + $0x40] sm:$0xff] }
 0x18e   :  { %1808 = vmatpush.msrb.mxu1 %v763_v18  ;;  %v1314_v1 = vpop.f32.mrf.mxu0  ;;  %v1295_v2 = vadd.f32 %v1294_v0, %v1275_v63  ;;  %1847 = vmatpush.msrb.mxu2 %v1826_v16 }
 0x18f   :  { %1789 = vmatpush.msrb.mxu0 %v746_v19  ;;  %v1334_v4 = vpop.f32.mrf.mxu1  ;;  %v1825_v19 = vld [vmem:[%s4358_s3 + $0x38] sm:$0xff] }
 0x190   :  { %1809 = vmatpush.msrb.mxu1 %v762_v20  ;;  %v1315_v3 = vadd.f32 %v1314_v1, %v1295_v2  ;;  %1848 = vmatpush.msrb.mxu2 %v1825_v19  ;;  %v1861_v2 = vld [vmem:[%s4360_s5] sm:$0xff] }
 0x191   :  { %1790 = vmatpush.msrb.mxu0 %v745_v22  ;;  %v1354_v5 = vpop.f32.mrf.mxu2  ;;  %1890 = vmatpush.msrb.mxu3 %v1861_v2 }
 0x192   :  { %1810 = vmatpush.msrb.mxu1 %v761_v24  ;;  %v1335_v6 = vadd.f32 %v1334_v4, %v1315_v3  ;;  %1849 = vmatpush.msrb.mxu2 %v1824_v21  ;;  %v1945_v3 = vld [vmem:[%s4359_s4] ss:$0 sm:$0xff]  ;;  %s1977_s4 = smov [#allocation2]  }
 0x193   :  { %1791 = vmatpush.msrb.mxu0 %v744_v25  ;;  %s1927_s5 = sshll.u32 %s1977_s4, 4  ;;  %s1928_s5 = int_to_ptr.vmem [resolvable:$true] %s1927_s5 }
 0x194   :  { %1811 = vmatpush.msrb.mxu1 %v760_v26  ;;  %v1355_v7 = vadd.f32 %v1354_v5, %v1335_v6  ;;  %v1374_v8 = vpop.f32.mrf.mxu3  ;;  %v1822_v26 = vld [vmem:[%s4358_s3 + $0x20] sm:$0xff]  ;;  %1850 = vmatpush.msrb.mxu2 %v1823_v23 }
 0x195   :  { %1792 = vmatpush.msrb.mxu0 %v743_v29 }
 0x196   :  { %1793 = vmatmul.f32.vlgmr.msrb.gmra.mxu0 %v847_v27  ;;  %1812 = vmatpush.msrb.mxu1 %v759_v32  ;;  %v1394_v9 = vpop.f32.mrf.mxu0  ;;  %v1375_v10 = vadd.f32 %v1374_v8, %v1355_v7  ;;  %v1946_v7 = vld [vmem:[%s4361_s6] ss:$0 sm:$0xff] }
 0x197   :  { %1938 = vmatmul.msk.f32.vlgmr.msrb.gmra.mxu1 %vm894_vm0, %v848_v30  ;;  %v1414_v12 = vpop.f32.mrf.mxu1  ;;  %1851 = vmatpush.msrb.mxu2 %v1822_v26 }
 0x198   :  { %v1395_v11 = vadd.f32 %v1394_v9, %v1375_v10 }
 0x199   :  { %v1434_v13 = vpop.f32.mrf.mxu2  ;;  %1852 = vmatpush.msrb.mxu2 %v1821_v35 }
 0x19a   :  { %v1415_v14 = vadd.f32 %v1414_v12, %v1395_v11 }
 0x19b   :  { %1853 = vmatpush.msrb.mxu2 %v1820_v38 }
 0x19c   :  { %v1435_v17 = vadd.f32 %v1434_v13, %v1415_v14  ;;  %v1454_v18 = vpop.f32.mrf.mxu3 }
 0x19d   :  { %1854 = vmatpush.msrb.mxu2 %v1819_v40 }
 0x19e   :  { %v1474_v20 = vpop.f32.mrf.mxu0  ;;  %v1455_v22 = vadd.f32 %v1454_v18, %v1435_v17 }
 0x19f   :  { %v1494_v25 = vpop.f32.mrf.mxu1  ;;  %1855 = vmatpush.msrb.mxu2 %v1818_v42 }
 0x1a0   :  { %v1475_v24 = vadd.f32 %v1474_v20, %v1455_v22 }
 0x1a1   :  { %v1514_v28 = vpop.f32.mrf.mxu2 }
 0x1a2   :  { %v1495_v29 = vadd.f32 %v1494_v25, %v1475_v24 }
 0x1a4   :  { %v1515_v31 = vadd.f32 %v1514_v28, %v1495_v29  ;;  %v1534_v27 = vpop.f32.mrf.mxu3 }
 0x1a6   :  { %v1535_v30 = vadd.f32 %v1534_v27, %v1515_v31 }
 0x1af   :  { %v1554_v32 = vpop.f32.mrf.mxu0 }
 0x1b0   :  { %v1555_v33 = vadd.f32 %v1554_v32, %v1535_v30 }
 0x1b2   :  { %v1574_v34 = vpop.f32.mrf.mxu1 }
 0x1b3   :  { %v1575_v37 = vadd.f32 %v1574_v34, %v1555_v33 }
 0x1b5   :  { %v1594_v36 = vpop.f32.mrf.mxu2 }
 0x1b6   :  { %v1595_v39 = vadd.f32 %v1594_v36, %v1575_v37 }
 0x1b8   :  { %v1614_v41 = vpop.f32.mrf.mxu3 }
 0x1b9   :  { %v1615_v44 = vadd.f32 %v1614_v41, %v1595_v39 }
 0x1d1   :  { %v1634_v43 = vpop.f32.mrf.mxu0 }
 0x1d2   :  { %v1635_v46 = vadd.f32 %v1634_v43, %v1615_v44 }
 0x1d4   :  { %v1654_v47 = vpop.f32.mrf.mxu1 }
 0x1d5   :  { %v1655_v49 = vadd.f32 %v1654_v47, %v1635_v46 }
 0x1d7   :  { %v1674_v48 = vpop.f32.mrf.mxu2 }
 0x1d8   :  { %v1675_v50 = vadd.f32 %v1674_v48, %v1655_v49 }
 0x1da   :  { %v1694_v51 = vpop.f32.mrf.mxu3 }
 0x1db   :  { %v1695_v53 = vadd.f32 %v1694_v51, %v1675_v50 }
 0x1f3   :  { %v1714_v52 = vpop.f32.mrf.mxu0 }
 0x1f4   :  { %v1715_v54 = vadd.f32 %v1714_v52, %v1695_v53 }
 0x1f5   :  { %v1734_v55 = vpop.f32.mrf.mxu1 }
 0x1f6   :  { %v1735_v57 = vadd.f32 %v1734_v55, %v1715_v54 }
 0x1f9   :  { %v1754_v56 = vpop.f32.mrf.mxu2 }
 0x1fa   :  { %v1755_v58 = vadd.f32 %v1754_v56, %v1735_v57 }
 0x1fc   :  { %v1774_v59 = vpop.f32.mrf.mxu3 }
 0x1fd   :  { %v1775_v60 = vadd.f32 %v1774_v59, %v1755_v58 }
 0x213   :  { %v1794_v61 = vpop.f32.mrf.mxu0 }
 0x214   :  { %v1795_v62 = vadd.f32 %v1794_v61, %v1775_v60  ;;  %v1814_v63 = vpop.f32.mrf.mxu1 }
 0x216   :  { %v1815_v0 = vadd.f32 %v1814_v63, %v1795_v62 }
 0x218   :  { %v1817_v1 = vmax.f32 %v1815_v0, 0.0 }
 0x21a   :  { %1940 = vmatmul.msk.f32.vlgmr.msrb.gmra.mxu2 %vm1832_vm3, %v1817_v1 }
 0x29d   :  { %v1857_v4 = vpop.f32.mrf.mxu2 }
 0x29e   :  { %v1858_v5 = vadd.f32 %v1945_v3, %v1857_v4 }
 0x2a0   :  { %v1860_v6 = vmax.f32 %v1858_v5, 0.0 }
 0x2a2   :  { %1942 = vmatmul.msk.f32.vlgmr.msrb.gmra.mxu3 %vm1867_vm4, %v1860_v6 }
 0x325   :  { %v1892_v8 = vpop.f32.mrf.mxu3 }
 0x326   :  { %v1893_v9 = vadd.f32 %v1946_v7, %v1892_v8 }
 0x328   :  { %v1895_v10 = vmax.f32 %v1893_v9, 0.0 }
 0x32a   :  { %v1897_v11 = vsel %vm1896_vm5, %v1895_v10, -inf }
 0x32b   :  { %1898 = vmax.xlane.f32.xlu0 %v1897_v11 }
 0x39e   :  { %v1899_v12 = vpop.xlane.xlu0 %1898 }
 0x39f   :  { %v1900_v13 = vsub.f32 %v1895_v10, %v1899_v12 }
 0x3a1   :  { %v1901_v14 = vmul.f32 1.442695, %v1900_v13 }
 0x3a3   :  { %1947 = vpow2.f32 %v1901_v14 }
 0x3a9   :  { %v1948_v15 = vpop.eup %1947 }
 0x3aa   :  { %v1903_v16 = vsel %vm1896_vm5, %v1948_v15, 0.0 }
 0x3ab   :  { %1904 = vadd.xlane.f32.xlu0 %v1903_v16 }
 0x41e   :  { %v1905_v17 = vpop.xlane.xlu0 %1904 }
 0x41f   :  { %1949 = vrcp.f32 %v1905_v17  ;;  %v1917_v21 = vand.u32 2147483648, %v1905_v17  ;;  %v1915_v23 = vand.u32 2147483647, %v1905_v17  ;;  %vm1911_vm7 = vweird.f32 %v1905_v17 }
 0x421   :  { %v1918_v25 = vor.u32 1.1754944e-38, %v1917_v21  ;;  %vm1916_vm9 = vcmp.eq.f32.partialorder %v1915_v23, 8.507059e+37 }
 0x425   :  { %v1950_v18 = vpop.eup %1949 }
 0x426   :  { %v1907_v19 = vmul.f32 %v1950_v18, %v1905_v17  ;;  %vm1912_vm6 = vweird.f32 %v1950_v18 }
 0x427   :  { %vm1913_vm8 = vmor %vm1911_vm7, %vm1912_vm6 }
 0x428   :  { %v1908_v20 = vsub.f32 1.0, %v1907_v19 }
 0x42a   :  { %v1909_v22 = vmul.f32 %v1950_v18, %v1908_v20 }
 0x42c   :  { %v1910_v24 = vadd.f32 %v1950_v18, %v1909_v22 }
 0x42e   :  { %v1914_v26 = vsel %vm1913_vm8, %v1950_v18, %v1910_v24 }
 0x42f   :  { %v1919_v28 = vsel %vm1916_vm9, %v1918_v25, %v1914_v26 }
 0x430   :  { %v1920_v29 = vmul.f32 %v1948_v15, %v1919_v28 }
 0x432   :  { %1921 = vst.msk [vmem:[#allocation2] sm:$0x3] %vm1896_vm5, %v1920_v29 }
 0x433   :  { %1932 = dma.vmem_to_hbm [thread:$0]  %s1928_s5, 32, %s1930_s21, [#allocation3]  }
 0x434   :  { %1975 = dma.done.wait [#allocation3], 32  }
 0x435   :  { %1976 = vsyncadd [#allocation3], 4294967264 }
 0x436   :  { %1937 = vsyncpa [#allocation3], 1 }

</bundles_post_ra>
